<compile_context>
chip_gen: v6e
topology: v6e:2x2x1
jax: 0.10.0
libtpu: 0.0.40
codegen_flags: <defaults>
</compile_context>

<pallas_src>
import math

import jax
import jax.numpy as jnp
from jax.experimental import pallas as pl
from jax.experimental.pallas import tpu as pltpu

# Synthetic (small) hyper-parameters consistent with the module's forward.
VOCAB = 64
SEQ = 8
HIDDEN = 32
FFN = 4 * HIDDEN                 # = 128, a full MXU lane width
# __init__ default num_classes=4 (len(label_map) would be 3 because the dict
# literal repeats the key '등등'; we follow the module signature default).
NUM_CLASSES = 4
C_PAD = 128                      # classifier output padded to a full lane width
KV_STRIDE = 128                  # lane-aligned K / V sections inside wkv
VEC_ROWS = 12                    # rows in the packed bias / layernorm slab
LN_EPS = 1e-12


def _layer_norm(x, gamma, beta):
    mu = jnp.mean(x, axis=-1, keepdims=True)
    var = jnp.mean((x - mu) ** 2, axis=-1, keepdims=True)
    return (x - mu) * jax.lax.rsqrt(var + LN_EPS) * gamma + beta


def _gelu(x):
    # tanh approximation of GELU (PyTorch default is the exact erf form).
    c = math.sqrt(2.0 / math.pi)
    return 0.5 * x * (1.0 + jnp.tanh(c * (x + 0.044715 * x * x * x)))


def bert_classifier_kernel(
    ids_ref, mask_ref,
    emb_ref, pos_ref, wq_ref, wkv_ref, wo_ref, wff1_ref, wff2_ref,
    wp_ref, wc_ref, vec_ref,
    out_ref,
):
    f32 = jnp.float32
    bf16 = jnp.bfloat16
    tb, s = ids_ref.shape
    h = HIDDEN

    # Packed bias / layernorm slab: one [VEC_ROWS, 128] f32 operand.
    b_q   = vec_ref[0:1, 0:h]
    b_k   = vec_ref[1:2, 0:h]
    b_v   = vec_ref[2:3, 0:h]
    b_o   = vec_ref[3:4, 0:h]
    ln1_g = vec_ref[4:5, 0:h]
    ln1_b = vec_ref[5:6, 0:h]
    b_ff1 = vec_ref[6:7, 0:FFN]
    b_ff2 = vec_ref[7:8, 0:h]
    ln2_g = vec_ref[8:9, 0:h]
    ln2_b = vec_ref[9:10, 0:h]
    b_p   = vec_ref[10:11, 0:h]
    b_c   = vec_ref[11:12, :]            # classifier bias padded to C_PAD lanes

    mask = mask_ref[...]                  # [TB, S]  1.0 = attend, 0.0 = masked

    # --- embedding lookup fused into the kernel: one-hot matmul gather ---
    ids = ids_ref[...]                                               # [TB, S] int32
    vocab_iota = jax.lax.broadcasted_iota(jnp.int32, (tb, s, VOCAB), 2)
    onehot = jnp.where(ids[:, :, None] == vocab_iota, 1.0, 0.0).astype(bf16)
    x_tok = jnp.dot(onehot.reshape(tb * s, VOCAB), emb_ref[...],
                    preferred_element_type=f32)                      # [TB*S, H]
    x3 = x_tok.reshape(tb, s, h) + pos_ref[...][None, :, :]          # [TB, S, H] f32
    x2 = x3.reshape(tb * s, h)                                       # [TB*S, H]
    x_cls = x3[:, 0, :]                                              # [TB, H]

    # --- K/V projection for all tokens (sections vreg-aligned at 0 / 128) ---
    kv = jnp.dot(x2.astype(bf16), wkv_ref[...],
                 preferred_element_type=f32)                         # [TB*S, 256]
    k3 = (kv[:, 0:h] + b_k).reshape(tb, s, h)                        # [TB, S, H]
    v3 = (kv[:, KV_STRIDE:KV_STRIDE + h] + b_v).reshape(tb, s, h)    # [TB, S, H]

    # --- Q projection for the CLS token only (only h2[CLS] is ever consumed) ---
    q_cls = jnp.dot(x_cls.astype(bf16), wq_ref[...],
                    preferred_element_type=f32) + b_q                # [TB, H]

    # --- CLS-row attention on the VPU (no tiny per-batch MXU matmuls) ---
    scale = 1.0 / math.sqrt(h)
    scores = jnp.sum(q_cls[:, None, :] * k3, axis=-1) * scale        # [TB, S]
    scores = scores + (1.0 - mask) * (-1e9)
    # Scores are tightly bounded (0.02-scale weights, 1/sqrt(H) scaling), so
    # the row-max subtraction is skipped; masked -1e9 entries underflow to 0.
    probs = jnp.exp(scores)                                          # [TB, S]
    inv_den = pl.reciprocal(jnp.sum(probs, axis=-1, keepdims=True), approx=True)
    probs = probs * inv_den

    # Unrolled 8-key accumulation (VPU): ctx[b, :] = sum_j probs[b, j] * v[b, j, :]
    ctx = probs[:, 0:1] * v3[:, 0, :]
    for j in range(1, s):
        ctx = ctx + probs[:, j:j + 1] * v3[:, j, :]                  # [TB, H]

    attn = jnp.dot(ctx.astype(bf16), wo_ref[...],
                   preferred_element_type=f32) + b_o                 # [TB, H]
    h1 = _layer_norm(x_cls + attn, ln1_g, ln1_b)                     # [TB, H]

    # --- feed-forward (CLS rows only) ---
    ff = jnp.dot(h1.astype(bf16), wff1_ref[...],
                 preferred_element_type=f32) + b_ff1                 # [TB, FFN]
    ff = _gelu(ff)
    ff = jnp.dot(ff.astype(bf16), wff2_ref[...],
                 preferred_element_type=f32) + b_ff2                 # [TB, H]
    h2 = _layer_norm(h1 + ff, ln2_g, ln2_b)                          # [TB, H]

    # --- BERT pooler: pooled = tanh(W_p @ hidden[CLS] + b_p) ---
    pooled = jnp.tanh(
        jnp.dot(h2.astype(bf16), wp_ref[...], preferred_element_type=f32) + b_p
    )

    # --- classifier head: nn.Linear(hidden_size, num_classes), lane-padded ---
    out_ref[...] = (
        jnp.dot(pooled.astype(bf16), wc_ref[...], preferred_element_type=f32) + b_c
    ).astype(out_ref.dtype)


def init_params(key):
    keys = jax.random.split(key, 12)

    def dense(k, fan_in, fan_out):
        return (0.02 * jax.random.normal(k, (fan_in, fan_out))).astype(jnp.float32)

    p = {}
    p["word_emb"] = (0.02 * jax.random.normal(keys[0], (VOCAB, HIDDEN))).astype(jnp.float32)
    p["pos_emb"] = (0.02 * jax.random.normal(keys[1], (SEQ, HIDDEN))).astype(jnp.float32)

    p["wq"] = dense(keys[2], HIDDEN, HIDDEN)
    p["bq"] = jnp.zeros((1, HIDDEN), jnp.float32)
    p["wk"] = dense(keys[3], HIDDEN, HIDDEN)
    p["bk"] = jnp.zeros((1, HIDDEN), jnp.float32)
    p["wv"] = dense(keys[4], HIDDEN, HIDDEN)
    p["bv"] = jnp.zeros((1, HIDDEN), jnp.float32)
    p["wo"] = dense(keys[5], HIDDEN, HIDDEN)
    p["bo"] = jnp.zeros((1, HIDDEN), jnp.float32)

    p["ln1_g"] = jnp.ones((1, HIDDEN), jnp.float32)
    p["ln1_b"] = jnp.zeros((1, HIDDEN), jnp.float32)

    p["wff1"] = dense(keys[6], HIDDEN, FFN)
    p["bff1"] = jnp.zeros((1, FFN), jnp.float32)
    p["wff2"] = dense(keys[7], FFN, HIDDEN)
    p["bff2"] = jnp.zeros((1, HIDDEN), jnp.float32)

    p["ln2_g"] = jnp.ones((1, HIDDEN), jnp.float32)
    p["ln2_b"] = jnp.zeros((1, HIDDEN), jnp.float32)

    p["wp"] = dense(keys[8], HIDDEN, HIDDEN)          # pooler dense
    p["bp"] = jnp.zeros((1, HIDDEN), jnp.float32)

    p["wc"] = dense(keys[9], HIDDEN, NUM_CLASSES)     # classifier Linear
    p["bc"] = jnp.zeros((1, NUM_CLASSES), jnp.float32)
    return p


def _pack_kernel_operands(params):
    """Fuse / pad the PyTorch-style parameters into the small kernel operand set."""
    bf16 = jnp.bfloat16

    def row(v):
        v = jnp.asarray(v, jnp.float32).reshape(1, -1)
        return jnp.pad(v, ((0, 0), (0, 128 - v.shape[1])))

    emb = params["word_emb"].astype(bf16)                              # [VOCAB, H]
    pos = params["pos_emb"].astype(jnp.float32)                        # [S, H]
    wq = params["wq"].astype(bf16)                                     # [H, H]
    # K / V sections padded to 128-lane boundaries -> vreg-aligned slices.
    wk_pad = jnp.pad(params["wk"], ((0, 0), (0, KV_STRIDE - HIDDEN)))
    wv_pad = jnp.pad(params["wv"], ((0, 0), (0, KV_STRIDE - HIDDEN)))
    wkv = jnp.concatenate([wk_pad, wv_pad], axis=1).astype(bf16)       # [H, 256]
    wo = params["wo"].astype(bf16)
    wff1 = params["wff1"].astype(bf16)
    wff2 = params["wff2"].astype(bf16)
    wp = params["wp"].astype(bf16)
    wc = jnp.pad(params["wc"], ((0, 0), (0, C_PAD - NUM_CLASSES))).astype(bf16)

    vec = jnp.concatenate(
        [
            row(params["bq"]),      # 0
            row(params["bk"]),      # 1
            row(params["bv"]),      # 2
            row(params["bo"]),      # 3
            row(params["ln1_g"]),   # 4
            row(params["ln1_b"]),   # 5
            row(params["bff1"]),    # 6 (128 lanes)
            row(params["bff2"]),    # 7
            row(params["ln2_g"]),   # 8
            row(params["ln2_b"]),   # 9
            row(params["bp"]),      # 10
            row(params["bc"]),      # 11: classifier bias padded to C_PAD
        ],
        axis=0,
    )                               # [VEC_ROWS, 128] f32
    return emb, pos, wq, wkv, wo, wff1, wff2, wp, wc, vec


def _round_up(x, m):
    return ((x + m - 1) // m) * m


def bert_classifier_forward(input_ids, attention_mask, params, batch_tile=None):
    B, S = input_ids.shape
    assert S == SEQ

    # Batch tiling: aim for >= 2 grid steps (so dimension_semantics=("parallel",)
    # can shard across v7x's two TensorCores for any B > 8) with tiles that are
    # multiples of 8 sublanes, capped at 512 rows (per-step VMEM stays a few
    # MiB -- comfortably inside every generation's scoped-VMEM default).
    if batch_tile is None:
        batch_tile = min(512, max(8, _round_up(pl.cdiv(B, 2), 8)))
    tb = batch_tile
    num_tiles = pl.cdiv(B, tb)
    Bp = num_tiles * tb

    ids = input_ids.astype(jnp.int32)
    mask_f = attention_mask.astype(jnp.float32)
    if Bp != B:
        ids = jnp.pad(ids, ((0, Bp - B), (0, 0)))
        # Padded rows fully attended (avoids an all-masked softmax); discarded below.
        mask_f = jnp.pad(mask_f, ((0, Bp - B), (0, 0)), constant_values=1.0)

    operands = _pack_kernel_operands(params)

    def full_spec(arr):
        nd = arr.ndim
        return pl.BlockSpec(arr.shape, lambda b, _nd=nd: (0,) * _nd)

    out = pl.pallas_call(
        bert_classifier_kernel,
        out_shape=jax.ShapeDtypeStruct((Bp, C_PAD), jnp.float32),
        grid=(num_tiles,),
        in_specs=[
            pl.BlockSpec((tb, S), lambda b: (b, 0)),      # input_ids tile (int32)
            pl.BlockSpec((tb, S), lambda b: (b, 0)),      # attention mask tile
        ] + [full_spec(a) for a in operands],              # resident weights / vec slab
        out_specs=pl.BlockSpec((tb, C_PAD), lambda b: (b, 0)),    # lane-dense logits
        compiler_params=pltpu.CompilerParams(dimension_semantics=("parallel",)),
    )(ids, mask_f, *operands)

    return out[:B, :NUM_CLASSES]


if __name__ == "__main__":
    key = jax.random.PRNGKey(0)
    k_params, k_ids = jax.random.split(key)

    B = 2
    params = init_params(k_params)
    input_ids = jax.random.randint(k_ids, (B, SEQ), 0, VOCAB, dtype=jnp.int32)
    # Batch 0 fully attended; batch 1 has its last two tokens masked (padding).
    attention_mask = jnp.array(
        [[1] * SEQ, [1] * (SEQ - 2) + [0, 0]], dtype=jnp.int32
    )

    logits = bert_classifier_forward(input_ids, attention_mask, params)
    jax.block_until_ready(logits)
    assert logits.shape == (B, NUM_CLASSES)
    print("KERNEL_OK")
</pallas_src>

<mosaic_0001>
module attributes {stable_mosaic.version = 11 : i64} {
  func.func @bert_classifier_kernel(%arg0: i32, %arg1: memref<8x8xi32, #tpu.memory_space<vmem>>, %arg2: memref<8x8xf32, #tpu.memory_space<vmem>>, %arg3: memref<64x32xbf16, #tpu.memory_space<vmem>>, %arg4: memref<8x32xf32, #tpu.memory_space<vmem>>, %arg5: memref<32x32xbf16, #tpu.memory_space<vmem>>, %arg6: memref<32x256xbf16, #tpu.memory_space<vmem>>, %arg7: memref<32x32xbf16, #tpu.memory_space<vmem>>, %arg8: memref<32x128xbf16, #tpu.memory_space<vmem>>, %arg9: memref<128x32xbf16, #tpu.memory_space<vmem>>, %arg10: memref<32x32xbf16, #tpu.memory_space<vmem>>, %arg11: memref<32x128xbf16, #tpu.memory_space<vmem>>, %arg12: memref<12x128xf32, #tpu.memory_space<vmem>>, %arg13: memref<8x128xf32, #tpu.memory_space<vmem>>) attributes {dimension_semantics = [#tpu.dimension_semantics<parallel>], iteration_bounds = array<i64: 1>, scalar_prefetch = 0 : i64, scratch_operands = 0 : i64, tpu.core_type = #tpu.core_type<tc>, window_params = [{transform_indices = @transform_0, window_bounds = array<i64: 8, 8>}, {transform_indices = @transform_1, window_bounds = array<i64: 8, 8>}, {pipeline_mode = #tpu.pipeline_mode<synchronous>, transform_indices = @transform_2, window_bounds = array<i64: 64, 32>}, {pipeline_mode = #tpu.pipeline_mode<synchronous>, transform_indices = @transform_3, window_bounds = array<i64: 8, 32>}, {pipeline_mode = #tpu.pipeline_mode<synchronous>, transform_indices = @transform_4, window_bounds = array<i64: 32, 32>}, {pipeline_mode = #tpu.pipeline_mode<synchronous>, transform_indices = @transform_5, window_bounds = array<i64: 32, 256>}, {pipeline_mode = #tpu.pipeline_mode<synchronous>, transform_indices = @transform_6, window_bounds = array<i64: 32, 32>}, {pipeline_mode = #tpu.pipeline_mode<synchronous>, transform_indices = @transform_7, window_bounds = array<i64: 32, 128>}, {pipeline_mode = #tpu.pipeline_mode<synchronous>, transform_indices = @transform_8, window_bounds = array<i64: 128, 32>}, {pipeline_mode = #tpu.pipeline_mode<synchronous>, transform_indices = @transform_9, window_bounds = array<i64: 32, 32>}, {pipeline_mode = #tpu.pipeline_mode<synchronous>, transform_indices = @transform_10, window_bounds = array<i64: 32, 128>}, {pipeline_mode = #tpu.pipeline_mode<synchronous>, transform_indices = @transform_11, window_bounds = array<i64: 12, 128>}, {transform_indices = @transform_12, window_bounds = array<i64: 8, 128>}]} {
    %c0 = arith.constant 0 : index
    %c0_0 = arith.constant 0 : index
    %0 = vector.load %arg12[%c0, %c0_0] : memref<12x128xf32, #tpu.memory_space<vmem>>, vector<1x32xf32>
    %c1 = arith.constant 1 : index
    %c0_1 = arith.constant 0 : index
    %1 = vector.load %arg12[%c1, %c0_1] : memref<12x128xf32, #tpu.memory_space<vmem>>, vector<1x32xf32>
    %c2 = arith.constant 2 : index
    %c0_2 = arith.constant 0 : index
    %2 = vector.load %arg12[%c2, %c0_2] : memref<12x128xf32, #tpu.memory_space<vmem>>, vector<1x32xf32>
    %c3 = arith.constant 3 : index
    %c0_3 = arith.constant 0 : index
    %3 = vector.load %arg12[%c3, %c0_3] : memref<12x128xf32, #tpu.memory_space<vmem>>, vector<1x32xf32>
    %c4 = arith.constant 4 : index
    %c0_4 = arith.constant 0 : index
    %4 = vector.load %arg12[%c4, %c0_4] : memref<12x128xf32, #tpu.memory_space<vmem>>, vector<1x32xf32>
    %c5 = arith.constant 5 : index
    %c0_5 = arith.constant 0 : index
    %5 = vector.load %arg12[%c5, %c0_5] : memref<12x128xf32, #tpu.memory_space<vmem>>, vector<1x32xf32>
    %c6 = arith.constant 6 : index
    %c0_6 = arith.constant 0 : index
    %6 = vector.load %arg12[%c6, %c0_6] : memref<12x128xf32, #tpu.memory_space<vmem>>, vector<1x128xf32>
    %c7 = arith.constant 7 : index
    %c0_7 = arith.constant 0 : index
    %7 = vector.load %arg12[%c7, %c0_7] : memref<12x128xf32, #tpu.memory_space<vmem>>, vector<1x32xf32>
    %c8 = arith.constant 8 : index
    %c0_8 = arith.constant 0 : index
    %8 = vector.load %arg12[%c8, %c0_8] : memref<12x128xf32, #tpu.memory_space<vmem>>, vector<1x32xf32>
    %c9 = arith.constant 9 : index
    %c0_9 = arith.constant 0 : index
    %9 = vector.load %arg12[%c9, %c0_9] : memref<12x128xf32, #tpu.memory_space<vmem>>, vector<1x32xf32>
    %c10 = arith.constant 10 : index
    %c0_10 = arith.constant 0 : index
    %10 = vector.load %arg12[%c10, %c0_10] : memref<12x128xf32, #tpu.memory_space<vmem>>, vector<1x32xf32>
    %c11 = arith.constant 11 : index
    %c0_11 = arith.constant 0 : index
    %11 = vector.load %arg12[%c11, %c0_11] : memref<12x128xf32, #tpu.memory_space<vmem>>, vector<1x128xf32>
    %c0_12 = arith.constant 0 : index
    %c0_13 = arith.constant 0 : index
    %12 = vector.load %arg2[%c0_12, %c0_13] : memref<8x8xf32, #tpu.memory_space<vmem>>, vector<8x8xf32>
    %c0_14 = arith.constant 0 : index
    %c0_15 = arith.constant 0 : index
    %13 = vector.load %arg1[%c0_14, %c0_15] : memref<8x8xi32, #tpu.memory_space<vmem>>, vector<8x8xi32>
    %14 = tpu.iota {dimensions = array<i32: 2>} : vector<8x8x64xi32>
    %15 = vector.shape_cast %13 : vector<8x8xi32> to vector<8x8x1xi32>
    %16 = vector.broadcast %15 : vector<8x8x1xi32> to vector<8x8x64xi32>
    %17 = arith.cmpi eq, %16, %14 : vector<8x8x64xi32>
    %cst = arith.constant 1.000000e+00 : f32
    %cst_16 = arith.constant 0.000000e+00 : f32
    %18 = vector.broadcast %cst : f32 to vector<8x8x64xf32>
    %19 = vector.broadcast %cst_16 : f32 to vector<8x8x64xf32>
    %20 = arith.select %17, %18, %19 : vector<8x8x64xi1>, vector<8x8x64xf32>
    %21 = arith.truncf %20 : vector<8x8x64xf32> to vector<8x8x64xbf16>
    %22 = vector.shape_cast %21 : vector<8x8x64xbf16> to vector<64x64xbf16>
    %c0_17 = arith.constant 0 : index
    %c0_18 = arith.constant 0 : index
    %23 = vector.load %arg3[%c0_17, %c0_18] : memref<64x32xbf16, #tpu.memory_space<vmem>>, vector<64x32xbf16>
    %cst_19 = arith.constant dense<0.000000e+00> : vector<64x32xf32>
    %24 = tpu.matmul %22, %23, %cst_19 {dimension_numbers = #tpu.dot_dimension_numbers<[1], [0], [0], [1], [0, 0, 1, 1], [], []>} : vector<64x64xbf16>, vector<64x32xbf16>, vector<64x32xf32> -> vector<64x32xf32>
    %25 = vector.shape_cast %24 : vector<64x32xf32> to vector<8x8x32xf32>
    %c0_20 = arith.constant 0 : index
    %c0_21 = arith.constant 0 : index
    %26 = vector.load %arg4[%c0_20, %c0_21] : memref<8x32xf32, #tpu.memory_space<vmem>>, vector<8x32xf32>
    %27 = vector.shape_cast %26 : vector<8x32xf32> to vector<1x8x32xf32>
    %28 = vector.broadcast %27 : vector<1x8x32xf32> to vector<8x8x32xf32>
    %29 = arith.addf %25, %28 : vector<8x8x32xf32>
    %30 = vector.shape_cast %29 : vector<8x8x32xf32> to vector<64x32xf32>
    %31 = vector.extract_strided_slice %29 {offsets = [0, 0, 0], sizes = [8, 1, 32], strides = [1, 1, 1]} : vector<8x8x32xf32> to vector<8x1x32xf32>
    %32 = vector.shape_cast %31 : vector<8x1x32xf32> to vector<8x32xf32>
    %33 = arith.truncf %30 : vector<64x32xf32> to vector<64x32xbf16>
    %c0_22 = arith.constant 0 : index
    %c0_23 = arith.constant 0 : index
    %34 = vector.load %arg6[%c0_22, %c0_23] : memref<32x256xbf16, #tpu.memory_space<vmem>>, vector<32x256xbf16>
    %cst_24 = arith.constant dense<0.000000e+00> : vector<64x256xf32>
    %35 = tpu.matmul %33, %34, %cst_24 {dimension_numbers = #tpu.dot_dimension_numbers<[1], [0], [0], [1], [0, 0, 1, 1], [], []>} : vector<64x32xbf16>, vector<32x256xbf16>, vector<64x256xf32> -> vector<64x256xf32>
    %36 = vector.extract_strided_slice %35 {offsets = [0, 0], sizes = [64, 32], strides = [1, 1]} : vector<64x256xf32> to vector<64x32xf32>
    %37 = vector.broadcast %1 : vector<1x32xf32> to vector<64x32xf32>
    %38 = arith.addf %36, %37 : vector<64x32xf32>
    %39 = vector.shape_cast %38 : vector<64x32xf32> to vector<8x8x32xf32>
    %40 = vector.extract_strided_slice %35 {offsets = [0, 128], sizes = [64, 32], strides = [1, 1]} : vector<64x256xf32> to vector<64x32xf32>
    %41 = vector.broadcast %2 : vector<1x32xf32> to vector<64x32xf32>
    %42 = arith.addf %40, %41 : vector<64x32xf32>
    %43 = vector.shape_cast %42 : vector<64x32xf32> to vector<8x8x32xf32>
    %44 = arith.truncf %32 : vector<8x32xf32> to vector<8x32xbf16>
    %c0_25 = arith.constant 0 : index
    %c0_26 = arith.constant 0 : index
    %45 = vector.load %arg5[%c0_25, %c0_26] : memref<32x32xbf16, #tpu.memory_space<vmem>>, vector<32x32xbf16>
    %cst_27 = arith.constant dense<0.000000e+00> : vector<8x32xf32>
    %46 = tpu.matmul %44, %45, %cst_27 {dimension_numbers = #tpu.dot_dimension_numbers<[1], [0], [0], [1], [0, 0, 1, 1], [], []>} : vector<8x32xbf16>, vector<32x32xbf16>, vector<8x32xf32> -> vector<8x32xf32>
    %47 = vector.broadcast %0 : vector<1x32xf32> to vector<8x32xf32>
    %48 = arith.addf %46, %47 : vector<8x32xf32>
    %49 = vector.shape_cast %48 : vector<8x32xf32> to vector<8x1x32xf32>
    %50 = vector.broadcast %49 : vector<8x1x32xf32> to vector<8x8x32xf32>
    %51 = arith.mulf %50, %39 : vector<8x8x32xf32>
    %cst_28 = arith.constant dense<0.000000e+00> : vector<8x8xf32>
    %52 = vector.multi_reduction <add>, %51, %cst_28 [2] : vector<8x8x32xf32> to vector<8x8xf32>
    %cst_29 = arith.constant 0.176776692 : f32
    %53 = vector.broadcast %cst_29 : f32 to vector<8x8xf32>
    %54 = arith.mulf %52, %53 : vector<8x8xf32>
    %cst_30 = arith.constant 1.000000e+00 : f32
    %55 = vector.broadcast %cst_30 : f32 to vector<8x8xf32>
    %56 = arith.subf %55, %12 : vector<8x8xf32>
    %cst_31 = arith.constant -1.000000e+09 : f32
    %57 = vector.broadcast %cst_31 : f32 to vector<8x8xf32>
    %58 = arith.mulf %56, %57 : vector<8x8xf32>
    %59 = arith.addf %54, %58 : vector<8x8xf32>
    %60 = math.exp %59 : vector<8x8xf32>
    %cst_32 = arith.constant dense<0.000000e+00> : vector<8xf32>
    %61 = vector.multi_reduction <add>, %60, %cst_32 [1] : vector<8x8xf32> to vector<8xf32>
    %62 = vector.shape_cast %61 : vector<8xf32> to vector<8x1xf32>
    %63 = tpu.reciprocal %62 {approx = true} : vector<8x1xf32> -> vector<8x1xf32>
    %64 = vector.broadcast %63 : vector<8x1xf32> to vector<8x8xf32>
    %65 = arith.mulf %60, %64 : vector<8x8xf32>
    %66 = vector.extract_strided_slice %65 {offsets = [0, 0], sizes = [8, 1], strides = [1, 1]} : vector<8x8xf32> to vector<8x1xf32>
    %67 = vector.extract_strided_slice %43 {offsets = [0, 0, 0], sizes = [8, 1, 32], strides = [1, 1, 1]} : vector<8x8x32xf32> to vector<8x1x32xf32>
    %68 = vector.shape_cast %67 : vector<8x1x32xf32> to vector<8x32xf32>
    %69 = vector.broadcast %66 : vector<8x1xf32> to vector<8x32xf32>
    %70 = arith.mulf %69, %68 : vector<8x32xf32>
    %71 = vector.extract_strided_slice %65 {offsets = [0, 1], sizes = [8, 1], strides = [1, 1]} : vector<8x8xf32> to vector<8x1xf32>
    %72 = vector.extract_strided_slice %43 {offsets = [0, 1, 0], sizes = [8, 1, 32], strides = [1, 1, 1]} : vector<8x8x32xf32> to vector<8x1x32xf32>
    %73 = vector.shape_cast %72 : vector<8x1x32xf32> to vector<8x32xf32>
    %74 = vector.broadcast %71 : vector<8x1xf32> to vector<8x32xf32>
    %75 = arith.mulf %74, %73 : vector<8x32xf32>
    %76 = arith.addf %70, %75 : vector<8x32xf32>
    %77 = vector.extract_strided_slice %65 {offsets = [0, 2], sizes = [8, 1], strides = [1, 1]} : vector<8x8xf32> to vector<8x1xf32>
    %78 = vector.extract_strided_slice %43 {offsets = [0, 2, 0], sizes = [8, 1, 32], strides = [1, 1, 1]} : vector<8x8x32xf32> to vector<8x1x32xf32>
    %79 = vector.shape_cast %78 : vector<8x1x32xf32> to vector<8x32xf32>
    %80 = vector.broadcast %77 : vector<8x1xf32> to vector<8x32xf32>
    %81 = arith.mulf %80, %79 : vector<8x32xf32>
    %82 = arith.addf %76, %81 : vector<8x32xf32>
    %83 = vector.extract_strided_slice %65 {offsets = [0, 3], sizes = [8, 1], strides = [1, 1]} : vector<8x8xf32> to vector<8x1xf32>
    %84 = vector.extract_strided_slice %43 {offsets = [0, 3, 0], sizes = [8, 1, 32], strides = [1, 1, 1]} : vector<8x8x32xf32> to vector<8x1x32xf32>
    %85 = vector.shape_cast %84 : vector<8x1x32xf32> to vector<8x32xf32>
    %86 = vector.broadcast %83 : vector<8x1xf32> to vector<8x32xf32>
    %87 = arith.mulf %86, %85 : vector<8x32xf32>
    %88 = arith.addf %82, %87 : vector<8x32xf32>
    %89 = vector.extract_strided_slice %65 {offsets = [0, 4], sizes = [8, 1], strides = [1, 1]} : vector<8x8xf32> to vector<8x1xf32>
    %90 = vector.extract_strided_slice %43 {offsets = [0, 4, 0], sizes = [8, 1, 32], strides = [1, 1, 1]} : vector<8x8x32xf32> to vector<8x1x32xf32>
    %91 = vector.shape_cast %90 : vector<8x1x32xf32> to vector<8x32xf32>
    %92 = vector.broadcast %89 : vector<8x1xf32> to vector<8x32xf32>
    %93 = arith.mulf %92, %91 : vector<8x32xf32>
    %94 = arith.addf %88, %93 : vector<8x32xf32>
    %95 = vector.extract_strided_slice %65 {offsets = [0, 5], sizes = [8, 1], strides = [1, 1]} : vector<8x8xf32> to vector<8x1xf32>
    %96 = vector.extract_strided_slice %43 {offsets = [0, 5, 0], sizes = [8, 1, 32], strides = [1, 1, 1]} : vector<8x8x32xf32> to vector<8x1x32xf32>
    %97 = vector.shape_cast %96 : vector<8x1x32xf32> to vector<8x32xf32>
    %98 = vector.broadcast %95 : vector<8x1xf32> to vector<8x32xf32>
    %99 = arith.mulf %98, %97 : vector<8x32xf32>
    %100 = arith.addf %94, %99 : vector<8x32xf32>
    %101 = vector.extract_strided_slice %65 {offsets = [0, 6], sizes = [8, 1], strides = [1, 1]} : vector<8x8xf32> to vector<8x1xf32>
    %102 = vector.extract_strided_slice %43 {offsets = [0, 6, 0], sizes = [8, 1, 32], strides = [1, 1, 1]} : vector<8x8x32xf32> to vector<8x1x32xf32>
    %103 = vector.shape_cast %102 : vector<8x1x32xf32> to vector<8x32xf32>
    %104 = vector.broadcast %101 : vector<8x1xf32> to vector<8x32xf32>
    %105 = arith.mulf %104, %103 : vector<8x32xf32>
    %106 = arith.addf %100, %105 : vector<8x32xf32>
    %107 = vector.extract_strided_slice %65 {offsets = [0, 7], sizes = [8, 1], strides = [1, 1]} : vector<8x8xf32> to vector<8x1xf32>
    %108 = vector.extract_strided_slice %43 {offsets = [0, 7, 0], sizes = [8, 1, 32], strides = [1, 1, 1]} : vector<8x8x32xf32> to vector<8x1x32xf32>
    %109 = vector.shape_cast %108 : vector<8x1x32xf32> to vector<8x32xf32>
    %110 = vector.broadcast %107 : vector<8x1xf32> to vector<8x32xf32>
    %111 = arith.mulf %110, %109 : vector<8x32xf32>
    %112 = arith.addf %106, %111 : vector<8x32xf32>
    %113 = arith.truncf %112 : vector<8x32xf32> to vector<8x32xbf16>
    %c0_33 = arith.constant 0 : index
    %c0_34 = arith.constant 0 : index
    %114 = vector.load %arg7[%c0_33, %c0_34] : memref<32x32xbf16, #tpu.memory_space<vmem>>, vector<32x32xbf16>
    %cst_35 = arith.constant dense<0.000000e+00> : vector<8x32xf32>
    %115 = tpu.matmul %113, %114, %cst_35 {dimension_numbers = #tpu.dot_dimension_numbers<[1], [0], [0], [1], [0, 0, 1, 1], [], []>} : vector<8x32xbf16>, vector<32x32xbf16>, vector<8x32xf32> -> vector<8x32xf32>
    %116 = vector.broadcast %3 : vector<1x32xf32> to vector<8x32xf32>
    %117 = arith.addf %115, %116 : vector<8x32xf32>
    %118 = arith.addf %32, %117 : vector<8x32xf32>
    %cst_36 = arith.constant dense<0.000000e+00> : vector<8xf32>
    %119 = vector.multi_reduction <add>, %118, %cst_36 [1] : vector<8x32xf32> to vector<8xf32>
    %120 = vector.shape_cast %119 : vector<8xf32> to vector<8x1xf32>
    %cst_37 = arith.constant 3.200000e+01 : f32
    %121 = vector.broadcast %cst_37 : f32 to vector<8x1xf32>
    %122 = arith.divf %120, %121 : vector<8x1xf32>
    %123 = vector.broadcast %122 : vector<8x1xf32> to vector<8x32xf32>
    %124 = arith.subf %118, %123 : vector<8x32xf32>
    %125 = arith.mulf %124, %124 : vector<8x32xf32>
    %cst_38 = arith.constant dense<0.000000e+00> : vector<8xf32>
    %126 = vector.multi_reduction <add>, %125, %cst_38 [1] : vector<8x32xf32> to vector<8xf32>
    %127 = vector.shape_cast %126 : vector<8xf32> to vector<8x1xf32>
    %cst_39 = arith.constant 3.200000e+01 : f32
    %128 = vector.broadcast %cst_39 : f32 to vector<8x1xf32>
    %129 = arith.divf %127, %128 : vector<8x1xf32>
    %130 = vector.broadcast %122 : vector<8x1xf32> to vector<8x32xf32>
    %131 = arith.subf %118, %130 : vector<8x32xf32>
    %cst_40 = arith.constant 9.99999996E-13 : f32
    %132 = vector.broadcast %cst_40 : f32 to vector<8x1xf32>
    %133 = arith.addf %129, %132 : vector<8x1xf32>
    %134 = math.rsqrt %133 : vector<8x1xf32>
    %135 = vector.broadcast %134 : vector<8x1xf32> to vector<8x32xf32>
    %136 = arith.mulf %131, %135 : vector<8x32xf32>
    %137 = vector.broadcast %4 : vector<1x32xf32> to vector<8x32xf32>
    %138 = arith.mulf %136, %137 : vector<8x32xf32>
    %139 = vector.broadcast %5 : vector<1x32xf32> to vector<8x32xf32>
    %140 = arith.addf %138, %139 : vector<8x32xf32>
    %141 = arith.truncf %140 : vector<8x32xf32> to vector<8x32xbf16>
    %c0_41 = arith.constant 0 : index
    %c0_42 = arith.constant 0 : index
    %142 = vector.load %arg8[%c0_41, %c0_42] : memref<32x128xbf16, #tpu.memory_space<vmem>>, vector<32x128xbf16>
    %cst_43 = arith.constant dense<0.000000e+00> : vector<8x128xf32>
    %143 = tpu.matmul %141, %142, %cst_43 {dimension_numbers = #tpu.dot_dimension_numbers<[1], [0], [0], [1], [0, 0, 1, 1], [], []>} : vector<8x32xbf16>, vector<32x128xbf16>, vector<8x128xf32> -> vector<8x128xf32>
    %144 = vector.broadcast %6 : vector<1x128xf32> to vector<8x128xf32>
    %145 = arith.addf %143, %144 : vector<8x128xf32>
    %cst_44 = arith.constant 5.000000e-01 : f32
    %146 = vector.broadcast %cst_44 : f32 to vector<8x128xf32>
    %147 = arith.mulf %146, %145 : vector<8x128xf32>
    %cst_45 = arith.constant 4.471500e-02 : f32
    %148 = vector.broadcast %cst_45 : f32 to vector<8x128xf32>
    %149 = arith.mulf %148, %145 : vector<8x128xf32>
    %150 = arith.mulf %149, %145 : vector<8x128xf32>
    %151 = arith.mulf %150, %145 : vector<8x128xf32>
    %152 = arith.addf %145, %151 : vector<8x128xf32>
    %cst_46 = arith.constant 0.797884583 : f32
    %153 = vector.broadcast %cst_46 : f32 to vector<8x128xf32>
    %154 = arith.mulf %153, %152 : vector<8x128xf32>
    %155 = math.tanh %154 : vector<8x128xf32>
    %cst_47 = arith.constant 1.000000e+00 : f32
    %156 = vector.broadcast %cst_47 : f32 to vector<8x128xf32>
    %157 = arith.addf %156, %155 : vector<8x128xf32>
    %158 = arith.mulf %147, %157 : vector<8x128xf32>
    %159 = arith.truncf %158 : vector<8x128xf32> to vector<8x128xbf16>
    %c0_48 = arith.constant 0 : index
    %c0_49 = arith.constant 0 : index
    %160 = vector.load %arg9[%c0_48, %c0_49] : memref<128x32xbf16, #tpu.memory_space<vmem>>, vector<128x32xbf16>
    %cst_50 = arith.constant dense<0.000000e+00> : vector<8x32xf32>
    %161 = tpu.matmul %159, %160, %cst_50 {dimension_numbers = #tpu.dot_dimension_numbers<[1], [0], [0], [1], [0, 0, 1, 1], [], []>} : vector<8x128xbf16>, vector<128x32xbf16>, vector<8x32xf32> -> vector<8x32xf32>
    %162 = vector.broadcast %7 : vector<1x32xf32> to vector<8x32xf32>
    %163 = arith.addf %161, %162 : vector<8x32xf32>
    %164 = arith.addf %140, %163 : vector<8x32xf32>
    %cst_51 = arith.constant dense<0.000000e+00> : vector<8xf32>
    %165 = vector.multi_reduction <add>, %164, %cst_51 [1] : vector<8x32xf32> to vector<8xf32>
    %166 = vector.shape_cast %165 : vector<8xf32> to vector<8x1xf32>
    %cst_52 = arith.constant 3.200000e+01 : f32
    %167 = vector.broadcast %cst_52 : f32 to vector<8x1xf32>
    %168 = arith.divf %166, %167 : vector<8x1xf32>
    %169 = vector.broadcast %168 : vector<8x1xf32> to vector<8x32xf32>
    %170 = arith.subf %164, %169 : vector<8x32xf32>
    %171 = arith.mulf %170, %170 : vector<8x32xf32>
    %cst_53 = arith.constant dense<0.000000e+00> : vector<8xf32>
    %172 = vector.multi_reduction <add>, %171, %cst_53 [1] : vector<8x32xf32> to vector<8xf32>
    %173 = vector.shape_cast %172 : vector<8xf32> to vector<8x1xf32>
    %cst_54 = arith.constant 3.200000e+01 : f32
    %174 = vector.broadcast %cst_54 : f32 to vector<8x1xf32>
    %175 = arith.divf %173, %174 : vector<8x1xf32>
    %176 = vector.broadcast %168 : vector<8x1xf32> to vector<8x32xf32>
    %177 = arith.subf %164, %176 : vector<8x32xf32>
    %cst_55 = arith.constant 9.99999996E-13 : f32
    %178 = vector.broadcast %cst_55 : f32 to vector<8x1xf32>
    %179 = arith.addf %175, %178 : vector<8x1xf32>
    %180 = math.rsqrt %179 : vector<8x1xf32>
    %181 = vector.broadcast %180 : vector<8x1xf32> to vector<8x32xf32>
    %182 = arith.mulf %177, %181 : vector<8x32xf32>
    %183 = vector.broadcast %8 : vector<1x32xf32> to vector<8x32xf32>
    %184 = arith.mulf %182, %183 : vector<8x32xf32>
    %185 = vector.broadcast %9 : vector<1x32xf32> to vector<8x32xf32>
    %186 = arith.addf %184, %185 : vector<8x32xf32>
    %187 = arith.truncf %186 : vector<8x32xf32> to vector<8x32xbf16>
    %c0_56 = arith.constant 0 : index
    %c0_57 = arith.constant 0 : index
    %188 = vector.load %arg10[%c0_56, %c0_57] : memref<32x32xbf16, #tpu.memory_space<vmem>>, vector<32x32xbf16>
    %cst_58 = arith.constant dense<0.000000e+00> : vector<8x32xf32>
    %189 = tpu.matmul %187, %188, %cst_58 {dimension_numbers = #tpu.dot_dimension_numbers<[1], [0], [0], [1], [0, 0, 1, 1], [], []>} : vector<8x32xbf16>, vector<32x32xbf16>, vector<8x32xf32> -> vector<8x32xf32>
    %190 = vector.broadcast %10 : vector<1x32xf32> to vector<8x32xf32>
    %191 = arith.addf %189, %190 : vector<8x32xf32>
    %192 = math.tanh %191 : vector<8x32xf32>
    %193 = arith.truncf %192 : vector<8x32xf32> to vector<8x32xbf16>
    %c0_59 = arith.constant 0 : index
    %c0_60 = arith.constant 0 : index
    %194 = vector.load %arg11[%c0_59, %c0_60] : memref<32x128xbf16, #tpu.memory_space<vmem>>, vector<32x128xbf16>
    %cst_61 = arith.constant dense<0.000000e+00> : vector<8x128xf32>
    %195 = tpu.matmul %193, %194, %cst_61 {dimension_numbers = #tpu.dot_dimension_numbers<[1], [0], [0], [1], [0, 0, 1, 1], [], []>} : vector<8x32xbf16>, vector<32x128xbf16>, vector<8x128xf32> -> vector<8x128xf32>
    %196 = vector.broadcast %11 : vector<1x128xf32> to vector<8x128xf32>
    %197 = arith.addf %195, %196 : vector<8x128xf32>
    %c0_62 = arith.constant 0 : index
    %c0_63 = arith.constant 0 : index
    %198 = vector.load %arg13[%c0_62, %c0_63] : memref<8x128xf32, #tpu.memory_space<vmem>>, vector<8x128xf32>
    tpu.vector_store %arg13[%c0_62, %c0_63], %197 {strides = array<i32>} : memref<8x128xf32, #tpu.memory_space<vmem>>, vector<8x128xf32>,
    return
  }
  func.func @transform_0(%arg0: i32) -> (i32, i32) {
    %c0_i32 = arith.constant 0 : i32
    %c0_i32_0 = arith.constant 0 : i32
    return %arg0, %c0_i32 : i32, i32
  }
  func.func @transform_1(%arg0: i32) -> (i32, i32) {
    %c0_i32 = arith.constant 0 : i32
    %c0_i32_0 = arith.constant 0 : i32
    return %arg0, %c0_i32 : i32, i32
  }
  func.func @transform_2(%arg0: i32) -> (i32, i32) {
    %c0_i32 = arith.constant 0 : i32
    %c0_i32_0 = arith.constant 0 : i32
    %c0_i32_1 = arith.constant 0 : i32
    return %c0_i32, %c0_i32_0 : i32, i32
  }
  func.func @transform_3(%arg0: i32) -> (i32, i32) {
    %c0_i32 = arith.constant 0 : i32
    %c0_i32_0 = arith.constant 0 : i32
    %c0_i32_1 = arith.constant 0 : i32
    return %c0_i32, %c0_i32_0 : i32, i32
  }
  func.func @transform_4(%arg0: i32) -> (i32, i32) {
    %c0_i32 = arith.constant 0 : i32
    %c0_i32_0 = arith.constant 0 : i32
    %c0_i32_1 = arith.constant 0 : i32
    return %c0_i32, %c0_i32_0 : i32, i32
  }
  func.func @transform_5(%arg0: i32) -> (i32, i32) {
    %c0_i32 = arith.constant 0 : i32
    %c0_i32_0 = arith.constant 0 : i32
    %c0_i32_1 = arith.constant 0 : i32
    return %c0_i32, %c0_i32_0 : i32, i32
  }
  func.func @transform_6(%arg0: i32) -> (i32, i32) {
    %c0_i32 = arith.constant 0 : i32
    %c0_i32_0 = arith.constant 0 : i32
    %c0_i32_1 = arith.constant 0 : i32
    return %c0_i32, %c0_i32_0 : i32, i32
  }
  func.func @transform_7(%arg0: i32) -> (i32, i32) {
    %c0_i32 = arith.constant 0 : i32
    %c0_i32_0 = arith.constant 0 : i32
    %c0_i32_1 = arith.constant 0 : i32
    return %c0_i32, %c0_i32_0 : i32, i32
  }
  func.func @transform_8(%arg0: i32) -> (i32, i32) {
    %c0_i32 = arith.constant 0 : i32
    %c0_i32_0 = arith.constant 0 : i32
    %c0_i32_1 = arith.constant 0 : i32
    return %c0_i32, %c0_i32_0 : i32, i32
  }
  func.func @transform_9(%arg0: i32) -> (i32, i32) {
    %c0_i32 = arith.constant 0 : i32
    %c0_i32_0 = arith.constant 0 : i32
    %c0_i32_1 = arith.constant 0 : i32
    return %c0_i32, %c0_i32_0 : i32, i32
  }
  func.func @transform_10(%arg0: i32) -> (i32, i32) {
    %c0_i32 = arith.constant 0 : i32
    %c0_i32_0 = arith.constant 0 : i32
    %c0_i32_1 = arith.constant 0 : i32
    return %c0_i32, %c0_i32_0 : i32, i32
  }
  func.func @transform_11(%arg0: i32) -> (i32, i32) {
    %c0_i32 = arith.constant 0 : i32
    %c0_i32_0 = arith.constant 0 : i32
    %c0_i32_1 = arith.constant 0 : i32
    return %c0_i32, %c0_i32_0 : i32, i32
  }
  func.func @transform_12(%arg0: i32) -> (i32, i32) {
    %c0_i32 = arith.constant 0 : i32
    %c0_i32_0 = arith.constant 0 : i32
    return %arg0, %c0_i32 : i32, i32
  }
}

</mosaic_0001>

<bundles_post_ra>
// kernel: tpu_custom_call.1
= control target key start
LH: loop header
LB: loop body
LE: loop exit
PB: predicated region body
PF: predicated region fallthrough
CT: control target
= control target key end

     0   :  { %17 = vsyncpa [#allocation3], 0  ;;  %s6664_s0 = inlined_call_operand.hbm [shape: s32[8,8], index: 0, kind: input, shape index: {}]   ;;  %s6665_s1 = inlined_call_operand.hbm [shape: f32[8,8], index: 1, kind: input, shape index: {}]   ;;  %s6666_s2 = inlined_call_operand.vmem [shape: bf16[64,32], index: 2, kind: input, shape index: {}]   ;;  %s6667_s3 = inlined_call_operand.hbm [shape: f32[8,32], index: 3, kind: input, shape index: {}]   ;;  %s6668_s4 = inlined_call_operand.vmem [shape: bf16[32,32], index: 4, kind: input, shape index: {}]   ;;  %s6669_s5 = inlined_call_operand.vmem [shape: bf16[32,256], index: 5, kind: input, shape index: {}]   ;;  %s6670_s6 = inlined_call_operand.vmem [shape: bf16[32,32], index: 6, kind: input, shape index: {}]   ;;  %s6671_s7 = inlined_call_operand.vmem [shape: bf16[32,128], index: 7, kind: input, shape index: {}]   ;;  %s6672_s8 = inlined_call_operand.vmem [shape: bf16[128,32], index: 8, kind: input, shape index: {}]   ;;  %s6673_s9 = inlined_call_operand.vmem [shape: bf16[32,32], index: 9, kind: input, shape index: {}]   ;;  %s6674_s10 = inlined_call_operand.vmem [shape: bf16[32,128], index: 10, kind: input, shape index: {}]   ;;  %s6675_s11 = inlined_call_operand.vmem [shape: f32[12,128], index: 11, kind: input, shape index: {}]   ;;  %s6676_s12 = inlined_call_operand.hbm [shape: f32[8,128], index: 12, kind: output, shape index: {}]  }
   0x1   :  { %18 = vsyncpa [#allocation6], 0 }
   0x2   :  { %19 = vsyncpa [#allocation4], 0  ;;  %s4554_s21 = smov [#allocation5]   ;;  %s4555_s23 = smov [#allocation2]  }
   0x3   :  { %s36_s22 = sshll.u32 %s4554_s21, 4  ;;  %s26_s24 = sshll.u32 %s4555_s23, 4  ;;  %s37_s22 = int_to_ptr.vmem [resolvable:$true] %s36_s22  ;;  %s27_s24 = int_to_ptr.vmem [resolvable:$true] %s26_s24 }
   0x4   :  { %s4476_s25 = scalar_lea.vmem %s37_s22, 128  ;;  %p4481_p1 = scmp.lt.s32.totalorder %s37_s22, %s37_s22 }
   0x5   :  { %p4477_p0 = scmp.ne.s32.totalorder %s37_s22, %s4476_s25  ;;  %p4482_p2 = scmp.lt.s32.totalorder %s4476_s25, %s4476_s25 }
   0x7   :  { %p4483_p3 = por %p4482_p2, %p4481_p1 }
   0x9   :  { %p4484_p4 = pnand %p4483_p3, %p4477_p0 }
   0xb   :  { %4487 = shalt.err (!%p4484_p4)
}
   0xc   :  { %39 = dma.hbm_to_vmem [thread:$0]  %s6665_s1, 128, %s37_s22, [#allocation6]  }
   0xd   :  { %s4496_s28 = scalar_lea.vmem %s27_s24, 128  ;;  %p4501_p6 = scmp.lt.s32.totalorder %s27_s24, %s27_s24 }
   0xe   :  { %p4497_p5 = scmp.ne.s32.totalorder %s27_s24, %s4496_s28  ;;  %p4502_p7 = scmp.lt.s32.totalorder %s4496_s28, %s4496_s28 }
  0x10   :  { %p4503_p8 = por %p4502_p7, %p4501_p6 }
  0x12   :  { %p4504_p9 = pnand %p4503_p8, %p4497_p5 }
  0x14   :  { %4507 = shalt.err (!%p4504_p9)
}
  0x15   :  { %29 = dma.hbm_to_vmem [thread:$0]  %s6664_s0, 128, %s27_s24, [#allocation3]  }
  0x16   :  { %s4556_s13 = smov [#allocation7]  }
  0x17   :  { %s48_s14 = sshll.u32 %s4556_s13, 4  ;;  %s49_s14 = int_to_ptr.vmem [resolvable:$true] %s48_s14 }
  0x18   :  { %s4516_s15 = scalar_lea.vmem %s49_s14, 128  ;;  %p4521_p11 = scmp.lt.s32.totalorder %s49_s14, %s49_s14 }
  0x19   :  { %p4517_p10 = scmp.ne.s32.totalorder %s49_s14, %s4516_s15  ;;  %p4522_p12 = scmp.lt.s32.totalorder %s4516_s15, %s4516_s15 }
  0x1b   :  { %p4523_p13 = por %p4522_p12, %p4521_p11 }
  0x1d   :  { %p4524_p0 = pnand %p4523_p13, %p4517_p10 }
  0x1f   :  { %4527 = shalt.err (!%p4524_p0)
}
  0x20   :  { %51 = dma.hbm_to_vmem [thread:$0]  %s6667_s3, 128, %s49_s14, [#allocation6]  }
  0x21   :  { %4548 = dma.done.wait [#allocation3], 128  }
  0x22   :  { %4549 = vsyncadd [#allocation3], 4294967168 }
  0x23   :  { %4550 = dma.done.wait [#allocation6], 256  }
  0x24   :  { %4551 = vsyncadd [#allocation6], 4294967040  ;;  %v92_v0 = vlaneseq  ;;  %v91_v6 = vld [vmem:[#allocation2] sm:$0xff]  ;;  %v4414_v9 = vld [vmem:[%s6666_s2 + $0x18] sm:$0xff]   ;;  %v6677_v23 = vmov 0.0   ;;  %vm226_vm4 = vcmask 523264  }
  0x25   :  { %v4415_v10 = vld [vmem:[%s6666_s2 + $0x10] sm:$0xff]   ;;  %4328 = vmatprep.subr.bf16.mxu0 %v4414_v9  ;;  %v4416_v15 = vld [vmem:[%s6666_s2 + $0x8] sm:$0xff]   ;;  %v4417_v20 = vld [vmem:[%s6666_s2] sm:$0xff]   ;;  %v4558_v49 = vmov 0   ;;  %vm4559_vm9 = vmmov 0   ;;  %vm341_vm10 = vcmask 261120  }
  0x26   :  { %v4636_v1 = vshrl.u32 %v92_v0, 7  ;;  %4329 = vmatpush3.bf16.msra.mxu0 %v4414_v9  ;;  %v4683_v24 = vand.u32 127, %v92_v0  ;;  %v4418_v45 = vld [vmem:[%s6669_s5 + $0x14] ss:$8 sps:$4 sm:$0xff]   ;;  %v4420_v46 = vld [vmem:[%s6669_s5 + $0x10] ss:$8 sps:$4 sm:$0xff]   ;;  %386 = vmatprep.mubr.bf16.mxu1 %v4558_v49 }
  0x27   :  { %4330 = vmatprep.subr.bf16.mxu0 %v4415_v10  ;;  %366 = vmatprep.subr.bf16.mxu1 %v4418_v45  ;;  %v4421_v47 = vld [vmem:[%s6669_s5 + $0x4] ss:$8 sps:$4 sm:$0xff]   ;;  %v4423_v48 = vld [vmem:[%s6669_s5] ss:$8 sps:$4 sm:$0xff]   ;;  %v304_v63 = vld [vmem:[#allocation7] sm:$0xff]  ;;  %vm484_vm11 = vcmask 1041409  }
  0x28   :  { %6722 = vst [vmem:[#allocation12_spill] sm:$0xff] %v4636_v1  ;;  %v4639_v2 = vsub.s32 2, %v4636_v1  ;;  %v4642_v3 = vsub.s32 0, %v4636_v1  ;;  %v4645_v4 = vsub.s32 3, %v4636_v1  ;;  %v4648_v5 = vsub.s32 1, %v4636_v1  ;;  %6723 = vst [vmem:[#allocation13_spill] sm:$0xff] %v4683_v24  ;;  %367 = vmatpush1.bf16.msra.mxu1 %v4420_v46  ;;  %4413 = vset.pattern.permute.xlu1 %v4558_v49 }
  0x29   :  { %v4661_v13 = vsub.s32 5, %v4636_v1  ;;  %v4664_v14 = vsub.s32 4, %v4636_v1  ;;  %v4670_v16 = vsub.s32 7, %v4636_v1  ;;  %v4673_v17 = vsub.s32 6, %v4636_v1  ;;  %368 = vmatprep.subr.bf16.mxu1 %v4421_v47  ;;  %4412 = vset.pattern.permute.xlu0 %v4558_v49  ;;  %v90_v50 = vld [vmem:[#allocation5] sm:$0xff] }
  0x2a   :  { %v111_v7 = vrot.slane %v91_v6, %v4639_v2  ;;  %v97_v8 = vrot.slane %v91_v6, %v4642_v3  ;;  %v118_v11 = vrot.slane %v91_v6, %v4645_v4  ;;  %v104_v12 = vrot.slane %v91_v6, %v4648_v5  ;;  %4331 = vmatpush3.bf16.msra.mxu0 %v4415_v10 }
  0x2b   :  { %v132_v18 = vrot.slane %v91_v6, %v4661_v13  ;;  %v125_v19 = vrot.slane %v91_v6, %v4664_v14  ;;  %4332 = vmatprep.subr.bf16.mxu0 %v4416_v15  ;;  %v146_v21 = vrot.slane %v91_v6, %v4670_v16  ;;  %v139_v22 = vrot.slane %v91_v6, %v4673_v17 }
  0x2c   :  { %113 = vbcast.lane.b32.xlu1 %v111_v7, 256  ;;  %99 = vbcast.lane.b32.xlu0 %v97_v8, 256  ;;  %v690_v51 = vsub.f32 1.0, %v90_v50  ;;  %v4424_v8 = vld [vmem:[%s6668_s4 + $0x8] sm:$0xff]   ;;  %vm487_vm12 = vcmask 1042434   ;;  %vm490_vm13 = vcmask 1043459  }
  0x2d   :  { %369 = vmatpush1.bf16.msra.mxu1 %v4423_v48  ;;  %vm493_vm14 = vcmask 1044484   ;;  %vm496_vm15 = vcmask 1045509  }
  0x2e   :  { %4333 = vmatpush3.bf16.msra.mxu0 %v4416_v15  ;;  %4344 = vmatprep.subr.bf16.mxu1 %v6677_v23  ;;  %v4723_v52 = vmul.f32 -1e+09, %v690_v51 }
  0x2f   :  { %4334 = vmatprep.subr.bf16.mxu0 %v4417_v20 }
  0x30   :  { %120 = vbcast.lane.b32.xlu1 %v118_v11, 256  ;;  %106 = vbcast.lane.b32.xlu0 %v104_v12, 256  ;;  %v696_v53 = vrot.slane %v4723_v52, %v4642_v3  ;;  %v703_v54 = vrot.slane %v4723_v52, %v4648_v5  ;;  %v710_v55 = vrot.slane %v4723_v52, %v4639_v2 }
  0x31   :  { %v724_v56 = vrot.slane %v4723_v52, %v4664_v14  ;;  %v717_v57 = vrot.slane %v4723_v52, %v4645_v4  ;;  %v731_v58 = vrot.slane %v4723_v52, %v4661_v13 }
  0x32   :  { %4335 = vmatpush3.bf16.msra.mxu0 %v4417_v20 }
  0x33   :  { %4352 = vmatprep.subr.bf16.mxu0 %v6677_v23 }
  0x34   :  { %134 = vbcast.lane.b32.xlu1 %v132_v18, 256  ;;  %127 = vbcast.lane.b32.xlu0 %v125_v19, 256  ;;  %v4425_v18 = vld [vmem:[%s6668_s4] sm:$0xff]  }
  0x38   :  { %148 = vbcast.lane.b32.xlu1 %v146_v21, 256  ;;  %141 = vbcast.lane.b32.xlu0 %v139_v22, 256 }
  0x3c   :  { %698 = vbcast.lane.b32.xlu1 %v696_v53, 256  ;;  %705 = vbcast.lane.b32.xlu0 %v703_v54, 256 }
  0x40   :  { %712 = vbcast.lane.b32.xlu1 %v710_v55, 256  ;;  %726 = vbcast.lane.b32.xlu0 %v724_v56, 256 }
  0x44   :  { %719 = vbcast.lane.b32.xlu1 %v717_v57, 256 }
  0x48   :  { %733 = vbcast.lane.b32.xlu1 %v731_v58, 256 }
  0x9e   :  { %v114_v25 = vpop.permute.xlu1 %113  ;;  %v100_v26 = vpop.permute.xlu0 %99 }
  0x9f   :  { %vm152_vm0 = vcmp.eq.s32.totalorder %v114_v25, %v4683_v24  ;;  %vm150_vm1 = vcmp.eq.s32.totalorder %v100_v26, %v4683_v24 }
  0xa0   :  { %v160_v29 = vsel %vm152_vm0, 1.0, %v6677_v23  ;;  %v158_v31 = vsel %vm150_vm1, 1.0, %v6677_v23  ;;  %vm499_vm0 = vcmask 1046534   ;;  %vm502_vm1 = vcmask 1047559  }
  0xa2   :  { %v121_v27 = vpop.permute.xlu1 %120  ;;  %v107_v28 = vpop.permute.xlu0 %106 }
  0xa3   :  { %vm153_vm2 = vcmp.eq.s32.totalorder %v121_v27, %v4683_v24  ;;  %vm151_vm3 = vcmp.eq.s32.totalorder %v107_v28, %v4683_v24 }
  0xa4   :  { %v161_v30 = vsel %vm153_vm2, 1.0, %v6677_v23  ;;  %v159_v32 = vsel %vm151_vm3, 1.0, %v6677_v23  ;;  %vm853_vm2 = vcmask 64512   ;;  %vm3300_vm3 = vcmask 130112  }
  0xa5   :  { %v4293_v33 = vpack.c.bf16 %v161_v30, %v160_v29  ;;  %v4292_v34 = vpack.c.bf16 %v159_v32, %v158_v31 }
  0xa6   :  { %v135_v35 = vpop.permute.xlu1 %134  ;;  %v128_v36 = vpop.permute.xlu0 %127 }
  0xa7   :  { %vm155_vm5 = vcmp.eq.s32.totalorder %v135_v35, %v4683_v24  ;;  %4336 = vmatprep.mubr.msk.bf16.mxu0 %vm226_vm4, %v4292_v34  ;;  %vm154_vm6 = vcmp.eq.s32.totalorder %v128_v36, %v4683_v24 }
  0xa8   :  { %v163_v37 = vsel %vm155_vm5, 1.0, %v6677_v23  ;;  %v162_v38 = vsel %vm154_vm6, 1.0, %v6677_v23  ;;  %4337 = vmatmul.mubr.msk.bf16.vlgmr.msra.gmra.mxu0 %vm226_vm4, %v4293_v33  ;;  %vm3314_vm5 = vcmask 261312  }
  0xa9   :  { %v4294_v39 = vpack.c.bf16 %v163_v37, %v162_v38 }
  0xaa   :  { %v149_v40 = vpop.permute.xlu1 %148  ;;  %v142_v41 = vpop.permute.xlu0 %141 }
  0xab   :  { %vm157_vm7 = vcmp.eq.s32.totalorder %v149_v40, %v4683_v24  ;;  %vm156_vm8 = vcmp.eq.s32.totalorder %v142_v41, %v4683_v24  ;;  %4340 = vmatprep.mubr.msk.bf16.mxu0 %vm226_vm4, %v4294_v39 }
  0xac   :  { %v165_v42 = vsel %vm157_vm7, 1.0, %v6677_v23  ;;  %v164_v43 = vsel %vm156_vm8, 1.0, %v6677_v23 }
  0xad   :  { %v4295_v44 = vpack.c.bf16 %v165_v42, %v164_v43 }
  0xb0   :  { %4341 = vmatmul.mubr.msk.bf16.gmra.mxu0 %vm226_vm4, %v4295_v44  ;;  %vm3307_vm4 = vcmask 195712  }
  0xb1   :  { %4356 = vmatprep.mubr.msk.bf16.mxu0 %vm4559_vm9, %v6677_v23 }
 0x168   :  { %v4338_v59 = vpop.f32.mrf.mxu0 }
 0x169   :  { %v4748_v12 = vadd.f32 %v4338_v59, %v304_v63 }
 0x16a   :  { %v273_v60 = vpop.f32.mrf.mxu0 }
 0x16b   :  { %v4737_v0 = vadd.f32 %v304_v63, %v273_v60  ;;  %6726 = vst [vmem:[#allocation16_spill] sm:$0xff] %v4748_v12  ;;  %v453_v22 = vpack.c.bf16 %v4748_v12, %v4748_v12 }
 0x16c   :  { %v4339_v61 = vpop.f32.mrf.mxu0 }
 0x16d   :  { %6724 = vst [vmem:[#allocation14_spill] sm:$0xff] %v4737_v0  ;;  %v4755_v19 = vadd.f32 %v4339_v61, %v304_v63  ;;  %v451_v26 = vpack.c.bf16 %v4737_v0, %v4737_v0  ;;  %v477_v31 = vunpack.c.l.b16 %v453_v22  ;;  %v738_v61 = vrot.slane %v4723_v52, %v4673_v17 }
 0x16e   :  { %v276_v62 = vpop.f32.mrf.mxu0 }
 0x16f   :  { %v4739_v6 = vadd.f32 %v304_v63, %v276_v62  ;;  %6727 = vst [vmem:[#allocation17_spill] sm:$0xff] %v4755_v19  ;;  %v314_v28 = vpack.c.bf16 %v4755_v19, %v4748_v12  ;;  %v454_v29 = vpack.c.bf16 %v4755_v19, %v4755_v19  ;;  %v475_v34 = vunpack.c.l.b16 %v451_v26  ;;  %740 = vbcast.lane.b32.xlu0 %v738_v61, 256 }
 0x170   :  { %v4342_v7 = vpop.f32.mrf.mxu0  ;;  %v486_v39 = vrot.slane %v477_v31, 6  ;;  %v745_v62 = vrot.slane %v4723_v52, %v4670_v16 }
 0x171   :  { %6725 = vst [vmem:[#allocation15_spill] sm:$0xff] %v4739_v6  ;;  %v313_v9 = vpack.c.bf16 %v4739_v6, %v4737_v0  ;;  %v452_v11 = vpack.c.bf16 %v4739_v6, %v4739_v6  ;;  %v4771_v32 = vadd.f32 %v4342_v7, %v304_v63  ;;  %v478_v36 = vunpack.c.l.b16 %v454_v29  ;;  %v4811_v7 = vld [vmem:[%s6675_s11 + $0x2] ss:$0 sm:$0xff] }
 0x172   :  { %v289_v10 = vpop.f32.mrf.mxu0  ;;  %747 = vbcast.lane.b32.xlu1 %v745_v62, 256 }
 0x173   :  { %4253 = vmatmul.mubr.msk.bf16.vlgmr.msra.gmra.mxu1 %vm341_vm10, %v313_v9  ;;  %v476_v21 = vunpack.c.l.b16 %v452_v11  ;;  %v4760_v25 = vadd.f32 %v304_v63, %v289_v10  ;;  %6730 = vst [vmem:[#allocation20_spill] sm:$0xff] %v4771_v32  ;;  %v457_v40 = vpack.c.bf16 %v4771_v32, %v4771_v32  ;;  %v489_v45 = vrot.slane %v478_v36, 5 }
 0x174   :  { %v4343_v15 = vpop.f32.mrf.mxu0  ;;  %396 = vmatprep.mubr.bf16.mxu1 %v4558_v49  ;;  %4345 = vmatpush3.bf16.msra.mxu1 %v4424_v8 }
 0x175   :  { %4346 = vmatprep.subr.bf16.mxu1 %v6677_v23  ;;  %6728 = vst [vmem:[#allocation18_spill] sm:$0xff] %v4760_v25  ;;  %v483_v30 = vrot.slane %v476_v21, 7  ;;  %v455_v33 = vpack.c.bf16 %v4760_v25, %v4760_v25  ;;  %v4780_v38 = vadd.f32 %v4343_v15, %v304_v63  ;;  %v481_v47 = vunpack.c.l.b16 %v457_v40 }
 0x176   :  { %v292_v20 = vpop.f32.mrf.mxu0 }
 0x177   :  { %v4764_v27 = vadd.f32 %v304_v63, %v292_v20  ;;  %v485_v37 = vsel %vm484_vm11, %v483_v30, %v475_v34  ;;  %6731 = vst [vmem:[#allocation21_spill] sm:$0xff] %v4780_v38  ;;  %v479_v41 = vunpack.c.l.b16 %v455_v33  ;;  %v458_v46 = vpack.c.bf16 %v4780_v38, %v4780_v38 }
 0x178   :  { %4347 = vmatpush3.bf16.msra.mxu1 %v4425_v18  ;;  %v488_v44 = vsel %vm487_vm12, %v486_v39, %v485_v37  ;;  %v498_v54 = vrot.slane %v481_v47, 2  ;;  %v316_v56 = vpack.c.bf16 %v4780_v38, %v4771_v32  ;;  %v4560_v39 = vmov 1966171168  }
 0x179   :  { %6729 = vst [vmem:[#allocation19_spill] sm:$0xff] %v4764_v27  ;;  %4360 = vmatprep.subr.bf16.mxu1 %v6677_v23  ;;  %v456_v35 = vpack.c.bf16 %v4764_v27, %v4764_v27  ;;  %v315_v42 = vpack.c.bf16 %v4764_v27, %v4760_v25  ;;  %v492_v48 = vrot.slane %v479_v41, 4  ;;  %v491_v50 = vsel %vm490_vm13, %v489_v45, %v488_v44 }
 0x17a   :  { %v482_v53 = vunpack.c.l.b16 %v458_v46  ;;  %v563_v40 = vunpack.c.l.s4 %v4560_v39 }
 0x17b   :  { %4254 = vmatmul.mubr.msk.bf16.gmra.mxu1 %vm341_vm10, %v314_v28  ;;  %v480_v43 = vunpack.c.l.b16 %v456_v35  ;;  %v494_v55 = vsel %vm493_vm14, %v492_v48, %v491_v50  ;;  %v4259_v48 = vld [vmem:[%s6675_s11] ss:$0 sm:$0xff] }
 0x17c   :  { %406 = vmatprep.mubr.bf16.mxu1 %v4558_v49  ;;  %v501_v58 = vrot.slane %v482_v53, 1  ;;  %v564_v44 = vunpack.c.0.s8 %v563_v40 }
 0x17d   :  { %v495_v51 = vrot.slane %v480_v43, 3 }
 0x17f   :  { %v497_v57 = vsel %vm496_vm15, %v495_v51, %v494_v55  ;;  %v567_v51 = vsub.s32 %v564_v44, %v4636_v1 }
 0x180   :  { %v500_v59 = vsel %vm499_vm0, %v498_v54, %v497_v57 }
 0x183   :  { %4255 = vmatmul.mubr.msk.bf16.gmra.mxu1 %vm341_vm10, %v315_v42 }
 0x184   :  { %416 = vmatprep.mubr.bf16.mxu1 %v4558_v49  ;;  %v503_v49 = vsel %vm502_vm1, %v501_v58, %v500_v59 }
 0x185   :  { %v504_v60 = vpack.c.b16 %v503_v49, %v503_v49 }
 0x18b   :  { %4256 = vmatmul.mubr.msk.bf16.gmra.mxu1 %vm341_vm10, %v316_v56  ;;  %v4257_v56 = vld [vmem:[%s6675_s11 + $0x1] ss:$0 sm:$0xff] }
 0x18c   :  { %4348 = vmatprep.mubr.msk.bf16.mxu1 %vm4559_vm9, %v6677_v23 }
 0x193   :  { %4349 = vmatmul.mubr.msk.bf16.vlgmr.msra.gmra.mxu1 %vm341_vm10, %v504_v60 }
 0x194   :  { %4364 = vmatprep.mubr.msk.bf16.mxu1 %vm4559_vm9, %v6677_v23 }
 0x233   :  { %v388_v63 = vpop.f32.mrf.mxu1 }
 0x235   :  { %v390_v8 = vpop.f32.mrf.mxu1 }
 0x236   :  { %v4814_v9 = vadd.f32 %v4811_v7, %v390_v8  ;;  %v431_v8 = vadd.f32 %v4257_v56, %v388_v63 }
 0x237   :  { %v392_v10 = vpop.f32.mrf.mxu1 }
 0x238   :  { %v950_v11 = vrot.slane %v4814_v9, %v4642_v3  ;;  %v1198_v18 = vrot.slane %v4814_v9, %v4648_v5  ;;  %v1478_v26 = vrot.slane %v4814_v9, %v4639_v2  ;;  %v1758_v35 = vrot.slane %v4814_v9, %v4645_v4 }
 0x239   :  { %v4818_v15 = vpop.f32.mrf.mxu1  ;;  %v2038_v46 = vrot.slane %v4814_v9, %v4664_v14  ;;  %v2318_v62 = vrot.slane %v4814_v9, %v4661_v13 }
 0x23a   :  { %964 = vbcast.lane.b32.xlu1 %v950_v11, 280  ;;  %952 = vbcast.lane.b32.xlu0 %v950_v11, 256 }
 0x23b   :  { %v398_v52 = vpop.f32.mrf.mxu1 }
 0x23c   :  { %v433_v40 = vadd.f32 %v4257_v56, %v398_v52 }
 0x23d   :  { %v400_v20 = vpop.f32.mrf.mxu1 }
 0x23e   :  { %v4823_v21 = vadd.f32 %v4811_v7, %v400_v20  ;;  %1208 = vbcast.lane.b32.xlu1 %v1198_v18, 272  ;;  %956 = vbcast.lane.b32.xlu0 %v950_v11, 264 }
 0x23f   :  { %v402_v22 = vpop.f32.mrf.mxu1 }
 0x241   :  { %v404_v28 = vpop.f32.mrf.mxu1 }
 0x242   :  { %v4828_v29 = vadd.f32 %v4811_v7, %v404_v28  ;;  %1480 = vbcast.lane.b32.xlu1 %v1478_v26, 256  ;;  %1200 = vbcast.lane.b32.xlu0 %v1198_v18, 256 }
 0x243   :  { %v408_v30 = vpop.f32.mrf.mxu1 }
 0x244   :  { %v1535_v25 = vrot.slane %v4828_v29, %v4639_v2 }
 0x245   :  { %v410_v31 = vpop.f32.mrf.mxu1 }
 0x246   :  { %v4831_v33 = vadd.f32 %v4811_v7, %v410_v31  ;;  %1488 = vbcast.lane.b32.xlu1 %v1478_v26, 272  ;;  %1204 = vbcast.lane.b32.xlu0 %v1198_v18, 264 }
 0x247   :  { %v412_v34 = vpop.f32.mrf.mxu1 }
 0x249   :  { %v414_v36 = vpop.f32.mrf.mxu1 }
 0x24a   :  { %v4836_v37 = vadd.f32 %v4811_v7, %v414_v36  ;;  %1760 = vbcast.lane.b32.xlu1 %v1758_v35, 256  ;;  %960 = vbcast.lane.b32.xlu0 %v950_v11, 272  ;;  %v432_v11 = vadd.f32 %v4257_v56, %v392_v10  ;;  %v436_v10 = vadd.f32 %v4257_v56, %v412_v34 }
 0x24b   :  { %v418_v41 = vpop.f32.mrf.mxu1 }
 0x24c   :  { %v437_v44 = vadd.f32 %v4257_v56, %v418_v41 }
 0x24d   :  { %v420_v42 = vpop.f32.mrf.mxu1 }
 0x24e   :  { %v4839_v43 = vadd.f32 %v4811_v7, %v420_v42  ;;  %1768 = vbcast.lane.b32.xlu1 %v1758_v35, 272  ;;  %1212 = vbcast.lane.b32.xlu0 %v1198_v18, 280  ;;  %v435_v18 = vadd.f32 %v4257_v56, %v408_v30  ;;  %v434_v42 = vadd.f32 %v4257_v56, %v402_v22 }
 0x24f   :  { %v422_v45 = vpop.f32.mrf.mxu1 }
 0x251   :  { %v424_v47 = vpop.f32.mrf.mxu1 }
 0x252   :  { %v4847_v50 = vadd.f32 %v4811_v7, %v424_v47  ;;  %2040 = vbcast.lane.b32.xlu1 %v2038_v46, 256  ;;  %1484 = vbcast.lane.b32.xlu0 %v1478_v26, 264 }
 0x253   :  { %v554_v53 = vpop.f32.mrf.mxu1 }
 0x254   :  { %v555_v54 = vadd.f32 %v4259_v48, %v554_v53 }
 0x255   :  { %v4350_v55 = vpop.f32.mrf.mxu1 }
 0x256   :  { %v561_v57 = vcombine.high %v555_v54, %v555_v54  ;;  %v568_v58 = vrot.slane %v555_v54, %v567_v51  ;;  %2048 = vbcast.lane.b32.xlu1 %v2038_v46, 272  ;;  %1492 = vbcast.lane.b32.xlu0 %v1478_v26, 280 }
 0x257   :  { %v557_v59 = vpop.f32.mrf.mxu1 }
 0x258   :  { %v575_v49 = vrot.slane %v561_v57, %v567_v51  ;;  %v576_v60 = vcombine.high %v568_v58, %v568_v58  ;;  %v584_v61 = vrot.slane %v568_v58, %v567_v51  ;;  %v438_v58 = vadd.f32 %v4257_v56, %v422_v45 }
 0x259   :  { %v4351_v20 = vpop.f32.mrf.mxu1 }
 0x25a   :  { %v577_v28 = vcombine.high %v575_v49, %v575_v49  ;;  %v591_v31 = vrot.slane %v575_v49, %v567_v51  ;;  %v598_v36 = vrot.slane %v576_v60, %v567_v51  ;;  %v606_v39 = vcombine.high %v584_v61, %v584_v61  ;;  %2320 = vbcast.lane.b32.xlu1 %v2318_v62, 256 }
 0x25b   :  { %1764 = vbcast.lane.b32.xlu0 %v1758_v35, 264  ;;  %v613_v26 = vrot.slane %v584_v61, %v4642_v3  ;;  %v4872_v60 = vadd.f32 %v4811_v7, %v4818_v15 }
 0x25c   :  { %v617_v47 = vrot.slane %v598_v36, %v4642_v3  ;;  %v629_v48 = vrot.slane %v591_v31, %v4642_v3  ;;  %v607_v53 = vcombine.high %v591_v31, %v591_v31  ;;  %v621_v63 = vrot.slane %v606_v39, %v4642_v3  ;;  %v4908_v31 = vpop.permute.xlu1 %698 }
 0x25d   :  { %v4859_v30 = vmul.f32 %v613_v26, %v431_v8  ;;  %v608_v54 = vcombine.high %v598_v36, %v598_v36  ;;  %v605_v55 = vrot.slane %v577_v28, %v567_v51  ;;  %v4876_v51 = vrot.slane %v4814_v9, %v4673_v17 }
 0x25e   :  { %2328 = vbcast.lane.b32.xlu1 %v2318_v62, 272  ;;  %v4861_v57 = vmul.f32 %v617_v47, %v432_v11  ;;  %v4863_v52 = vmul.f32 %v629_v48, %v435_v18  ;;  %v637_v22 = vrot.slane %v607_v53, %v4642_v3  ;;  %v4866_v41 = vmul.f32 %v621_v63, %v433_v40 }
 0x25f   :  { %1772 = vbcast.lane.b32.xlu0 %v1758_v35, 280  ;;  %v625_v59 = vrot.slane %v608_v54, %v4642_v3  ;;  %v633_v49 = vrot.slane %v605_v55, %v4642_v3  ;;  %v609_v34 = vcombine.high %v605_v55, %v605_v55  ;;  %v1217_v7 = vrot.slane %v4872_v60, %v4648_v5 }
 0x260   :  { %v4878_v61 = vmul.f32 %v637_v22, %v437_v44  ;;  %v1497_v15 = vrot.slane %v4872_v60, %v4639_v2  ;;  %v1777_v56 = vrot.slane %v4872_v60, %v4645_v4  ;;  %v969_v18 = vrot.slane %v4872_v60, %v4642_v3  ;;  %v4912_v39 = vpop.permute.xlu1 %712 }
 0x261   :  { %v4880_v8 = vmul.f32 %v625_v59, %v434_v42  ;;  %v4882_v11 = vmul.f32 %v633_v49, %v436_v10  ;;  %v641_v35 = vrot.slane %v609_v34, %v4642_v3  ;;  %v4903_v20 = vrot.slane %v4872_v60, %v4673_v17  ;;  %v4916_v42 = vpop.permute.xlu0 %705 }
 0x262   :  { %2600 = vbcast.lane.b32.xlu1 %v4876_v51, 256  ;;  %v1236_v28 = vrot.slane %v4823_v21, %v4648_v5  ;;  %v988_v36 = vrot.slane %v4823_v21, %v4642_v3  ;;  %v1516_v40 = vrot.slane %v4823_v21, %v4639_v2  ;;  %v1796_v26 = vrot.slane %v4823_v21, %v4645_v4 }
 0x263   :  { %2044 = vbcast.lane.b32.xlu0 %v2038_v46, 264  ;;  %v4886_v45 = vmul.f32 %v641_v35, %v438_v58  ;;  %v2076_v10 = vrot.slane %v4823_v21, %v4664_v14  ;;  %v2356_v59 = vrot.slane %v4823_v21, %v4661_v13 }
 0x264   :  { %v4918_v44 = vpop.permute.xlu1 %719 }
 0x265   :  { %v4922_v47 = vpop.permute.xlu0 %726 }
 0x266   :  { %1227 = vbcast.lane.b32.xlu1 %v1217_v7, 272 }
 0x267   :  { %2052 = vbcast.lane.b32.xlu0 %v2038_v46, 280  ;;  %v2057_v46 = vrot.slane %v4872_v60, %v4664_v14 }
 0x268   :  { %v4924_v48 = vpop.permute.xlu1 %733 }
 0x269   :  { %v4926_v53 = vpop.permute.xlu0 %740 }
 0x26a   :  { %1499 = vbcast.lane.b32.xlu1 %v1497_v15, 256 }
 0x26b   :  { %2324 = vbcast.lane.b32.xlu0 %v2318_v62, 264 }
 0x26c   :  { %v4928_v63 = vpop.permute.xlu1 %747 }
 0x26e   :  { %1507 = vbcast.lane.b32.xlu1 %v1497_v15, 272 }
 0x26f   :  { %2332 = vbcast.lane.b32.xlu0 %v2318_v62, 280  ;;  %v2337_v62 = vrot.slane %v4872_v60, %v4661_v13 }
 0x272   :  { %1779 = vbcast.lane.b32.xlu1 %v1777_v56, 256 }
 0x273   :  { %2604 = vbcast.lane.b32.xlu0 %v4876_v51, 264 }
 0x276   :  { %1787 = vbcast.lane.b32.xlu1 %v1777_v56, 272 }
 0x277   :  { %971 = vbcast.lane.b32.xlu0 %v969_v18, 256 }
 0x27a   :  { %2059 = vbcast.lane.b32.xlu1 %v2057_v46, 256 }
 0x27b   :  { %975 = vbcast.lane.b32.xlu0 %v969_v18, 264 }
 0x27e   :  { %2067 = vbcast.lane.b32.xlu1 %v2057_v46, 272 }
 0x27f   :  { %1219 = vbcast.lane.b32.xlu0 %v1217_v7, 256 }
 0x282   :  { %2339 = vbcast.lane.b32.xlu1 %v2337_v62, 256 }
 0x283   :  { %1223 = vbcast.lane.b32.xlu0 %v1217_v7, 264 }
 0x286   :  { %2347 = vbcast.lane.b32.xlu1 %v2337_v62, 272 }
 0x287   :  { %979 = vbcast.lane.b32.xlu0 %v969_v18, 272 }
 0x28a   :  { %2619 = vbcast.lane.b32.xlu1 %v4903_v20, 256 }
 0x28b   :  { %983 = vbcast.lane.b32.xlu0 %v969_v18, 280 }
 0x28e   :  { %1238 = vbcast.lane.b32.xlu1 %v1236_v28, 256 }
 0x28f   :  { %1231 = vbcast.lane.b32.xlu0 %v1217_v7, 280 }
 0x292   :  { %998 = vbcast.lane.b32.xlu1 %v988_v36, 272 }
 0x293   :  { %1503 = vbcast.lane.b32.xlu0 %v1497_v15, 264 }
 0x296   :  { %1246 = vbcast.lane.b32.xlu1 %v1236_v28, 272 }
 0x297   :  { %1511 = vbcast.lane.b32.xlu0 %v1497_v15, 280  ;;  %v4953_v15 = vrot.slane %v4828_v29, %v4642_v3 }
 0x29a   :  { %1518 = vbcast.lane.b32.xlu1 %v1516_v40, 256 }
 0x29b   :  { %1783 = vbcast.lane.b32.xlu0 %v1777_v56, 264 }
 0x29e   :  { %1526 = vbcast.lane.b32.xlu1 %v1516_v40, 272 }
 0x29f   :  { %1791 = vbcast.lane.b32.xlu0 %v1777_v56, 280 }
 0x2a2   :  { %1798 = vbcast.lane.b32.xlu1 %v1796_v26, 256 }
 0x2a3   :  { %2063 = vbcast.lane.b32.xlu0 %v2057_v46, 264 }
 0x2a6   :  { %1806 = vbcast.lane.b32.xlu1 %v1796_v26, 272 }
 0x2a7   :  { %2071 = vbcast.lane.b32.xlu0 %v2057_v46, 280  ;;  %v4962_v46 = vrot.slane %v4828_v29, %v4648_v5 }
 0x2aa   :  { %2078 = vbcast.lane.b32.xlu1 %v2076_v10, 256 }
 0x2ab   :  { %2343 = vbcast.lane.b32.xlu0 %v2337_v62, 264 }
 0x2ac   :  { %v4932_v54 = vpop.permute.xlu1 %964  ;;  %v4934_v55 = vpop.permute.xlu0 %952 }
 0x2ad   :  { %6732 = vst [vmem:[#allocation22_spill] sm:$0xff] %v4932_v54  ;;  %6733 = vst [vmem:[#allocation23_spill] sm:$0xff] %v4934_v55 }
 0x2ae   :  { %2086 = vbcast.lane.b32.xlu1 %v2076_v10, 272 }
 0x2af   :  { %2351 = vbcast.lane.b32.xlu0 %v2337_v62, 280 }
 0x2b0   :  { %v4936_v22 = vpop.permute.xlu1 %1208  ;;  %v4938_v58 = vpop.permute.xlu0 %956 }
 0x2b1   :  { %6734 = vst [vmem:[#allocation24_spill] sm:$0xff] %v4936_v22  ;;  %6735 = vst [vmem:[#allocation25_spill] sm:$0xff] %v4938_v58 }
 0x2b2   :  { %2358 = vbcast.lane.b32.xlu1 %v2356_v59, 256 }
 0x2b3   :  { %2623 = vbcast.lane.b32.xlu0 %v4903_v20, 264 }
 0x2b4   :  { %v4943_v49 = vpop.permute.xlu1 %1480  ;;  %v4945_v34 = vpop.permute.xlu0 %1200 }
 0x2b5   :  { %6736 = vst [vmem:[#allocation26_spill] sm:$0xff] %v4943_v49  ;;  %6737 = vst [vmem:[#allocation27_spill] sm:$0xff] %v4945_v34 }
 0x2b6   :  { %2366 = vbcast.lane.b32.xlu1 %v2356_v59, 272 }
 0x2b7   :  { %990 = vbcast.lane.b32.xlu0 %v988_v36, 256 }
 0x2b8   :  { %v4947_v35 = vpop.permute.xlu1 %1488  ;;  %v4949_v7 = vpop.permute.xlu0 %1204 }
 0x2b9   :  { %6738 = vst [vmem:[#allocation28_spill] sm:$0xff] %v4947_v35  ;;  %6739 = vst [vmem:[#allocation29_spill] sm:$0xff] %v4949_v7 }
 0x2ba   :  { %1009 = vbcast.lane.b32.xlu1 %v4953_v15, 256 }
 0x2bb   :  { %994 = vbcast.lane.b32.xlu0 %v988_v36, 264 }
 0x2bc   :  { %v4956_v56 = vpop.permute.xlu1 %1760  ;;  %v4958_v18 = vpop.permute.xlu0 %960 }
 0x2bd   :  { %6740 = vst [vmem:[#allocation30_spill] sm:$0xff] %v4956_v56  ;;  %6741 = vst [vmem:[#allocation31_spill] sm:$0xff] %v4958_v18 }
 0x2be   :  { %1257 = vbcast.lane.b32.xlu1 %v4962_v46, 256 }
 0x2bf   :  { %1242 = vbcast.lane.b32.xlu0 %v1236_v28, 264 }
 0x2c0   :  { %v4965_v62 = vpop.permute.xlu1 %1768  ;;  %v4967_v23 = vpop.permute.xlu0 %1212 }
 0x2c1   :  { %6742 = vst [vmem:[#allocation32_spill] sm:$0xff] %v4965_v62  ;;  %6743 = vst [vmem:[#allocation33_spill] sm:$0xff] %v4967_v23 }
 0x2c2   :  { %1017 = vbcast.lane.b32.xlu1 %v4953_v15, 272 }
 0x2c3   :  { %1002 = vbcast.lane.b32.xlu0 %v988_v36, 280 }
 0x2c4   :  { %v4970_v38 = vpop.permute.xlu1 %2040  ;;  %v4972_v32 = vpop.permute.xlu0 %1484 }
 0x2c5   :  { %6744 = vst [vmem:[#allocation34_spill] sm:$0xff] %v4970_v38  ;;  %6745 = vst [vmem:[#allocation35_spill] sm:$0xff] %v4972_v32 }
 0x2c6   :  { %1265 = vbcast.lane.b32.xlu1 %v4962_v46, 272 }
 0x2c7   :  { %1250 = vbcast.lane.b32.xlu0 %v1236_v28, 280  ;;  %v1815_v28 = vrot.slane %v4828_v29, %v4645_v4 }
 0x2c8   :  { %v4975_v27 = vpop.permute.xlu1 %2048  ;;  %v4977_v0 = vpop.permute.xlu0 %1492 }
 0x2c9   :  { %6746 = vst [vmem:[#allocation36_spill] sm:$0xff] %v4975_v27  ;;  %6747 = vst [vmem:[#allocation37_spill] sm:$0xff] %v4977_v0 }
 0x2ca   :  { %1537 = vbcast.lane.b32.xlu1 %v1535_v25, 256 }
 0x2cb   :  { %1522 = vbcast.lane.b32.xlu0 %v1516_v40, 264 }
 0x2cc   :  { %v4981_v19 = vpop.permute.xlu1 %2320 }
 0x2cd   :  { %6748 = vst [vmem:[#allocation38_spill] sm:$0xff] %v4981_v19  ;;  %v4983_v12 = vpop.permute.xlu0 %1764 }
 0x2ce   :  { %6749 = vst [vmem:[#allocation39_spill] sm:$0xff] %v4983_v12  ;;  %1545 = vbcast.lane.b32.xlu1 %v1535_v25, 272 }
 0x2cf   :  { %1530 = vbcast.lane.b32.xlu0 %v1516_v40, 280  ;;  %v2095_v40 = vrot.slane %v4828_v29, %v4664_v14 }
 0x2d0   :  { %v4985_v36 = vpop.permute.xlu1 %2328 }
 0x2d1   :  { %6750 = vst [vmem:[#allocation40_spill] sm:$0xff] %v4985_v36  ;;  %v4989_v6 = vpop.permute.xlu0 %1772 }
 0x2d2   :  { %6751 = vst [vmem:[#allocation41_spill] sm:$0xff] %v4989_v6  ;;  %1817 = vbcast.lane.b32.xlu1 %v1815_v28, 256 }
 0x2d3   :  { %1802 = vbcast.lane.b32.xlu0 %v1796_v26, 264 }
 0x2d4   :  { %v4991_v27 = vpop.permute.xlu1 %2600 }
 0x2d5   :  { %6752 = vst [vmem:[#allocation42_spill] sm:$0xff] %v4991_v27  ;;  %v4993_v62 = vpop.permute.xlu0 %2044  ;;  %v1611_v27 = vrot.slane %v4847_v50, %v4639_v2 }
 0x2d6   :  { %6753 = vst [vmem:[#allocation43_spill] sm:$0xff] %v4993_v62  ;;  %1825 = vbcast.lane.b32.xlu1 %v1815_v28, 272 }
 0x2d7   :  { %1810 = vbcast.lane.b32.xlu0 %v1796_v26, 280  ;;  %v5009_v26 = vrot.slane %v4828_v29, %v4661_v13 }
 0x2d8   :  { %v4995_v0 = vpop.permute.xlu1 %1227 }
 0x2d9   :  { %6754 = vst [vmem:[#allocation44_spill] sm:$0xff] %v4995_v0  ;;  %v4999_v35 = vpop.permute.xlu0 %2052 }
 0x2da   :  { %6755 = vst [vmem:[#allocation45_spill] sm:$0xff] %v4999_v35  ;;  %2097 = vbcast.lane.b32.xlu1 %v2095_v40, 256 }
 0x2db   :  { %2082 = vbcast.lane.b32.xlu0 %v2076_v10, 264 }
 0x2dc   :  { %v5001_v36 = vpop.permute.xlu1 %1499 }
 0x2dd   :  { %6756 = vst [vmem:[#allocation46_spill] sm:$0xff] %v5001_v36  ;;  %v5003_v6 = vpop.permute.xlu0 %2324 }
 0x2de   :  { %6757 = vst [vmem:[#allocation47_spill] sm:$0xff] %v5003_v6  ;;  %2105 = vbcast.lane.b32.xlu1 %v2095_v40, 272 }
 0x2df   :  { %2090 = vbcast.lane.b32.xlu0 %v2076_v10, 280  ;;  %v1026_v10 = vrot.slane %v4831_v33, %v4642_v3 }
 0x2e0   :  { %v5005_v23 = vpop.permute.xlu1 %1507 }
 0x2e1   :  { %6758 = vst [vmem:[#allocation48_spill] sm:$0xff] %v5005_v23  ;;  %v5011_v0 = vpop.permute.xlu0 %2332 }
 0x2e2   :  { %6759 = vst [vmem:[#allocation49_spill] sm:$0xff] %v5011_v0  ;;  %2377 = vbcast.lane.b32.xlu1 %v5009_v26, 256  ;;  %v1274_v0 = vrot.slane %v4831_v33, %v4648_v5 }
 0x2e3   :  { %2362 = vbcast.lane.b32.xlu0 %v2356_v59, 264 }
 0x2e4   :  { %v5014_v35 = vpop.permute.xlu1 %1779 }
 0x2e5   :  { %6760 = vst [vmem:[#allocation50_spill] sm:$0xff] %v5014_v35  ;;  %v5016_v22 = vpop.permute.xlu0 %2604 }
 0x2e6   :  { %6761 = vst [vmem:[#allocation51_spill] sm:$0xff] %v5016_v22  ;;  %2385 = vbcast.lane.b32.xlu1 %v5009_v26, 272 }
 0x2e7   :  { %2370 = vbcast.lane.b32.xlu0 %v2356_v59, 280 }
 0x2e8   :  { %v5021_v23 = vpop.permute.xlu1 %1787 }
 0x2e9   :  { %6762 = vst [vmem:[#allocation52_spill] sm:$0xff] %v5021_v23  ;;  %v5023_v54 = vpop.permute.xlu0 %971 }
 0x2ea   :  { %6763 = vst [vmem:[#allocation53_spill] sm:$0xff] %v5023_v54  ;;  %1028 = vbcast.lane.b32.xlu1 %v1026_v10, 256 }
 0x2eb   :  { %1013 = vbcast.lane.b32.xlu0 %v4953_v15, 264 }
 0x2ec   :  { %v5028_v18 = vpop.permute.xlu1 %2059 }
 0x2ed   :  { %6764 = vst [vmem:[#allocation54_spill] sm:$0xff] %v5028_v18  ;;  %v5030_v35 = vpop.permute.xlu0 %975  ;;  %v1554_v18 = vrot.slane %v4831_v33, %v4639_v2 }
 0x2ee   :  { %6765 = vst [vmem:[#allocation55_spill] sm:$0xff] %v5030_v35  ;;  %1276 = vbcast.lane.b32.xlu1 %v1274_v0, 256 }
 0x2ef   :  { %1261 = vbcast.lane.b32.xlu0 %v4962_v46, 264 }
 0x2f0   :  { %v5033_v36 = vpop.permute.xlu1 %2067 }
 0x2f1   :  { %6766 = vst [vmem:[#allocation56_spill] sm:$0xff] %v5033_v36  ;;  %v5035_v59 = vpop.permute.xlu0 %1219 }
 0x2f2   :  { %6767 = vst [vmem:[#allocation57_spill] sm:$0xff] %v5035_v59  ;;  %1036 = vbcast.lane.b32.xlu1 %v1026_v10, 272 }
 0x2f3   :  { %1021 = vbcast.lane.b32.xlu0 %v4953_v15, 280  ;;  %v1834_v15 = vrot.slane %v4831_v33, %v4645_v4 }
 0x2f4   :  { %v5038_v23 = vpop.permute.xlu1 %2339 }
 0x2f5   :  { %6768 = vst [vmem:[#allocation58_spill] sm:$0xff] %v5038_v23  ;;  %v5040_v54 = vpop.permute.xlu0 %1223 }
 0x2f6   :  { %6769 = vst [vmem:[#allocation59_spill] sm:$0xff] %v5040_v54  ;;  %1284 = vbcast.lane.b32.xlu1 %v1274_v0, 272 }
 0x2f7   :  { %1269 = vbcast.lane.b32.xlu0 %v4962_v46, 280 }
 0x2f8   :  { %v5045_v35 = vpop.permute.xlu1 %2347 }
 0x2f9   :  { %6770 = vst [vmem:[#allocation60_spill] sm:$0xff] %v5045_v35  ;;  %v5047_v22 = vpop.permute.xlu0 %979 }
 0x2fa   :  { %6771 = vst [vmem:[#allocation61_spill] sm:$0xff] %v5047_v22  ;;  %1556 = vbcast.lane.b32.xlu1 %v1554_v18, 256  ;;  %v2114_v22 = vrot.slane %v4831_v33, %v4664_v14 }
 0x2fb   :  { %1541 = vbcast.lane.b32.xlu0 %v1535_v25, 264 }
 0x2fc   :  { %v5049_v36 = vpop.permute.xlu1 %2619 }
 0x2fd   :  { %6772 = vst [vmem:[#allocation62_spill] sm:$0xff] %v5049_v36  ;;  %v5051_v59 = vpop.permute.xlu0 %983 }
 0x2fe   :  { %6773 = vst [vmem:[#allocation63_spill] sm:$0xff] %v5051_v59  ;;  %1564 = vbcast.lane.b32.xlu1 %v1554_v18, 272 }
 0x2ff   :  { %1549 = vbcast.lane.b32.xlu0 %v1535_v25, 280 }
 0x300   :  { %v5055_v23 = vpop.permute.xlu1 %1238 }
 0x301   :  { %6774 = vst [vmem:[#allocation64_spill] sm:$0xff] %v5055_v23  ;;  %v5057_v54 = vpop.permute.xlu0 %1231 }
 0x302   :  { %6775 = vst [vmem:[#allocation65_spill] sm:$0xff] %v5057_v54  ;;  %1836 = vbcast.lane.b32.xlu1 %v1834_v15, 256  ;;  %v1045_v54 = vrot.slane %v4836_v37, %v4642_v3 }
 0x303   :  { %1821 = vbcast.lane.b32.xlu0 %v1815_v28, 264 }
 0x304   :  { %v5059_v46 = vpop.permute.xlu1 %998 }
 0x305   :  { %6776 = vst [vmem:[#allocation66_spill] sm:$0xff] %v5059_v46  ;;  %v5061_v35 = vpop.permute.xlu0 %1503 }
 0x306   :  { %6777 = vst [vmem:[#allocation67_spill] sm:$0xff] %v5061_v35  ;;  %1844 = vbcast.lane.b32.xlu1 %v1834_v15, 272 }
 0x307   :  { %1829 = vbcast.lane.b32.xlu0 %v1815_v28, 280 }
 0x308   :  { %v5065_v59 = vpop.permute.xlu1 %1246 }
 0x309   :  { %6778 = vst [vmem:[#allocation68_spill] sm:$0xff] %v5065_v59  ;;  %v5067_v36 = vpop.permute.xlu0 %1511  ;;  %v1293_v59 = vrot.slane %v4836_v37, %v4648_v5 }
 0x30a   :  { %6779 = vst [vmem:[#allocation69_spill] sm:$0xff] %v5067_v36  ;;  %2116 = vbcast.lane.b32.xlu1 %v2114_v22, 256 }
 0x30b   :  { %2101 = vbcast.lane.b32.xlu0 %v2095_v40, 264 }
 0x30c   :  { %v5069_v25 = vpop.permute.xlu1 %1518 }
 0x30d   :  { %6780 = vst [vmem:[#allocation70_spill] sm:$0xff] %v5069_v25  ;;  %v5071_v23 = vpop.permute.xlu0 %1783 }
 0x30e   :  { %6781 = vst [vmem:[#allocation71_spill] sm:$0xff] %v5071_v23  ;;  %2124 = vbcast.lane.b32.xlu1 %v2114_v22, 272  ;;  %v1573_v23 = vrot.slane %v4836_v37, %v4639_v2 }
 0x30f   :  { %2109 = vbcast.lane.b32.xlu0 %v2095_v40, 280 }
 0x310   :  { %v5073_v46 = vpop.permute.xlu1 %1526 }
 0x311   :  { %6782 = vst [vmem:[#allocation72_spill] sm:$0xff] %v5073_v46  ;;  %v5077_v35 = vpop.permute.xlu0 %1791 }
 0x312   :  { %6783 = vst [vmem:[#allocation73_spill] sm:$0xff] %v5077_v35  ;;  %1047 = vbcast.lane.b32.xlu1 %v1045_v54, 256 }
 0x313   :  { %2381 = vbcast.lane.b32.xlu0 %v5009_v26, 264 }
 0x314   :  { %v5080_v28 = vpop.permute.xlu1 %1798 }
 0x315   :  { %6784 = vst [vmem:[#allocation74_spill] sm:$0xff] %v5080_v28  ;;  %v5084_v25 = vpop.permute.xlu0 %2063 }
 0x316   :  { %6785 = vst [vmem:[#allocation75_spill] sm:$0xff] %v5084_v25  ;;  %1295 = vbcast.lane.b32.xlu1 %v1293_v59, 256 }
 0x317   :  { %1032 = vbcast.lane.b32.xlu0 %v1026_v10, 264 }
 0x318   :  { %v5086_v40 = vpop.permute.xlu1 %1806 }
 0x319   :  { %6786 = vst [vmem:[#allocation76_spill] sm:$0xff] %v5086_v40  ;;  %v5088_v46 = vpop.permute.xlu0 %2071 }
 0x31a   :  { %6787 = vst [vmem:[#allocation77_spill] sm:$0xff] %v5088_v46  ;;  %1055 = vbcast.lane.b32.xlu1 %v1045_v54, 272 }
 0x31b   :  { %1280 = vbcast.lane.b32.xlu0 %v1274_v0, 264 }
 0x31c   :  { %v5090_v36 = vpop.permute.xlu1 %2078 }
 0x31d   :  { %6788 = vst [vmem:[#allocation78_spill] sm:$0xff] %v5090_v36  ;;  %v5092_v35 = vpop.permute.xlu0 %2343 }
 0x31e   :  { %6789 = vst [vmem:[#allocation79_spill] sm:$0xff] %v5092_v35  ;;  %1303 = vbcast.lane.b32.xlu1 %v1293_v59, 272 }
 0x31f   :  { %1040 = vbcast.lane.b32.xlu0 %v1026_v10, 280  ;;  %v1853_v10 = vrot.slane %v4836_v37, %v4645_v4 }
 0x320   :  { %v5094_v28 = vpop.permute.xlu1 %2086 }
 0x321   :  { %6790 = vst [vmem:[#allocation80_spill] sm:$0xff] %v5094_v28  ;;  %v5098_v25 = vpop.permute.xlu0 %2351 }
 0x322   :  { %6791 = vst [vmem:[#allocation81_spill] sm:$0xff] %v5098_v25  ;;  %1575 = vbcast.lane.b32.xlu1 %v1573_v23, 256 }
 0x323   :  { %1288 = vbcast.lane.b32.xlu0 %v1274_v0, 280 }
 0x324   :  { %v5100_v40 = vpop.permute.xlu1 %2358 }
 0x325   :  { %6792 = vst [vmem:[#allocation82_spill] sm:$0xff] %v5100_v40  ;;  %v5102_v46 = vpop.permute.xlu0 %2623  ;;  %v2133_v40 = vrot.slane %v4836_v37, %v4664_v14 }
 0x326   :  { %6793 = vst [vmem:[#allocation83_spill] sm:$0xff] %v5102_v46  ;;  %1583 = vbcast.lane.b32.xlu1 %v1573_v23, 272 }
 0x327   :  { %1560 = vbcast.lane.b32.xlu0 %v1554_v18, 264 }
 0x328   :  { %v5104_v36 = vpop.permute.xlu1 %2366 }
 0x329   :  { %6794 = vst [vmem:[#allocation84_spill] sm:$0xff] %v5104_v36  ;;  %v5108_v35 = vpop.permute.xlu0 %990 }
 0x32a   :  { %6795 = vst [vmem:[#allocation85_spill] sm:$0xff] %v5108_v35  ;;  %1855 = vbcast.lane.b32.xlu1 %v1853_v10, 256 }
 0x32b   :  { %1568 = vbcast.lane.b32.xlu0 %v1554_v18, 280 }
 0x32c   :  { %v5110_v28 = vpop.permute.xlu1 %1009 }
 0x32d   :  { %6796 = vst [vmem:[#allocation86_spill] sm:$0xff] %v5110_v28  ;;  %v5112_v25 = vpop.permute.xlu0 %994  ;;  %v1064_v28 = vrot.slane %v4839_v43, %v4642_v3 }
 0x32e   :  { %6797 = vst [vmem:[#allocation87_spill] sm:$0xff] %v5112_v25  ;;  %1863 = vbcast.lane.b32.xlu1 %v1853_v10, 272 }
 0x32f   :  { %1840 = vbcast.lane.b32.xlu0 %v1834_v15, 264 }
 0x330   :  { %v5114_v0 = vpop.permute.xlu1 %1257 }
 0x331   :  { %6798 = vst [vmem:[#allocation88_spill] sm:$0xff] %v5114_v0  ;;  %v5118_v46 = vpop.permute.xlu0 %1242 }
 0x332   :  { %6799 = vst [vmem:[#allocation89_spill] sm:$0xff] %v5118_v46  ;;  %2135 = vbcast.lane.b32.xlu1 %v2133_v40, 256 }
 0x333   :  { %1848 = vbcast.lane.b32.xlu0 %v1834_v15, 280  ;;  %v1312_v15 = vrot.slane %v4839_v43, %v4648_v5 }
 0x334   :  { %v5120_v36 = vpop.permute.xlu1 %1017 }
 0x335   :  { %6800 = vst [vmem:[#allocation90_spill] sm:$0xff] %v5120_v36  ;;  %v5122_v35 = vpop.permute.xlu0 %1002 }
 0x336   :  { %6801 = vst [vmem:[#allocation91_spill] sm:$0xff] %v5122_v35  ;;  %2143 = vbcast.lane.b32.xlu1 %v2133_v40, 272 }
 0x337   :  { %2120 = vbcast.lane.b32.xlu0 %v2114_v22, 264 }
 0x338   :  { %v5124_v18 = vpop.permute.xlu1 %1265 }
 0x339   :  { %6802 = vst [vmem:[#allocation92_spill] sm:$0xff] %v5124_v18  ;;  %v5128_v25 = vpop.permute.xlu0 %1250 }
 0x33a   :  { %6803 = vst [vmem:[#allocation93_spill] sm:$0xff] %v5128_v25  ;;  %1066 = vbcast.lane.b32.xlu1 %v1064_v28, 256 }
 0x33b   :  { %2128 = vbcast.lane.b32.xlu0 %v2114_v22, 280 }
 0x33c   :  { %v5130_v0 = vpop.permute.xlu1 %1537 }
 0x33d   :  { %6804 = vst [vmem:[#allocation94_spill] sm:$0xff] %v5130_v0  ;;  %v5134_v46 = vpop.permute.xlu0 %1522  ;;  %v1592_v0 = vrot.slane %v4839_v43, %v4639_v2 }
 0x33e   :  { %6805 = vst [vmem:[#allocation95_spill] sm:$0xff] %v5134_v46  ;;  %1314 = vbcast.lane.b32.xlu1 %v1312_v15, 256 }
 0x33f   :  { %1051 = vbcast.lane.b32.xlu0 %v1045_v54, 264 }
 0x340   :  { %v5136_v36 = vpop.permute.xlu1 %1545 }
 0x341   :  { %6806 = vst [vmem:[#allocation96_spill] sm:$0xff] %v5136_v36  ;;  %v5138_v35 = vpop.permute.xlu0 %1530 }
 0x342   :  { %6807 = vst [vmem:[#allocation97_spill] sm:$0xff] %v5138_v35  ;;  %1074 = vbcast.lane.b32.xlu1 %v1064_v28, 272 }
 0x343   :  { %1299 = vbcast.lane.b32.xlu0 %v1293_v59, 264 }
 0x344   :  { %v5140_v18 = vpop.permute.xlu1 %1817 }
 0x345   :  { %6808 = vst [vmem:[#allocation98_spill] sm:$0xff] %v5140_v18  ;;  %v5142_v25 = vpop.permute.xlu0 %1802 }
 0x346   :  { %6809 = vst [vmem:[#allocation99_spill] sm:$0xff] %v5142_v25  ;;  %1322 = vbcast.lane.b32.xlu1 %v1312_v15, 272 }
 0x347   :  { %1059 = vbcast.lane.b32.xlu0 %v1045_v54, 280  ;;  %v1872_v54 = vrot.slane %v4839_v43, %v4645_v4 }
 0x348   :  { %v5144_v22 = vpop.permute.xlu1 %1825 }
 0x349   :  { %6810 = vst [vmem:[#allocation100_spill] sm:$0xff] %v5144_v22  ;;  %v5148_v46 = vpop.permute.xlu0 %1810 }
 0x34a   :  { %6811 = vst [vmem:[#allocation101_spill] sm:$0xff] %v5148_v46  ;;  %1594 = vbcast.lane.b32.xlu1 %v1592_v0, 256 }
 0x34b   :  { %1307 = vbcast.lane.b32.xlu0 %v1293_v59, 280 }
 0x34c   :  { %v5150_v36 = vpop.permute.xlu1 %2097 }
 0x34d   :  { %6812 = vst [vmem:[#allocation102_spill] sm:$0xff] %v5150_v36  ;;  %v5152_v35 = vpop.permute.xlu0 %2082  ;;  %v5168_v36 = vrot.slane %v4839_v43, %v4664_v14 }
 0x34e   :  { %6813 = vst [vmem:[#allocation103_spill] sm:$0xff] %v5152_v35  ;;  %1602 = vbcast.lane.b32.xlu1 %v1592_v0, 272 }
 0x34f   :  { %1579 = vbcast.lane.b32.xlu0 %v1573_v23, 264 }
 0x350   :  { %v5154_v18 = vpop.permute.xlu1 %2105 }
 0x351   :  { %6814 = vst [vmem:[#allocation104_spill] sm:$0xff] %v5154_v18  ;;  %v5158_v25 = vpop.permute.xlu0 %2090 }
 0x352   :  { %6815 = vst [vmem:[#allocation105_spill] sm:$0xff] %v5158_v25  ;;  %1874 = vbcast.lane.b32.xlu1 %v1872_v54, 256 }
 0x353   :  { %1587 = vbcast.lane.b32.xlu0 %v1573_v23, 280  ;;  %v1083_v23 = vrot.slane %v4847_v50, %v4642_v3 }
 0x354   :  { %v5160_v22 = vpop.permute.xlu1 %2377 }
 0x355   :  { %6816 = vst [vmem:[#allocation106_spill] sm:$0xff] %v5160_v22  ;;  %v5162_v46 = vpop.permute.xlu0 %2362 }
 0x356   :  { %6817 = vst [vmem:[#allocation107_spill] sm:$0xff] %v5162_v46  ;;  %1882 = vbcast.lane.b32.xlu1 %v1872_v54, 272 }
 0x357   :  { %1859 = vbcast.lane.b32.xlu0 %v1853_v10, 264 }
 0x358   :  { %v5164_v59 = vpop.permute.xlu1 %2385 }
 0x359   :  { %6818 = vst [vmem:[#allocation108_spill] sm:$0xff] %v5164_v59  ;;  %v5170_v18 = vpop.permute.xlu0 %2370  ;;  %v1331_v59 = vrot.slane %v4847_v50, %v4648_v5 }
 0x35a   :  { %6819 = vst [vmem:[#allocation109_spill] sm:$0xff] %v5170_v18  ;;  %2154 = vbcast.lane.b32.xlu1 %v5168_v36, 256 }
 0x35b   :  { %1867 = vbcast.lane.b32.xlu0 %v1853_v10, 280 }
 0x35c   :  { %v5173_v25 = vpop.permute.xlu1 %1028 }
 0x35d   :  { %6820 = vst [vmem:[#allocation110_spill] sm:$0xff] %v5173_v25  ;;  %v5177_v22 = vpop.permute.xlu0 %1013 }
 0x35e   :  { %6821 = vst [vmem:[#allocation111_spill] sm:$0xff] %v5177_v22  ;;  %1085 = vbcast.lane.b32.xlu1 %v1083_v23, 256 }
 0x35f   :  { %2139 = vbcast.lane.b32.xlu0 %v2133_v40, 264 }
 0x360   :  { %v5179_v46 = vpop.permute.xlu1 %1276 }
 0x361   :  { %6822 = vst [vmem:[#allocation112_spill] sm:$0xff] %v5179_v46  ;;  %v5183_v35 = vpop.permute.xlu0 %1261 }
 0x362   :  { %6823 = vst [vmem:[#allocation113_spill] sm:$0xff] %v5183_v35  ;;  %1333 = vbcast.lane.b32.xlu1 %v1331_v59, 256 }
 0x363   :  { %2147 = vbcast.lane.b32.xlu0 %v2133_v40, 280 }
 0x364   :  { %v5185_v18 = vpop.permute.xlu1 %1036 }
 0x365   :  { %6824 = vst [vmem:[#allocation114_spill] sm:$0xff] %v5185_v18  ;;  %v5187_v10 = vpop.permute.xlu0 %1021 }
 0x366   :  { %6825 = vst [vmem:[#allocation115_spill] sm:$0xff] %v5187_v10  ;;  %1093 = vbcast.lane.b32.xlu1 %v1083_v23, 272 }
 0x367   :  { %1070 = vbcast.lane.b32.xlu0 %v1064_v28, 264 }
 0x368   :  { %v5189_v25 = vpop.permute.xlu1 %1284 }
 0x369   :  { %6826 = vst [vmem:[#allocation116_spill] sm:$0xff] %v5189_v25  ;;  %v5191_v22 = vpop.permute.xlu0 %1269 }
 0x36a   :  { %6827 = vst [vmem:[#allocation117_spill] sm:$0xff] %v5191_v22  ;;  %1341 = vbcast.lane.b32.xlu1 %v1331_v59, 272  ;;  %v1891_v22 = vrot.slane %v4847_v50, %v4645_v4 }
 0x36b   :  { %1318 = vbcast.lane.b32.xlu0 %v1312_v15, 264 }
 0x36c   :  { %v5193_v46 = vpop.permute.xlu1 %1556 }
 0x36d   :  { %6828 = vst [vmem:[#allocation118_spill] sm:$0xff] %v5193_v46  ;;  %v5197_v35 = vpop.permute.xlu0 %1541 }
 0x36e   :  { %6829 = vst [vmem:[#allocation119_spill] sm:$0xff] %v5197_v35  ;;  %1613 = vbcast.lane.b32.xlu1 %v1611_v27, 256 }
 0x36f   :  { %1078 = vbcast.lane.b32.xlu0 %v1064_v28, 280 }
 0x370   :  { %v5199_v40 = vpop.permute.xlu1 %1564 }
 0x371   :  { %6830 = vst [vmem:[#allocation120_spill] sm:$0xff] %v5199_v40  ;;  %v5201_v18 = vpop.permute.xlu0 %1549 }
 0x372   :  { %6831 = vst [vmem:[#allocation121_spill] sm:$0xff] %v5201_v18  ;;  %1621 = vbcast.lane.b32.xlu1 %v1611_v27, 272 }
 0x373   :  { %1326 = vbcast.lane.b32.xlu0 %v1312_v15, 280 }
 0x374   :  { %v5203_v25 = vpop.permute.xlu1 %1836 }
 0x375   :  { %6832 = vst [vmem:[#allocation122_spill] sm:$0xff] %v5203_v25  ;;  %v5207_v10 = vpop.permute.xlu0 %1821 }
 0x376   :  { %6833 = vst [vmem:[#allocation123_spill] sm:$0xff] %v5207_v10  ;;  %1893 = vbcast.lane.b32.xlu1 %v1891_v22, 256 }
 0x377   :  { %1598 = vbcast.lane.b32.xlu0 %v1592_v0, 264 }
 0x378   :  { %v5209_v46 = vpop.permute.xlu1 %1844 }
 0x379   :  { %6834 = vst [vmem:[#allocation124_spill] sm:$0xff] %v5209_v46  ;;  %v5211_v35 = vpop.permute.xlu0 %1829 }
 0x37a   :  { %6835 = vst [vmem:[#allocation125_spill] sm:$0xff] %v5211_v35  ;;  %1901 = vbcast.lane.b32.xlu1 %v1891_v22, 272 }
 0x37b   :  { %1606 = vbcast.lane.b32.xlu0 %v1592_v0, 280 }
 0x37c   :  { %v5213_v28 = vpop.permute.xlu1 %2116 }
 0x37d   :  { %6836 = vst [vmem:[#allocation126_spill] sm:$0xff] %v5213_v28  ;;  %v5215_v40 = vpop.permute.xlu0 %2101 }
 0x37e   :  { %6837 = vst [vmem:[#allocation127_spill] sm:$0xff] %v5215_v40 }
 0x37f   :  { %1878 = vbcast.lane.b32.xlu0 %v1872_v54, 264 }
 0x380   :  { %v5217_v15 = vpop.permute.xlu1 %2124 }
 0x381   :  { %6838 = vst [vmem:[#allocation128_spill] sm:$0xff] %v5217_v15  ;;  %v5219_v25 = vpop.permute.xlu0 %2109 }
 0x382   :  { %6839 = vst [vmem:[#allocation129_spill] sm:$0xff] %v5219_v25 }
 0x383   :  { %1886 = vbcast.lane.b32.xlu0 %v1872_v54, 280 }
 0x384   :  { %v5223_v10 = vpop.permute.xlu1 %1047 }
 0x385   :  { %v5221_v18 = vpop.permute.xlu0 %2381  ;;  %6841 = vst [vmem:[#allocation131_spill] sm:$0xff] %v5223_v10 }
 0x386   :  { %6840 = vst [vmem:[#allocation130_spill] sm:$0xff] %v5221_v18 }
 0x387   :  { %2158 = vbcast.lane.b32.xlu0 %v5168_v36, 264 }
 0x388   :  { %v5228_v0 = vpop.permute.xlu1 %1295 }
 0x389   :  { %v5226_v46 = vpop.permute.xlu0 %1032  ;;  %6843 = vst [vmem:[#allocation133_spill] sm:$0xff] %v5228_v0  ;;  %v661_v0 = vsel %vm341_vm10, %v4861_v57, 0.0 }
 0x38a   :  { %6842 = vst [vmem:[#allocation132_spill] sm:$0xff] %v5226_v46 }
 0x38b   :  { %1089 = vbcast.lane.b32.xlu0 %v1083_v23, 264 }
 0x38c   :  { %v5234_v15 = vpop.permute.xlu1 %1055 }
 0x38d   :  { %v5230_v28 = vpop.permute.xlu0 %1280 }
 0x38e   :  { %6844 = vst [vmem:[#allocation134_spill] sm:$0xff] %v5230_v28 }
 0x38f   :  { %1337 = vbcast.lane.b32.xlu0 %v1331_v59, 264 }
 0x390   :  { %v5238_v25 = vpop.permute.xlu1 %1303 }
 0x391   :  { %v5232_v35 = vpop.permute.xlu0 %1040 }
 0x392   :  { %6845 = vst [vmem:[#allocation135_spill] sm:$0xff] %v5232_v35 }
 0x393   :  { %1097 = vbcast.lane.b32.xlu0 %v1083_v23, 280  ;;  %v670_v23 = vsel %vm341_vm10, %v4863_v52, 0.0 }
 0x394   :  { %v5246_v28 = vpop.permute.xlu1 %1575 }
 0x395   :  { %v5236_v54 = vpop.permute.xlu0 %1288  ;;  %6849 = vst [vmem:[#allocation139_spill] sm:$0xff] %v5246_v28 }
 0x396   :  { %6846 = vst [vmem:[#allocation136_spill] sm:$0xff] %v5236_v54 }
 0x397   :  { %1345 = vbcast.lane.b32.xlu0 %v1331_v59, 280 }
 0x398   :  { %v5252_v59 = vpop.permute.xlu1 %1583 }
 0x399   :  { %v5240_v10 = vpop.permute.xlu0 %1560 }
 0x39a   :  { %6847 = vst [vmem:[#allocation137_spill] sm:$0xff] %v5240_v10  ;;  %v5297_v10 = vrot.slane %v4847_v50, %v4664_v14 }
 0x39b   :  { %1617 = vbcast.lane.b32.xlu0 %v1611_v27, 264 }
 0x39d   :  { %v5242_v46 = vpop.permute.xlu0 %1568 }
 0x39e   :  { %6848 = vst [vmem:[#allocation138_spill] sm:$0xff] %v5242_v46  ;;  %662 = vadd.xlane.f32.xlu1 %v661_v0  ;;  %v676_v46 = vsel %vm341_vm10, %v4878_v61, 0.0  ;;  %v5260_v0 = vpop.permute.xlu1 %1855 }
 0x39f   :  { %1625 = vbcast.lane.b32.xlu0 %v1611_v27, 280  ;;  %6853 = vst [vmem:[#allocation143_spill] sm:$0xff] %v5260_v0  ;;  %v2636_v0 = vrot.slane %v4823_v21, %v4673_v17 }
 0x3a1   :  { %v5248_v35 = vpop.permute.xlu0 %1840 }
 0x3a2   :  { %6850 = vst [vmem:[#allocation140_spill] sm:$0xff] %v5248_v35  ;;  %671 = vadd.xlane.f32.xlu1 %v670_v23  ;;  %v5264_v28 = vpop.permute.xlu1 %1863 }
 0x3a3   :  { %1897 = vbcast.lane.b32.xlu0 %v1891_v22, 264 }
 0x3a5   :  { %v5254_v54 = vpop.permute.xlu0 %1848 }
 0x3a6   :  { %6851 = vst [vmem:[#allocation141_spill] sm:$0xff] %v5254_v54  ;;  %677 = vadd.xlane.f32.xlu1 %v676_v46  ;;  %v2394_v54 = vrot.slane %v4831_v33, %v4661_v13  ;;  %v5272_v35 = vpop.permute.xlu1 %2135 }
 0x3a7   :  { %1905 = vbcast.lane.b32.xlu0 %v1891_v22, 280  ;;  %6857 = vst [vmem:[#allocation147_spill] sm:$0xff] %v5272_v35  ;;  %v658_v35 = vsel %vm341_vm10, %v4859_v30, 0.0  ;;  %v667_v30 = vsel %vm341_vm10, %v4880_v8, 0.0  ;;  %v679_v8 = vsel %vm341_vm10, %v4886_v45, 0.0 }
 0x3a9   :  { %v5258_v57 = vpop.permute.xlu0 %2120 }
 0x3aa   :  { %6852 = vst [vmem:[#allocation142_spill] sm:$0xff] %v5258_v57  ;;  %v5277_v46 = vpop.permute.xlu1 %2143  ;;  %v664_v57 = vsel %vm341_vm10, %v4866_v41, 0.0  ;;  %v5310_v41 = vrot.slane %v4836_v37, %v4661_v13 }
 0x3ad   :  { %v5262_v27 = vpop.permute.xlu0 %2128 }
 0x3ae   :  { %6854 = vst [vmem:[#allocation144_spill] sm:$0xff] %v5262_v27 }
 0x3b1   :  { %v5266_v52 = vpop.permute.xlu0 %1051 }
 0x3b2   :  { %6855 = vst [vmem:[#allocation145_spill] sm:$0xff] %v5266_v52 }
 0x3b5   :  { %v5268_v23 = vpop.permute.xlu0 %1299 }
 0x3b6   :  { %6856 = vst [vmem:[#allocation146_spill] sm:$0xff] %v5268_v23  ;;  %v5284_v23 = vpop.permute.xlu1 %1066 }
 0x3b7   :  { %2396 = vbcast.lane.b32.xlu1 %v2394_v54, 256 }
 0x3b9   :  { %v5274_v61 = vpop.permute.xlu0 %1059 }
 0x3ba   :  { %v5291_v27 = vpop.permute.xlu1 %1314 }
 0x3bb   :  { %2608 = vbcast.lane.b32.xlu1 %v4876_v51, 272 }
 0x3bd   :  { %v5280_v22 = vpop.permute.xlu0 %1307 }
 0x3bf   :  { %2627 = vbcast.lane.b32.xlu1 %v4903_v20, 272 }
 0x3c1   :  { %v5288_v52 = vpop.permute.xlu0 %1579 }
 0x3c2   :  { %6858 = vst [vmem:[#allocation148_spill] sm:$0xff] %v5288_v52  ;;  %v673_v52 = vsel %vm341_vm10, %v4882_v11, 0.0  ;;  %v5323_v11 = vrot.slane %v4828_v29, %v4673_v17 }
 0x3c3   :  { %2638 = vbcast.lane.b32.xlu1 %v2636_v0, 256 }
 0x3c5   :  { %v5300_v18 = vpop.permute.xlu0 %1587 }
 0x3c6   :  { %659 = vadd.xlane.f32.xlu0 %v658_v35  ;;  %v5304_v35 = vpop.permute.xlu1 %1074 }
 0x3c7   :  { %2162 = vbcast.lane.b32.xlu1 %v5168_v36, 272  ;;  %6859 = vst [vmem:[#allocation149_spill] sm:$0xff] %v5304_v35 }
 0x3ca   :  { %665 = vadd.xlane.f32.xlu0 %v664_v57  ;;  %v5312_v57 = vpop.permute.xlu0 %1859  ;;  %v5315_v40 = vpop.permute.xlu1 %1322 }
 0x3cb   :  { %2173 = vbcast.lane.b32.xlu1 %v5297_v10, 256  ;;  %6860 = vst [vmem:[#allocation150_spill] sm:$0xff] %v5312_v57  ;;  %6861 = vst [vmem:[#allocation151_spill] sm:$0xff] %v5315_v40 }
 0x3ce   :  { %668 = vadd.xlane.f32.xlu0 %v667_v30  ;;  %v5319_v30 = vpop.permute.xlu0 %1867  ;;  %v5325_v6 = vpop.permute.xlu1 %1594 }
 0x3cf   :  { %2404 = vbcast.lane.b32.xlu1 %v2394_v54, 272 }
 0x3d2   :  { %674 = vadd.xlane.f32.xlu0 %v673_v52  ;;  %v5330_v52 = vrot.slane %v4814_v9, %v4670_v16  ;;  %v5332_v57 = vpop.permute.xlu0 %2139  ;;  %v5335_v45 = vpop.permute.xlu1 %1602 }
 0x3d3   :  { %2415 = vbcast.lane.b32.xlu1 %v5310_v41, 256  ;;  %6862 = vst [vmem:[#allocation152_spill] sm:$0xff] %v5332_v57  ;;  %6863 = vst [vmem:[#allocation153_spill] sm:$0xff] %v5335_v45 }
 0x3d6   :  { %680 = vadd.xlane.f32.xlu0 %v679_v8  ;;  %v5339_v8 = vrot.slane %v4872_v60, %v4670_v16  ;;  %v5342_v19 = vpop.permute.xlu0 %2147  ;;  %v5344_v62 = vpop.permute.xlu1 %1874 }
 0x3d7   :  { %2646 = vbcast.lane.b32.xlu1 %v2636_v0, 272 }
 0x3da   :  { %v5346_v38 = vpop.permute.xlu0 %1070  ;;  %v5349_v9 = vpop.permute.xlu1 %1882 }
 0x3db   :  { %2657 = vbcast.lane.b32.xlu1 %v5323_v11, 256  ;;  %6864 = vst [vmem:[#allocation154_spill] sm:$0xff] %v5349_v9 }
 0x3de   :  { %v5351_v57 = vpop.permute.xlu0 %1318  ;;  %v5353_v12 = vpop.permute.xlu1 %2154 }
 0x3df   :  { %2880 = vbcast.lane.b32.xlu1 %v5330_v52, 256 }
 0x3e2   :  { %v5356_v60 = vpop.permute.xlu0 %1078  ;;  %v5359_v56 = vpop.permute.xlu1 %1085 }
 0x3e3   :  { %2899 = vbcast.lane.b32.xlu1 %v5339_v8, 256  ;;  %6865 = vst [vmem:[#allocation155_spill] sm:$0xff] %v5356_v60  ;;  %6866 = vst [vmem:[#allocation156_spill] sm:$0xff] %v5359_v56 }
 0x3e6   :  { %v5361_v32 = vpop.permute.xlu0 %1326  ;;  %v5363_v49 = vpop.permute.xlu1 %1333 }
 0x3e7   :  { %6867 = vst [vmem:[#allocation157_spill] sm:$0xff] %v5361_v32  ;;  %6868 = vst [vmem:[#allocation158_spill] sm:$0xff] %v5363_v49 }
 0x3ea   :  { %v5369_v7 = vpop.permute.xlu1 %1093 }
 0x3eb   :  { %6869 = vst [vmem:[#allocation159_spill] sm:$0xff] %v5369_v7 }
 0x3ec   :  { %2389 = vbcast.lane.b32.xlu0 %v5009_v26, 280  ;;  %v5366_v26 = vpop.permute.xlu0 %1598 }
 0x3ee   :  { %v5373_v34 = vpop.permute.xlu1 %1341 }
 0x3ef   :  { %6871 = vst [vmem:[#allocation161_spill] sm:$0xff] %v5373_v34 }
 0x3f0   :  { %2400 = vbcast.lane.b32.xlu0 %v2394_v54, 264 }
 0x3f2   :  { %v5378_v58 = vpop.permute.xlu1 %1613 }
 0x3f3   :  { %6872 = vst [vmem:[#allocation162_spill] sm:$0xff] %v5378_v58 }
 0x3f4   :  { %2612 = vbcast.lane.b32.xlu0 %v4876_v51, 280  ;;  %v5371_v51 = vpop.permute.xlu0 %1606 }
 0x3f5   :  { %6870 = vst [vmem:[#allocation160_spill] sm:$0xff] %v5371_v51 }
 0x3f6   :  { %v5383_v49 = vpop.permute.xlu1 %1621 }
 0x3f7   :  { %6874 = vst [vmem:[#allocation164_spill] sm:$0xff] %v5383_v49 }
 0x3f8   :  { %2631 = vbcast.lane.b32.xlu0 %v4903_v20, 280  ;;  %v5376_v20 = vpop.permute.xlu0 %1878 }
 0x3fa   :  { %v5388_v55 = vpop.permute.xlu1 %1893 }
 0x3fb   :  { %6876 = vst [vmem:[#allocation166_spill] sm:$0xff] %v5388_v55 }
 0x3fc   :  { %2642 = vbcast.lane.b32.xlu0 %v2636_v0, 264 }
 0x3fe   :  { %v5392_v34 = vpop.permute.xlu1 %1901 }
 0x3ff   :  { %6878 = vst [vmem:[#allocation168_spill] sm:$0xff] %v5392_v34 }
 0x400   :  { %2166 = vbcast.lane.b32.xlu0 %v5168_v36, 280  ;;  %v5381_v36 = vpop.permute.xlu0 %1886 }
 0x401   :  { %6873 = vst [vmem:[#allocation163_spill] sm:$0xff] %v5381_v36 }
 0x404   :  { %2177 = vbcast.lane.b32.xlu0 %v5297_v10, 264 }
 0x408   :  { %2408 = vbcast.lane.b32.xlu0 %v2394_v54, 280  ;;  %v5386_v54 = vpop.permute.xlu0 %2158 }
 0x409   :  { %6875 = vst [vmem:[#allocation165_spill] sm:$0xff] %v5386_v54 }
 0x40c   :  { %2419 = vbcast.lane.b32.xlu0 %v5310_v41, 264  ;;  %v5390_v56 = vpop.permute.xlu0 %1089 }
 0x40d   :  { %6877 = vst [vmem:[#allocation167_spill] sm:$0xff] %v5390_v56 }
 0x410   :  { %2650 = vbcast.lane.b32.xlu0 %v2636_v0, 280  ;;  %v5394_v7 = vpop.permute.xlu0 %1337 }
 0x411   :  { %6879 = vst [vmem:[#allocation169_spill] sm:$0xff] %v5394_v7 }
 0x414   :  { %2661 = vbcast.lane.b32.xlu0 %v5323_v11, 264  ;;  %v5397_v36 = vpop.permute.xlu0 %1097 }
 0x415   :  { %6880 = vst [vmem:[#allocation170_spill] sm:$0xff] %v5397_v36 }
 0x418   :  { %2884 = vbcast.lane.b32.xlu0 %v5330_v52, 264  ;;  %v5399_v49 = vpop.permute.xlu0 %1345 }
 0x419   :  { %6881 = vst [vmem:[#allocation171_spill] sm:$0xff] %v5399_v49 }
 0x41c   :  { %v5401_v45 = vpop.permute.xlu0 %1617 }
 0x41d   :  { %6882 = vst [vmem:[#allocation172_spill] sm:$0xff] %v5401_v45 }
 0x420   :  { %v5406_v55 = vpop.permute.xlu0 %1625 }
 0x421   :  { %6884 = vst [vmem:[#allocation174_spill] sm:$0xff] %v5406_v55 }
 0x424   :  { %v5408_v56 = vpop.permute.xlu0 %1897 }
 0x425   :  { %6885 = vst [vmem:[#allocation175_spill] sm:$0xff] %v5408_v56 }
 0x427   :  { %v663_v0 = vpop.xlane.xlu1 %662 }
 0x428   :  { %v683_v58 = vmul.f32 0.17677669, %v663_v0  ;;  %v5410_v7 = vpop.permute.xlu0 %1905 }
 0x429   :  { %6886 = vst [vmem:[#allocation176_spill] sm:$0xff] %v5410_v7 }
 0x42a   :  { %v758_v9 = vadd.f32 %v4916_v42, %v683_v58 }
 0x42b   :  { %v672_v0 = vpop.xlane.xlu1 %671 }
 0x42c   :  { %v767_v51 = vmul.f32 1.442695, %v758_v9  ;;  %v686_v9 = vmul.f32 0.17677669, %v672_v0 }
 0x42e   :  { %4442 = vpow2.f32 %v767_v51  ;;  %v761_v32 = vadd.f32 %v4922_v47, %v686_v9  ;;  %v2935_v9 = vrot.slane %v4828_v29, %v4670_v16 }
 0x42f   :  { %v678_v34 = vpop.xlane.xlu1 %677 }
 0x430   :  { %v688_v40 = vmul.f32 0.17677669, %v678_v34  ;;  %v773_v7 = vmul.f32 1.442695, %v761_v32 }
 0x43b   :  { %v5403_v54 = vpop.eup %4442 }
 0x43c   :  { %6883 = vst [vmem:[#allocation173_spill] sm:$0xff] %v5403_v54  ;;  %793 = vperm.xlu1 %4413, %v5403_v54   ;;  %v763_v54 = vadd.f32 %v4926_v53, %v688_v40 }
 0x44f   :  { %v660_v42 = vpop.xlane.xlu0 %659 }
 0x450   :  { %v682_v58 = vmul.f32 0.17677669, %v660_v42 }
 0x452   :  { %v757_v51 = vadd.f32 %v4908_v31, %v682_v58 }
 0x453   :  { %v666_v49 = vpop.xlane.xlu0 %665 }
 0x454   :  { %v765_v36 = vmul.f32 1.442695, %v757_v51  ;;  %v684_v45 = vmul.f32 0.17677669, %v666_v49  ;;  %v777_v49 = vmul.f32 1.442695, %v763_v54 }
 0x456   :  { %4444 = vpow2.f32 %v765_v36  ;;  %v759_v55 = vadd.f32 %v4912_v39, %v684_v45  ;;  %v2674_v45 = vrot.slane %v4831_v33, %v4673_v17 }
 0x457   :  { %v669_v60 = vpop.xlane.xlu0 %668 }
 0x458   :  { %v769_v56 = vmul.f32 1.442695, %v759_v55  ;;  %v685_v35 = vmul.f32 0.17677669, %v669_v60  ;;  %v2916_v60 = vrot.slane %v4823_v21, %v4670_v16  ;;  %v2693_v21 = vrot.slane %v4836_v37, %v4673_v17 }
 0x45a   :  { %4446 = vpow2.f32 %v769_v56  ;;  %v760_v0 = vadd.f32 %v4918_v44, %v685_v35  ;;  %v2432_v35 = vrot.slane %v4839_v43, %v4661_v13 }
 0x45b   :  { %v675_v42 = vpop.xlane.xlu0 %674  ;;  %4448 = vpow2.f32 %v773_v7 }
 0x45c   :  { %v771_v31 = vmul.f32 1.442695, %v760_v0  ;;  %v687_v58 = vmul.f32 0.17677669, %v675_v42 }
 0x45e   :  { %4450 = vpow2.f32 %v771_v31  ;;  %v762_v47 = vadd.f32 %v4924_v48, %v687_v58  ;;  %v2712_v58 = vrot.slane %v4839_v43, %v4673_v17 }
 0x45f   :  { %v681_v34 = vpop.xlane.xlu0 %680  ;;  %4452 = vpow2.f32 %v777_v49 }
 0x460   :  { %v775_v36 = vmul.f32 1.442695, %v762_v47  ;;  %v689_v39 = vmul.f32 0.17677669, %v681_v34  ;;  %v2954_v34 = vrot.slane %v4831_v33, %v4670_v16 }
 0x462   :  { %4454 = vpow2.f32 %v775_v36  ;;  %v764_v32 = vadd.f32 %v4928_v63, %v689_v39 }
 0x463   :  { %v5419_v55 = vpop.eup %4444 }
 0x464   :  { %v779_v53 = vmul.f32 1.442695, %v764_v32  ;;  %790 = vperm.xlu0 %4412, %v5419_v55   ;;  %v2731_v32 = vrot.slane %v4847_v50, %v4673_v17 }
 0x466   :  { %4456 = vpow2.f32 %v779_v53 }
 0x467   :  { %v5422_v44 = vpop.eup %4446 }
 0x468   :  { %796 = vperm.xlu1 %4413, %v5422_v44   ;;  %v5425_v7 = vpop.eup %4448 }
 0x46b   :  { %v5427_v48 = vpop.eup %4450 }
 0x46c   :  { %802 = vperm.xlu1 %4413, %v5425_v7   ;;  %799 = vperm.xlu0 %4412, %v5427_v48   ;;  %v5431_v56 = vpop.eup %4452 }
 0x46f   :  { %v5433_v63 = vpop.eup %4454 }
 0x470   :  { %808 = vperm.xlu1 %4413, %v5431_v56   ;;  %805 = vperm.xlu0 %4412, %v5433_v63  }
 0x473   :  { %v5437_v40 = vpop.eup %4456 }
 0x474   :  { %2181 = vbcast.lane.b32.xlu1 %v5297_v10, 272  ;;  %811 = vperm.xlu0 %4412, %v5437_v40  }
 0x478   :  { %2423 = vbcast.lane.b32.xlu1 %v5310_v41, 272  ;;  %2903 = vbcast.lane.b32.xlu0 %v5339_v8, 264 }
 0x47c   :  { %2434 = vbcast.lane.b32.xlu1 %v2432_v35, 256  ;;  %2185 = vbcast.lane.b32.xlu0 %v5297_v10, 280  ;;  %v2451_v10 = vrot.slane %v4847_v50, %v4661_v13 }
 0x480   :  { %2665 = vbcast.lane.b32.xlu1 %v5323_v11, 272  ;;  %2427 = vbcast.lane.b32.xlu0 %v5310_v41, 280  ;;  %v5459_v41 = vpop.permute.xlu1 %2396 }
 0x481   :  { %6887 = vst [vmem:[#allocation177_spill] sm:$0xff] %v5459_v41  ;;  %v3011_v41 = vrot.slane %v4847_v50, %v4670_v16 }
 0x484   :  { %2676 = vbcast.lane.b32.xlu1 %v2674_v45, 256  ;;  %2438 = vbcast.lane.b32.xlu0 %v2432_v35, 264  ;;  %v5465_v54 = vpop.permute.xlu1 %2608 }
 0x485   :  { %6889 = vst [vmem:[#allocation179_spill] sm:$0xff] %v5465_v54 }
 0x488   :  { %2888 = vbcast.lane.b32.xlu1 %v5330_v52, 272  ;;  %2669 = vbcast.lane.b32.xlu0 %v5323_v11, 280  ;;  %v5461_v11 = vpop.permute.xlu0 %2389 }
 0x489   :  { %6888 = vst [vmem:[#allocation178_spill] sm:$0xff] %v5461_v11 }
 0x48c   :  { %2907 = vbcast.lane.b32.xlu1 %v5339_v8, 272  ;;  %2680 = vbcast.lane.b32.xlu0 %v2674_v45, 264 }
 0x490   :  { %2918 = vbcast.lane.b32.xlu1 %v2916_v60, 256  ;;  %2892 = vbcast.lane.b32.xlu0 %v5330_v52, 280  ;;  %v5467_v52 = vpop.permute.xlu0 %2400 }
 0x491   :  { %6890 = vst [vmem:[#allocation180_spill] sm:$0xff] %v5467_v52 }
 0x494   :  { %2442 = vbcast.lane.b32.xlu1 %v2432_v35, 272  ;;  %2911 = vbcast.lane.b32.xlu0 %v5339_v8, 280  ;;  %v5469_v8 = vpop.permute.xlu1 %2627  ;;  %v5473_v51 = vpop.permute.xlu0 %2612 }
 0x495   :  { %6891 = vst [vmem:[#allocation181_spill] sm:$0xff] %v5469_v8  ;;  %6892 = vst [vmem:[#allocation182_spill] sm:$0xff] %v5473_v51 }
 0x498   :  { %2453 = vbcast.lane.b32.xlu1 %v2451_v10, 256  ;;  %2922 = vbcast.lane.b32.xlu0 %v2916_v60, 264  ;;  %v5475_v0 = vpop.permute.xlu1 %2638  ;;  %v5477_v42 = vpop.permute.xlu0 %2631 }
 0x499   :  { %6893 = vst [vmem:[#allocation183_spill] sm:$0xff] %v5475_v0  ;;  %6894 = vst [vmem:[#allocation184_spill] sm:$0xff] %v5477_v42 }
 0x49c   :  { %2684 = vbcast.lane.b32.xlu1 %v2674_v45, 272  ;;  %2446 = vbcast.lane.b32.xlu0 %v2432_v35, 280  ;;  %v5479_v31 = vpop.permute.xlu1 %2162  ;;  %v5483_v49 = vpop.permute.xlu0 %2642 }
 0x49d   :  { %6895 = vst [vmem:[#allocation185_spill] sm:$0xff] %v5483_v49 }
 0x4a0   :  { %2695 = vbcast.lane.b32.xlu1 %v2693_v21, 256  ;;  %2457 = vbcast.lane.b32.xlu0 %v2451_v10, 264  ;;  %v5485_v29 = vpop.permute.xlu1 %2173  ;;  %v5487_v47 = vpop.permute.xlu0 %2166 }
 0x4a1   :  { %6896 = vst [vmem:[#allocation186_spill] sm:$0xff] %v5485_v29  ;;  %v2992_v29 = vrot.slane %v4839_v43, %v4670_v16 }
 0x4a4   :  { %2926 = vbcast.lane.b32.xlu1 %v2916_v60, 272  ;;  %2688 = vbcast.lane.b32.xlu0 %v2674_v45, 280  ;;  %v5491_v36 = vpop.permute.xlu1 %2404  ;;  %v5493_v39 = vpop.permute.xlu0 %2177  ;;  %v2973_v45 = vrot.slane %v4836_v37, %v4670_v16 }
 0x4a5   :  { %6897 = vst [vmem:[#allocation187_spill] sm:$0xff] %v5491_v36  ;;  %6898 = vst [vmem:[#allocation188_spill] sm:$0xff] %v5493_v39 }
 0x4a8   :  { %2937 = vbcast.lane.b32.xlu1 %v2935_v9, 256  ;;  %2699 = vbcast.lane.b32.xlu0 %v2693_v21, 264  ;;  %v5497_v53 = vpop.permute.xlu1 %2415  ;;  %v5499_v35 = vpop.permute.xlu0 %2408 }
 0x4a9   :  { %6899 = vst [vmem:[#allocation189_spill] sm:$0xff] %v5497_v53  ;;  %6900 = vst [vmem:[#allocation190_spill] sm:$0xff] %v5499_v35 }
 0x4ac   :  { %2461 = vbcast.lane.b32.xlu1 %v2451_v10, 272  ;;  %2930 = vbcast.lane.b32.xlu0 %v2916_v60, 280  ;;  %v5501_v33 = vpop.permute.xlu1 %2646  ;;  %v5505_v60 = vpop.permute.xlu0 %2419 }
 0x4ad   :  { %6901 = vst [vmem:[#allocation191_spill] sm:$0xff] %v5501_v33  ;;  %6902 = vst [vmem:[#allocation192_spill] sm:$0xff] %v5505_v60 }
 0x4b0   :  { %2703 = vbcast.lane.b32.xlu1 %v2693_v21, 272  ;;  %2941 = vbcast.lane.b32.xlu0 %v2935_v9, 264 }
 0x4b4   :  { %2714 = vbcast.lane.b32.xlu1 %v2712_v58, 256  ;;  %2465 = vbcast.lane.b32.xlu0 %v2451_v10, 280  ;;  %v5507_v10 = vpop.permute.xlu1 %2657 }
 0x4b5   :  { %6903 = vst [vmem:[#allocation193_spill] sm:$0xff] %v5507_v10 }
 0x4b8   :  { %2945 = vbcast.lane.b32.xlu1 %v2935_v9, 272  ;;  %2707 = vbcast.lane.b32.xlu0 %v2693_v21, 280  ;;  %v5509_v21 = vpop.permute.xlu0 %2650 }
 0x4b9   :  { %6904 = vst [vmem:[#allocation194_spill] sm:$0xff] %v5509_v21 }
 0x4bc   :  { %2956 = vbcast.lane.b32.xlu1 %v2954_v34, 256  ;;  %2718 = vbcast.lane.b32.xlu0 %v2712_v58, 264  ;;  %v5513_v39 = vpop.permute.xlu0 %2661 }
 0x4bd   :  { %6905 = vst [vmem:[#allocation195_spill] sm:$0xff] %v5513_v39 }
 0x4c0   :  { %2722 = vbcast.lane.b32.xlu1 %v2712_v58, 272  ;;  %2949 = vbcast.lane.b32.xlu0 %v2935_v9, 280  ;;  %v5511_v9 = vpop.permute.xlu1 %2880  ;;  %v5517_v37 = vpop.permute.xlu0 %2884 }
 0x4c4   :  { %2733 = vbcast.lane.b32.xlu1 %v2731_v32, 256  ;;  %2960 = vbcast.lane.b32.xlu0 %v2954_v34, 264 }
 0x4c8   :  { %2964 = vbcast.lane.b32.xlu1 %v2954_v34, 272  ;;  %2726 = vbcast.lane.b32.xlu0 %v2712_v58, 280  ;;  %v5515_v58 = vpop.permute.xlu1 %2899 }
 0x4c9   :  { %6906 = vst [vmem:[#allocation196_spill] sm:$0xff] %v5515_v58 }
 0x4cc   :  { %2975 = vbcast.lane.b32.xlu1 %v2973_v45, 256  ;;  %2737 = vbcast.lane.b32.xlu0 %v2731_v32, 264  ;;  %v794_v60 = vpop.permute.xlu1 %793 }
 0x4d0   :  { %2741 = vbcast.lane.b32.xlu1 %v2731_v32, 272  ;;  %2968 = vbcast.lane.b32.xlu0 %v2954_v34, 280  ;;  %v5523_v34 = vsub.s32 %v4683_v24, %v4636_v1 }
 0x4d2   :  { %6907 = vst [vmem:[#allocation197_spill] sm:$0xff] %v5523_v34  ;;  %v820_v52 = vrot.slane %v794_v60, %v5523_v34 }
 0x4d4   :  { %2979 = vbcast.lane.b32.xlu0 %v2973_v45, 264 }
 0x4d8   :  { %2745 = vbcast.lane.b32.xlu0 %v2731_v32, 280 }
 0x4dc   :  { %2987 = vbcast.lane.b32.xlu0 %v2973_v45, 280 }
 0x4df   :  { %v791_v53 = vpop.permute.xlu0 %790 }
 0x4e0   :  { %2998 = vbcast.lane.b32.xlu0 %v2992_v29, 264  ;;  %v816_v36 = vrot.slane %v791_v53, %v5523_v34 }
 0x4e2   :  { %v845_v39 = vsel %vm484_vm11, %v820_v52, %v816_v36 }
 0x4e3   :  { %v797_v35 = vpop.permute.xlu1 %796 }
 0x4e4   :  { %3006 = vbcast.lane.b32.xlu0 %v2992_v29, 280  ;;  %v824_v32 = vrot.slane %v797_v35, %v5523_v34 }
 0x4e6   :  { %v846_v1 = vsel %vm487_vm12, %v824_v32, %v845_v39 }
 0x4e7   :  { %v803_v11 = vpop.permute.xlu1 %802  ;;  %v800_v43 = vpop.permute.xlu0 %799 }
 0x4e8   :  { %v828_v10 = vrot.slane %v800_v43, %v5523_v34  ;;  %3017 = vbcast.lane.b32.xlu0 %v3011_v41, 264  ;;  %v832_v24 = vrot.slane %v803_v11, %v5523_v34 }
 0x4ea   :  { %v847_v53 = vsel %vm490_vm13, %v828_v10, %v846_v1 }
 0x4eb   :  { %v809_v21 = vpop.permute.xlu1 %808  ;;  %v806_v35 = vpop.permute.xlu0 %805  ;;  %v848_v33 = vsel %vm493_vm14, %v832_v24, %v847_v53 }
 0x4ec   :  { %v836_v60 = vrot.slane %v806_v35, %v5523_v34  ;;  %3025 = vbcast.lane.b32.xlu0 %v3011_v41, 280  ;;  %v840_v50 = vrot.slane %v809_v21, %v5523_v34 }
 0x4ee   :  { %v849_v52 = vsel %vm496_vm15, %v836_v60, %v848_v33 }
 0x4ef   :  { %v5539_v36 = vpop.permute.xlu1 %2181  ;;  %v812_v43 = vpop.permute.xlu0 %811  ;;  %v850_v11 = vsel %vm499_vm0, %v840_v50, %v849_v52 }
 0x4f0   :  { %v844_v39 = vrot.slane %v812_v43, %v5523_v34 }
 0x4f2   :  { %v851_v1 = vsel %vm502_vm1, %v844_v39, %v850_v11 }
 0x4f3   :  { %v854_v10 = vsel %vm853_vm2, %v851_v1, 0.0  ;;  %v5544_v32 = vpop.permute.xlu1 %2423  ;;  %v5554_v53 = vpop.permute.xlu0 %2903 }
 0x4f4   :  { %855 = vadd.xlane.f32.xlu1 %v854_v10  ;;  %6911 = vst [vmem:[#allocation201_spill] sm:$0xff] %v5554_v53 }
 0x4f7   :  { %v5546_v35 = vpop.permute.xlu1 %2434  ;;  %v5558_v50 = vpop.permute.xlu0 %2185 }
 0x4fb   :  { %v5548_v21 = vpop.permute.xlu1 %2665  ;;  %v5562_v43 = vpop.permute.xlu0 %2427 }
 0x4fc   :  { %6908 = vst [vmem:[#allocation198_spill] sm:$0xff] %v5548_v21 }
 0x4ff   :  { %v5550_v24 = vpop.permute.xlu1 %2676 }
 0x500   :  { %6909 = vst [vmem:[#allocation199_spill] sm:$0xff] %v5550_v24 }
 0x503   :  { %v5552_v33 = vpop.permute.xlu1 %2888 }
 0x504   :  { %6910 = vst [vmem:[#allocation200_spill] sm:$0xff] %v5552_v33 }
 0x505   :  { %2983 = vbcast.lane.b32.xlu1 %v2973_v45, 272  ;;  %v5566_v45 = vpop.permute.xlu0 %2438 }
 0x507   :  { %v5556_v60 = vpop.permute.xlu1 %2907 }
 0x508   :  { %6912 = vst [vmem:[#allocation202_spill] sm:$0xff] %v5556_v60 }
 0x509   :  { %2994 = vbcast.lane.b32.xlu1 %v2992_v29, 256  ;;  %v5570_v1 = vpop.permute.xlu0 %2669 }
 0x50a   :  { %6916 = vst [vmem:[#allocation206_spill] sm:$0xff] %v5570_v1 }
 0x50b   :  { %v5560_v52 = vpop.permute.xlu1 %2918 }
 0x50c   :  { %6913 = vst [vmem:[#allocation203_spill] sm:$0xff] %v5560_v52 }
 0x50d   :  { %3002 = vbcast.lane.b32.xlu1 %v2992_v29, 272  ;;  %v5574_v10 = vpop.permute.xlu0 %2680 }
 0x50e   :  { %6918 = vst [vmem:[#allocation208_spill] sm:$0xff] %v5574_v10 }
 0x50f   :  { %v5564_v39 = vpop.permute.xlu1 %2442 }
 0x510   :  { %6914 = vst [vmem:[#allocation204_spill] sm:$0xff] %v5564_v39 }
 0x511   :  { %3013 = vbcast.lane.b32.xlu1 %v3011_v41, 256 }
 0x513   :  { %v5568_v11 = vpop.permute.xlu1 %2453 }
 0x514   :  { %6915 = vst [vmem:[#allocation205_spill] sm:$0xff] %v5568_v11 }
 0x515   :  { %3021 = vbcast.lane.b32.xlu1 %v3011_v41, 272  ;;  %v5578_v41 = vpop.permute.xlu0 %2892 }
 0x516   :  { %6920 = vst [vmem:[#allocation210_spill] sm:$0xff] %v5578_v41 }
 0x517   :  { %v5572_v29 = vpop.permute.xlu1 %2684 }
 0x518   :  { %6917 = vst [vmem:[#allocation207_spill] sm:$0xff] %v5572_v29 }
 0x519   :  { %v5582_v21 = vpop.permute.xlu0 %2911 }
 0x51a   :  { %6922 = vst [vmem:[#allocation212_spill] sm:$0xff] %v5582_v21 }
 0x51b   :  { %v5576_v34 = vpop.permute.xlu1 %2695 }
 0x51c   :  { %6919 = vst [vmem:[#allocation209_spill] sm:$0xff] %v5576_v34 }
 0x51d   :  { %v5586_v39 = vpop.permute.xlu0 %2922 }
 0x51e   :  { %6924 = vst [vmem:[#allocation214_spill] sm:$0xff] %v5586_v39 }
 0x51f   :  { %v5580_v24 = vpop.permute.xlu1 %2926 }
 0x520   :  { %6921 = vst [vmem:[#allocation211_spill] sm:$0xff] %v5580_v24 }
 0x521   :  { %v5590_v11 = vpop.permute.xlu0 %2446 }
 0x522   :  { %6925 = vst [vmem:[#allocation215_spill] sm:$0xff] %v5590_v11 }
 0x523   :  { %v5584_v52 = vpop.permute.xlu1 %2937 }
 0x524   :  { %6923 = vst [vmem:[#allocation213_spill] sm:$0xff] %v5584_v52 }
 0x525   :  { %v5594_v29 = vpop.permute.xlu0 %2457 }
 0x526   :  { %6926 = vst [vmem:[#allocation216_spill] sm:$0xff] %v5594_v29 }
 0x527   :  { %v5588_v49 = vpop.permute.xlu1 %2461 }
 0x529   :  { %v5598_v34 = vpop.permute.xlu0 %2688 }
 0x52a   :  { %6927 = vst [vmem:[#allocation217_spill] sm:$0xff] %v5598_v34 }
 0x52b   :  { %v5592_v1 = vpop.permute.xlu1 %2703 }
 0x52d   :  { %v5602_v24 = vpop.permute.xlu0 %2699 }
 0x52e   :  { %6929 = vst [vmem:[#allocation219_spill] sm:$0xff] %v5602_v24 }
 0x52f   :  { %v5596_v10 = vpop.permute.xlu1 %2714 }
 0x531   :  { %v5606_v52 = vpop.permute.xlu0 %2930 }
 0x532   :  { %6931 = vst [vmem:[#allocation221_spill] sm:$0xff] %v5606_v52 }
 0x533   :  { %v5600_v0 = vpop.permute.xlu1 %2945 }
 0x534   :  { %6928 = vst [vmem:[#allocation218_spill] sm:$0xff] %v5600_v0 }
 0x535   :  { %v5610_v60 = vpop.permute.xlu0 %2941 }
 0x536   :  { %6933 = vst [vmem:[#allocation223_spill] sm:$0xff] %v5610_v60 }
 0x537   :  { %v5604_v21 = vpop.permute.xlu1 %2956 }
 0x538   :  { %6930 = vst [vmem:[#allocation220_spill] sm:$0xff] %v5604_v21 }
 0x539   :  { %v5614_v42 = vpop.permute.xlu0 %2465 }
 0x53b   :  { %v5608_v39 = vpop.permute.xlu1 %2722 }
 0x53c   :  { %6932 = vst [vmem:[#allocation222_spill] sm:$0xff] %v5608_v39 }
 0x53d   :  { %v5618_v8 = vpop.permute.xlu0 %2707 }
 0x53f   :  { %v5612_v11 = vpop.permute.xlu1 %2733 }
 0x540   :  { %6934 = vst [vmem:[#allocation224_spill] sm:$0xff] %v5612_v11 }
 0x541   :  { %v5622_v0 = vpop.permute.xlu0 %2718 }
 0x543   :  { %v5616_v29 = vpop.permute.xlu1 %2964 }
 0x544   :  { %6935 = vst [vmem:[#allocation225_spill] sm:$0xff] %v5616_v29 }
 0x545   :  { %v5626_v21 = vpop.permute.xlu0 %2949 }
 0x546   :  { %6937 = vst [vmem:[#allocation227_spill] sm:$0xff] %v5626_v21 }
 0x547   :  { %v5620_v34 = vpop.permute.xlu1 %2975 }
 0x548   :  { %6936 = vst [vmem:[#allocation226_spill] sm:$0xff] %v5620_v34 }
 0x549   :  { %v5628_v39 = vpop.permute.xlu0 %2960 }
 0x54a   :  { %6938 = vst [vmem:[#allocation228_spill] sm:$0xff] %v5628_v39 }
 0x54b   :  { %v5624_v24 = vpop.permute.xlu1 %2741 }
 0x54d   :  { %v5630_v60 = vpop.permute.xlu0 %2726 }
 0x54e   :  { %6939 = vst [vmem:[#allocation229_spill] sm:$0xff] %v5630_v60 }
 0x551   :  { %v5636_v41 = vpop.permute.xlu0 %2737 }
 0x552   :  { %6940 = vst [vmem:[#allocation230_spill] sm:$0xff] %v5636_v41 }
 0x555   :  { %v5654_v21 = vpop.permute.xlu0 %2968 }
 0x556   :  { %6943 = vst [vmem:[#allocation233_spill] sm:$0xff] %v5654_v21 }
 0x57d   :  { %v856_v52 = vpop.xlane.xlu1 %855 }
 0x57e   :  { %4458 = vrcp.f32 %v856_v52 }
 0x58b   :  { %v5632_v11 = vpop.eup %4458 }
 0x58c   :  { %v882_v29 = vrot.slane %v5632_v11, %v4661_v13  ;;  %v886_v33 = vrot.slane %v5632_v11, %v4673_v17 }
 0x58e   :  { %v5639_v34 = vmul.f32 %v5433_v63, %v882_v29  ;;  %v5652_v39 = vmul.f32 %v5431_v56, %v886_v33  ;;  %v5676_v33 = vpop.permute.xlu0 %2979 }
 0x58f   :  { %6945 = vst [vmem:[#allocation235_spill] sm:$0xff] %v5676_v33 }
 0x590   :  { %v5645_v52 = vrot.slane %v5639_v34, %v4642_v3  ;;  %v5649_v60 = vrot.slane %v5639_v34, %v4648_v5  ;;  %v5666_v54 = vrot.slane %v5652_v39, %v4642_v3  ;;  %v5670_v56 = vrot.slane %v5652_v39, %v4648_v5 }
 0x591   :  { %v5688_v53 = vrot.slane %v5639_v34, %v4645_v4 }
 0x592   :  { %6941 = vst [vmem:[#allocation231_spill] sm:$0xff] %v5645_v52  ;;  %6942 = vst [vmem:[#allocation232_spill] sm:$0xff] %v5649_v60  ;;  %v1153_v63 = vmul.f32 %v5234_v15, %v5645_v52  ;;  %v1154_v29 = vmul.f32 %v5274_v61, %v5645_v52  ;;  %v1401_v41 = vmul.f32 %v5238_v25, %v5649_v60 }
 0x593   :  { %v1402_v51 = vmul.f32 %v5280_v22, %v5649_v60  ;;  %v5674_v15 = vrot.slane %v5639_v34, %v4639_v2  ;;  %v1155_v25 = vmul.f32 %v5284_v23, %v5666_v54  ;;  %v1403_v22 = vmul.f32 %v5291_v27, %v5670_v56  ;;  %6946 = vst [vmem:[#allocation236_spill] sm:$0xff] %v5688_v53 }
 0x594   :  { %v1433_v61 = vadd.f32 %v1401_v41, %v1153_v63  ;;  %v5692_v41 = vrot.slane %v5652_v39, %v4639_v2  ;;  %v1156_v23 = vmul.f32 %v5346_v38, %v5666_v54  ;;  %v1404_v27 = vmul.f32 %v5351_v57, %v5670_v56 }
 0x595   :  { %6944 = vst [vmem:[#allocation234_spill] sm:$0xff] %v5674_v15  ;;  %v1434_v21 = vadd.f32 %v1402_v51, %v1154_v29  ;;  %v1681_v60 = vmul.f32 %v5252_v59, %v5674_v15  ;;  %v1682_v52 = vmul.f32 %v5300_v18, %v5674_v15  ;;  %v1435_v59 = vadd.f32 %v1403_v22, %v1155_v25  ;;  %v5698_v29 = vpop.permute.xlu0 %2745 }
 0x596   :  { %v1961_v18 = vmul.f32 %v5264_v28, %v5688_v53  ;;  %v1962_v33 = vmul.f32 %v5319_v30, %v5688_v53  ;;  %v5706_v15 = vrot.slane %v5639_v34, %v4664_v14  ;;  %v5712_v38 = vrot.slane %v5652_v39, %v4645_v4 }
 0x597   :  { %v1713_v51 = vadd.f32 %v1681_v60, %v1433_v61  ;;  %v1714_v63 = vadd.f32 %v1682_v52, %v1434_v21  ;;  %v1683_v21 = vmul.f32 %v5325_v6, %v5692_v41  ;;  %v2984_v52 = vpop.permute.xlu1 %2983  ;;  %v1436_v61 = vadd.f32 %v1404_v27, %v1156_v23 }
 0x598   :  { %6947 = vst [vmem:[#allocation237_spill] sm:$0xff] %v5706_v15  ;;  %v890_v28 = vrot.slane %v5632_v11, %v4670_v16  ;;  %v2241_v30 = vmul.f32 %v5277_v46, %v5706_v15  ;;  %v2242_v22 = vmul.f32 %v5342_v19, %v5706_v15  ;;  %v5722_v6 = vrot.slane %v5639_v34, %v4661_v13 }
 0x599   :  { %v1993_v57 = vadd.f32 %v1961_v18, %v1713_v51  ;;  %v1994_v60 = vadd.f32 %v1962_v33, %v1714_v63  ;;  %v1715_v25 = vadd.f32 %v1683_v21, %v1435_v59  ;;  %v862_v51 = vrot.slane %v5632_v11, %v4642_v3  ;;  %v2988_v46 = vpop.permute.xlu0 %2987 }
 0x59a   :  { %6948 = vst [vmem:[#allocation238_spill] sm:$0xff] %v5722_v6  ;;  %v1684_v33 = vmul.f32 %v5366_v26, %v5692_v41  ;;  %v1963_v63 = vmul.f32 %v5344_v62, %v5712_v38  ;;  %v5732_v23 = vrot.slane %v5652_v39, %v4664_v14  ;;  %v866_v19 = vrot.slane %v5632_v11, %v4648_v5 }
 0x59b   :  { %v2273_v27 = vadd.f32 %v2241_v30, %v1993_v57  ;;  %v2274_v59 = vadd.f32 %v2242_v22, %v1994_v60  ;;  %v870_v18 = vrot.slane %v5632_v11, %v4639_v2  ;;  %v5740_v21 = vrot.slane %v5639_v34, %v4673_v17 }
 0x59c   :  { %v1716_v26 = vadd.f32 %v1684_v33, %v1436_v61  ;;  %v1995_v15 = vadd.f32 %v1963_v63, %v1715_v25  ;;  %v874_v62 = vrot.slane %v5632_v11, %v4645_v4  ;;  %v2521_v53 = vmul.f32 %v5544_v32, %v5722_v6  ;;  %v5757_v25 = vpop.permute.xlu1 %2994  ;;  %v6950_v32 = vld [vmem:[#allocation173_spill] sm:$0xff] }
 0x59d   :  { %v2522_v58 = vmul.f32 %v5562_v43, %v5722_v6  ;;  %v5749_v57 = vmul.f32 %v5437_v40, %v890_v28  ;;  %v878_v60 = vrot.slane %v5632_v11, %v4664_v14  ;;  %v1964_v30 = vmul.f32 %v5376_v20, %v5712_v38  ;;  %6949 = vst [vmem:[#allocation239_spill] sm:$0xff] %v5757_v25  ;;  %v5777_v63 = vpop.permute.xlu0 %2998 }
 0x59e   :  { %v2243_v61 = vmul.f32 %v5353_v12, %v5732_v23  ;;  %v5760_v22 = vmul.f32 %v5419_v55, %v862_v51  ;;  %v5763_v33 = vmul.f32 %v6950_v32, %v866_v19  ;;  %v2553_v43 = vadd.f32 %v2521_v53, %v2273_v27  ;;  %6953 = vst [vmem:[#allocation241_spill] sm:$0xff] %v5777_v63  ;;  %v6954_v53 = vld [vmem:[#allocation149_spill] sm:$0xff]  ;;  %v6956_v27 = vld [vmem:[#allocation151_spill] sm:$0xff] }
 0x59f   :  { %v5767_v40 = vrot.slane %v5639_v34, %v4670_v16  ;;  %v2554_v11 = vadd.f32 %v2522_v58, %v2274_v59  ;;  %v5771_v20 = vrot.slane %v5652_v39, %v4661_v13  ;;  %v2801_v12 = vmul.f32 %v5592_v1, %v5740_v21  ;;  %v6955_v34 = vld [vmem:[#allocation155_spill] sm:$0xff]  ;;  %v6957_v32 = vld [vmem:[#allocation157_spill] sm:$0xff] }
 0x5a0   :  { %v2802_v55 = vmul.f32 %v5618_v8, %v5740_v21  ;;  %v1996_v28 = vadd.f32 %v1964_v30, %v1716_v26  ;;  %v2275_v51 = vadd.f32 %v2243_v61, %v1995_v15  ;;  %v1157_v19 = vmul.f32 %v6954_v53, %v5666_v54  ;;  %v6958_v1 = vld [vmem:[#allocation165_spill] sm:$0xff] }
 0x5a1   :  { %6951 = vst [vmem:[#allocation173_spill] sm:$0xff] %v5767_v40  ;;  %6952 = vst [vmem:[#allocation240_spill] sm:$0xff] %v5771_v20  ;;  %v1158_v58 = vmul.f32 %v6955_v34, %v5666_v54  ;;  %v1405_v59 = vmul.f32 %v6956_v27, %v5670_v56  ;;  %v1406_v25 = vmul.f32 %v6957_v32, %v5670_v56  ;;  %v5806_v32 = vpop.permute.xlu1 %3002 }
 0x5a2   :  { %v2244_v6 = vmul.f32 %v6958_v1, %v5732_v23  ;;  %v5791_v8 = vrot.slane %v5652_v39, %v4673_v17  ;;  %v5794_v15 = vmul.f32 %v5422_v44, %v870_v18  ;;  %v5797_v26 = vmul.f32 %v5427_v48, %v874_v62  ;;  %6960 = vst [vmem:[#allocation155_spill] sm:$0xff] %v5806_v32  ;;  %v6990_v32 = vld [vmem:[#allocation29_spill] sm:$0xff] }
 0x5a3   :  { %v2833_v54 = vadd.f32 %v2801_v12, %v2553_v43  ;;  %v2834_v30 = vadd.f32 %v2802_v55, %v2554_v11  ;;  %v2523_v61 = vmul.f32 %v5546_v35, %v5771_v20  ;;  %v5802_v56 = vmul.f32 %v5425_v7, %v878_v60  ;;  %v5828_v60 = vpop.permute.xlu0 %3006  ;;  %v6967_v11 = vld [vmem:[#allocation160_spill] sm:$0xff] }
 0x5a4   :  { %6959 = vst [vmem:[#allocation149_spill] sm:$0xff] %v5791_v8  ;;  %v3081_v53 = vmul.f32 %v2984_v52, %v5767_v40  ;;  %v3082_v34 = vmul.f32 %v2988_v46, %v5767_v40  ;;  %v2276_v27 = vadd.f32 %v2244_v6, %v1996_v28  ;;  %v5810_v44 = vrot.slane %v5749_v57, %v4642_v3 }
 0x5a5   :  { %v2555_v48 = vadd.f32 %v2523_v61, %v2275_v51  ;;  %v5814_v18 = vrot.slane %v5652_v39, %v4670_v16  ;;  %v1437_v35 = vadd.f32 %v1405_v59, %v1157_v19  ;;  %v1438_v62 = vadd.f32 %v1406_v25, %v1158_v58  ;;  %6963 = vst [vmem:[#allocation165_spill] sm:$0xff] %v5828_v60  ;;  %v6966_v25 = vld [vmem:[#allocation153_spill] sm:$0xff]  ;;  %v6970_v51 = vld [vmem:[#allocation159_spill] sm:$0xff]  ;;  %v6974_v61 = vld [vmem:[#allocation170_spill] sm:$0xff] }
 0x5a6   :  { %v2803_v7 = vmul.f32 %v5596_v10, %v5791_v8  ;;  %v2524_v52 = vmul.f32 %v5566_v45, %v5771_v20  ;;  %v5822_v6 = vmul.f32 %v5622_v0, %v5791_v8  ;;  %v5826_v46 = vrot.slane %v5749_v57, %v4648_v5  ;;  %v6969_v0 = vld [vmem:[#allocation154_spill] sm:$0xff] }
 0x5a7   :  { %6961 = vst [vmem:[#allocation151_spill] sm:$0xff] %v5814_v18  ;;  %v5830_v39 = vadd.f32 %v3081_v53, %v2833_v54  ;;  %v5832_v43 = vadd.f32 %v3082_v34, %v2834_v30  ;;  %v1685_v10 = vmul.f32 %v6966_v25, %v5692_v41  ;;  %v1686_v45 = vmul.f32 %v6967_v11, %v5692_v41  ;;  %v5858_v30 = vpop.permute.xlu1 %3013  ;;  %v6975_v34 = vld [vmem:[#allocation161_spill] sm:$0xff]  ;;  %v7013_v18 = vld [vmem:[#allocation75_spill] sm:$0xff] }
 0x5a8   :  { %6962 = vst [vmem:[#allocation157_spill] sm:$0xff] %v5822_v6  ;;  %v5838_v12 = vadd.f32 %v2524_v52, %v2276_v27  ;;  %v1965_v55 = vmul.f32 %v6969_v0, %v5712_v38  ;;  %v5844_v28 = vrot.slane %v5749_v57, %v4639_v2  ;;  %v1161_v19 = vmul.f32 %v6970_v51, %v5810_v44  ;;  %v6980_v0 = vld [vmem:[#allocation164_spill] sm:$0xff] }
 0x5a9   :  { %6964 = vst [vmem:[#allocation242_spill] sm:$0xff] %v5830_v39  ;;  %6965 = vst [vmem:[#allocation243_spill] sm:$0xff] %v5832_v43  ;;  %v5848_v58 = vadd.f32 %v2803_v7, %v2555_v48  ;;  %v1717_v59 = vadd.f32 %v1685_v10, %v1437_v35  ;;  %v1718_v1 = vadd.f32 %v1686_v45, %v1438_v62  ;;  %v6976_v48 = vld [vmem:[#allocation171_spill] sm:$0xff] }
 0x5aa   :  { %6968 = vst [vmem:[#allocation153_spill] sm:$0xff] %v5838_v12  ;;  %v5852_v54 = vrot.slane %v5749_v57, %v4673_v17  ;;  %v5856_v41 = vrot.slane %v5749_v57, %v4645_v4  ;;  %6973 = vst [vmem:[#allocation159_spill] sm:$0xff] %v5858_v30  ;;  %v1162_v53 = vmul.f32 %v6974_v61, %v5810_v44  ;;  %v6977_v62 = vld [vmem:[#allocation163_spill] sm:$0xff]  ;;  %v6981_v61 = vld [vmem:[#allocation174_spill] sm:$0xff] }
 0x5ab   :  { %6971 = vst [vmem:[#allocation160_spill] sm:$0xff] %v5848_v58  ;;  %v1409_v27 = vmul.f32 %v6975_v34, %v5826_v46  ;;  %v1410_v35 = vmul.f32 %v6976_v48, %v5826_v46  ;;  %v1966_v7 = vmul.f32 %v6977_v62, %v5712_v38  ;;  %v5870_v52 = vmul.f32 %v5479_v31, %v5732_v23  ;;  %v5884_v34 = vpop.permute.xlu0 %3017  ;;  %v6992_v43 = vld [vmem:[#allocation35_spill] sm:$0xff] }
 0x5ac   :  { %6972 = vst [vmem:[#allocation154_spill] sm:$0xff] %v5852_v54  ;;  %v5874_v25 = vrot.slane %v5749_v57, %v4664_v14  ;;  %v5878_v10 = vrot.slane %v5749_v57, %v4661_v13  ;;  %v1689_v51 = vmul.f32 %v6980_v0, %v5844_v28  ;;  %v1690_v38 = vmul.f32 %v6981_v61, %v5844_v28  ;;  %v6984_v61 = vld [vmem:[#allocation176_spill] sm:$0xff] }
 0x5ad   :  { %v1441_v11 = vadd.f32 %v1409_v27, %v1161_v19  ;;  %v1442_v45 = vadd.f32 %v1410_v35, %v1162_v53  ;;  %6982 = vst [vmem:[#allocation171_spill] sm:$0xff] %v5884_v34  ;;  %v5886_v31 = vadd.f32 %v1965_v55, %v1717_v59  ;;  %v5888_v48 = vadd.f32 %v1966_v7, %v1718_v1  ;;  %v6983_v35 = vld [vmem:[#allocation168_spill] sm:$0xff]  ;;  %v6989_v34 = vld [vmem:[#allocation27_spill] sm:$0xff] }
 0x5ae   :  { %6978 = vst [vmem:[#allocation170_spill] sm:$0xff] %v5874_v25  ;;  %6979 = vst [vmem:[#allocation161_spill] sm:$0xff] %v5878_v10  ;;  %v5892_v62 = vmul.f32 %v5487_v47, %v5732_v23  ;;  %v2809_v19 = vmul.f32 %v5624_v24, %v5852_v54  ;;  %v1969_v0 = vmul.f32 %v6983_v35, %v5856_v41  ;;  %v6985_v55 = vld [vmem:[#allocation156_spill] sm:$0xff]  ;;  %v6988_v35 = vld [vmem:[#allocation25_spill] sm:$0xff] }
 0x5af   :  { %v1721_v53 = vadd.f32 %v1689_v51, %v1441_v11  ;;  %v1722_v27 = vadd.f32 %v1690_v38, %v1442_v45  ;;  %v1970_v30 = vmul.f32 %v6984_v61, %v5856_v41  ;;  %v5902_v59 = vmul.f32 %v6985_v55, %v5810_v44  ;;  %v3022_v11 = vpop.permute.xlu1 %3021 }
 0x5b0   :  { %v5906_v1 = vrot.slane %v5749_v57, %v4670_v16  ;;  %v2249_v47 = vmul.f32 %v5539_v36, %v5874_v25  ;;  %v2529_v24 = vmul.f32 %v5588_v49, %v5878_v10  ;;  %v2250_v45 = vmul.f32 %v5558_v50, %v5874_v25 }
 0x5b1   :  { %v2001_v23 = vadd.f32 %v1969_v0, %v1721_v53  ;;  %v2002_v7 = vadd.f32 %v1970_v30, %v1722_v27  ;;  %v5916_v51 = vrot.slane %v5760_v22, %v4642_v3  ;;  %v2530_v57 = vmul.f32 %v5614_v42, %v5878_v10  ;;  %v6987_v53 = vld [vmem:[#allocation23_spill] sm:$0xff]  ;;  %v3026_v0 = vpop.permute.xlu0 %3025 }
 0x5b2   :  { %6986 = vst [vmem:[#allocation163_spill] sm:$0xff] %v5906_v1  ;;  %v5922_v38 = vrot.slane %v5760_v22, %v4648_v5  ;;  %v5926_v49 = vrot.slane %v5760_v22, %v4639_v2  ;;  %v5930_v36 = vrot.slane %v5760_v22, %v4645_v4  ;;  %v2810_v61 = vmul.f32 %v5698_v29, %v5852_v54 }
 0x5b3   :  { %v2281_v50 = vadd.f32 %v2249_v47, %v2001_v23  ;;  %v2282_v30 = vadd.f32 %v2250_v45, %v2002_v7  ;;  %v1131_v27 = vmul.f32 %v6987_v53, %v5916_v51  ;;  %v1132_v42 = vmul.f32 %v6988_v35, %v5916_v51  ;;  %v6991_v45 = vld [vmem:[#allocation26_spill] sm:$0xff] }
 0x5b4   :  { %v3089_v55 = vmul.f32 %v3022_v11, %v5906_v1  ;;  %v1379_v60 = vmul.f32 %v6989_v34, %v5922_v38  ;;  %v1380_v58 = vmul.f32 %v6990_v32, %v5922_v38  ;;  %v3090_v7 = vmul.f32 %v3026_v0, %v5906_v1  ;;  %v6993_v11 = vld [vmem:[#allocation30_spill] sm:$0xff] }
 0x5b5   :  { %v2561_v47 = vadd.f32 %v2529_v24, %v2281_v50  ;;  %v2562_v23 = vadd.f32 %v2530_v57, %v2282_v30  ;;  %v1659_v53 = vmul.f32 %v6991_v45, %v5926_v49  ;;  %v1660_v29 = vmul.f32 %v6992_v43, %v5926_v49  ;;  %v6997_v45 = vld [vmem:[#allocation43_spill] sm:$0xff] }
 0x5b6   :  { %v1411_v35 = vadd.f32 %v1379_v60, %v1131_v27  ;;  %v1412_v10 = vadd.f32 %v1380_v58, %v1132_v42  ;;  %v1939_v54 = vmul.f32 %v6993_v11, %v5930_v36  ;;  %v5952_v32 = vrot.slane %v5760_v22, %v4664_v14  ;;  %v6994_v60 = vld [vmem:[#allocation39_spill] sm:$0xff] }
 0x5b7   :  { %v2841_v39 = vadd.f32 %v2809_v19, %v2561_v47  ;;  %v2842_v34 = vadd.f32 %v2810_v61, %v2562_v23  ;;  %v5956_v24 = vrot.slane %v5760_v22, %v4661_v13  ;;  %v1940_v58 = vmul.f32 %v6994_v60, %v5930_v36  ;;  %v6995_v19 = vld [vmem:[#allocation167_spill] sm:$0xff] }
 0x5b8   :  { %v1691_v57 = vadd.f32 %v1659_v53, %v1411_v35  ;;  %v1692_v50 = vadd.f32 %v1660_v29, %v1412_v10  ;;  %v5962_v43 = vrot.slane %v5760_v22, %v4673_v17  ;;  %v5966_v30 = vmul.f32 %v6995_v19, %v5810_v44  ;;  %v6996_v10 = vld [vmem:[#allocation34_spill] sm:$0xff] }
 0x5b9   :  { %v3121_v27 = vadd.f32 %v3089_v55, %v2841_v39  ;;  %v3122_v42 = vadd.f32 %v3090_v7, %v2842_v34  ;;  %v5970_v0 = vrot.slane %v5760_v22, %v4670_v16  ;;  %v2219_v23 = vmul.f32 %v6996_v10, %v5952_v32  ;;  %v6999_v29 = vld [vmem:[#allocation38_spill] sm:$0xff]  ;;  %v7000_v39 = vld [vmem:[#allocation47_spill] sm:$0xff] }
 0x5ba   :  { %v1971_v61 = vadd.f32 %v1939_v54, %v1691_v57  ;;  %v1972_v47 = vadd.f32 %v1940_v58, %v1692_v50  ;;  %v2220_v53 = vmul.f32 %v6997_v45, %v5952_v32  ;;  %v2499_v44 = vmul.f32 %v6999_v29, %v5956_v24  ;;  %v7001_v7 = vld [vmem:[#allocation42_spill] sm:$0xff]  ;;  %v7002_v34 = vld [vmem:[#allocation51_spill] sm:$0xff] }
 0x5bb   :  { %v5976_v35 = vpack.c.bf16 %v3122_v42, %v3121_v27  ;;  %v2500_v55 = vmul.f32 %v7000_v39, %v5956_v24  ;;  %v2779_v22 = vmul.f32 %v7001_v7, %v5962_v43  ;;  %v2780_v57 = vmul.f32 %v7002_v34, %v5962_v43  ;;  %v7007_v39 = vld [vmem:[#allocation46_spill] sm:$0xff]  ;;  %v7008_v34 = vld [vmem:[#allocation67_spill] sm:$0xff] }
 0x5bc   :  { %v2251_v11 = vadd.f32 %v2219_v23, %v1971_v61  ;;  %v2252_v54 = vadd.f32 %v2220_v53, %v1972_v47  ;;  %v5988_v50 = vrot.slane %v5763_v33, %v4642_v3  ;;  %v3059_v60 = vmul.f32 %v5511_v9, %v5970_v0  ;;  %v7003_v47 = vld [vmem:[#allocation53_spill] sm:$0xff]  ;;  %v7004_v23 = vld [vmem:[#allocation55_spill] sm:$0xff] }
 0x5bd   :  { %6998 = vst [vmem:[#allocation164_spill] sm:$0xff] %v5976_v35  ;;  %v3060_v58 = vmul.f32 %v5517_v37, %v5970_v0  ;;  %v5996_v19 = vrot.slane %v5763_v33, %v4648_v5  ;;  %v6000_v27 = vrot.slane %v5763_v33, %v4639_v2  ;;  %v7005_v9 = vld [vmem:[#allocation57_spill] sm:$0xff]  ;;  %v7006_v37 = vld [vmem:[#allocation59_spill] sm:$0xff] }
 0x5be   :  { %v2531_v42 = vadd.f32 %v2499_v44, %v2251_v11  ;;  %v2532_v61 = vadd.f32 %v2500_v55, %v2252_v54  ;;  %v1135_v10 = vmul.f32 %v7003_v47, %v5988_v50  ;;  %v1136_v45 = vmul.f32 %v7004_v23, %v5988_v50 }
 0x5bf   :  { %v1383_v53 = vmul.f32 %v7005_v9, %v5996_v19  ;;  %v1384_v29 = vmul.f32 %v7006_v37, %v5996_v19  ;;  %v1663_v7 = vmul.f32 %v7007_v39, %v6000_v27  ;;  %v1664_v35 = vmul.f32 %v7008_v34, %v6000_v27  ;;  %v7010_v39 = vld [vmem:[#allocation50_spill] sm:$0xff] }
 0x5c0   :  { %v2811_v44 = vadd.f32 %v2779_v22, %v2531_v42  ;;  %v2812_v55 = vadd.f32 %v2780_v57, %v2532_v61  ;;  %v6016_v11 = vrot.slane %v5763_v33, %v4645_v4  ;;  %v6020_v54 = vrot.slane %v5763_v33, %v4664_v14  ;;  %v7009_v22 = vld [vmem:[#allocation158_spill] sm:$0xff] }
 0x5c1   :  { %v1415_v47 = vadd.f32 %v1383_v53, %v1135_v10  ;;  %v1416_v23 = vadd.f32 %v1384_v29, %v1136_v45  ;;  %v6024_v9 = vrot.slane %v5763_v33, %v4661_v13  ;;  %v6028_v37 = vrot.slane %v5763_v33, %v4673_v17  ;;  %v7011_v45 = vld [vmem:[#allocation71_spill] sm:$0xff]  ;;  %v7012_v29 = vld [vmem:[#allocation54_spill] sm:$0xff] }
 0x5c2   :  { %v6032_v57 = vmul.f32 %v7009_v22, %v5826_v46  ;;  %v3091_v42 = vadd.f32 %v3059_v60, %v2811_v44  ;;  %v3092_v61 = vadd.f32 %v3060_v58, %v2812_v55  ;;  %v1943_v34 = vmul.f32 %v7010_v39, %v6016_v11  ;;  %v7014_v22 = vld [vmem:[#allocation58_spill] sm:$0xff]  ;;  %v7015_v60 = vld [vmem:[#allocation79_spill] sm:$0xff] }
 0x5c3   :  { %v1695_v1 = vadd.f32 %v1663_v7, %v1415_v47  ;;  %v1696_v10 = vadd.f32 %v1664_v35, %v1416_v23  ;;  %v1944_v53 = vmul.f32 %v7011_v45, %v6016_v11  ;;  %v2223_v8 = vmul.f32 %v7012_v29, %v6020_v54  ;;  %v7016_v35 = vld [vmem:[#allocation62_spill] sm:$0xff] }
 0x5c4   :  { %v3123_v63 = vpack.c.bf16 %v3092_v61, %v3091_v42  ;;  %v2224_v6 = vmul.f32 %v7013_v18, %v6020_v54  ;;  %v2503_v12 = vmul.f32 %v7014_v22, %v6024_v9  ;;  %v2504_v58 = vmul.f32 %v7015_v60, %v6024_v9  ;;  %v7017_v61 = vld [vmem:[#allocation31_spill] sm:$0xff]  ;;  %v7018_v39 = vld [vmem:[#allocation22_spill] sm:$0xff] }
 0x5c5   :  { %v1975_v44 = vadd.f32 %v1943_v34, %v1695_v1  ;;  %v1976_v55 = vadd.f32 %v1944_v53, %v1696_v10  ;;  %v2783_v7 = vmul.f32 %v7016_v35, %v6028_v37  ;;  %v6050_v47 = vrot.slane %v5763_v33, %v4670_v16  ;;  %v7019_v1 = vld [vmem:[#allocation83_spill] sm:$0xff]  ;;  %v7020_v10 = vld [vmem:[#allocation196_spill] sm:$0xff]  ;;  %v7021_v33 = vld [vmem:[#allocation201_spill] sm:$0xff] }
 0x5c6   :  { %v3164_v23 = vunpack.c.h.b16 %v3123_v63  ;;  %v3163_v42 = vunpack.c.l.b16 %v3123_v63  ;;  %v1133_v18 = vmul.f32 %v7017_v61, %v5916_v51  ;;  %v1134_v45 = vmul.f32 %v7018_v39, %v5916_v51  ;;  %v7022_v63 = vld [vmem:[#allocation24_spill] sm:$0xff]  ;;  %v7023_v61 = vld [vmem:[#allocation33_spill] sm:$0xff] }
 0x5c7   :  { %v2255_v29 = vadd.f32 %v2223_v8, %v1975_v44  ;;  %v2256_v22 = vadd.f32 %v2224_v6, %v1976_v55  ;;  %v2784_v34 = vmul.f32 %v7019_v1, %v6028_v37  ;;  %v3063_v53 = vmul.f32 %v7020_v10, %v6050_v47  ;;  %v7024_v6 = vld [vmem:[#allocation28_spill] sm:$0xff]  ;;  %v7025_v55 = vld [vmem:[#allocation37_spill] sm:$0xff] }
 0x5c8   :  { %3199 = vperm.xlu0 %4412, %v3164_v23   ;;  %3196 = vperm.xlu1 %4413, %v3163_v42   ;;  %v3064_v60 = vmul.f32 %v7021_v33, %v6050_v47  ;;  %v1381_v35 = vmul.f32 %v7022_v63, %v5922_v38  ;;  %v1382_v25 = vmul.f32 %v7023_v61, %v5922_v38  ;;  %v7026_v42 = vld [vmem:[#allocation32_spill] sm:$0xff]  ;;  %v7027_v33 = vld [vmem:[#allocation41_spill] sm:$0xff] }
 0x5c9   :  { %v2535_v51 = vadd.f32 %v2503_v12, %v2255_v29  ;;  %v2536_v8 = vadd.f32 %v2504_v58, %v2256_v22  ;;  %v1661_v44 = vmul.f32 %v7024_v6, %v5926_v49  ;;  %v1662_v39 = vmul.f32 %v7025_v55, %v5926_v49  ;;  %v7028_v38 = vld [vmem:[#allocation36_spill] sm:$0xff]  ;;  %v7029_v58 = vld [vmem:[#allocation45_spill] sm:$0xff] }
 0x5ca   :  { %v1413_v1 = vadd.f32 %v1381_v35, %v1133_v18  ;;  %v1414_v23 = vadd.f32 %v1382_v25, %v1134_v45  ;;  %v1941_v10 = vmul.f32 %v7026_v42, %v5930_v36  ;;  %v1942_v40 = vmul.f32 %v7027_v33, %v5930_v36  ;;  %v7030_v49 = vld [vmem:[#allocation40_spill] sm:$0xff]  ;;  %v7031_v25 = vld [vmem:[#allocation49_spill] sm:$0xff]  ;;  %v7032_v36 = vld [vmem:[#allocation179_spill] sm:$0xff] }
 0x5cb   :  { %v2815_v63 = vadd.f32 %v2783_v7, %v2535_v51  ;;  %v2816_v20 = vadd.f32 %v2784_v34, %v2536_v8  ;;  %v2221_v12 = vmul.f32 %v7028_v38, %v5952_v32  ;;  %v2222_v29 = vmul.f32 %v7029_v58, %v5952_v32  ;;  %v7033_v34 = vld [vmem:[#allocation182_spill] sm:$0xff]  ;;  %v7034_v32 = vld [vmem:[#allocation200_spill] sm:$0xff]  ;;  %v7036_v42 = vld [vmem:[#allocation63_spill] sm:$0xff] }
 0x5cc   :  { %v1693_v22 = vadd.f32 %v1661_v44, %v1413_v1  ;;  %v1694_v61 = vadd.f32 %v1662_v39, %v1414_v23  ;;  %v2501_v18 = vmul.f32 %v7030_v49, %v5956_v24  ;;  %v2502_v45 = vmul.f32 %v7031_v25, %v5956_v24  ;;  %v7035_v39 = vld [vmem:[#allocation61_spill] sm:$0xff] }
 0x5cd   :  { %v3095_v35 = vadd.f32 %v3063_v53, %v2815_v63  ;;  %v3096_v6 = vadd.f32 %v3064_v60, %v2816_v20  ;;  %v2781_v7 = vmul.f32 %v7032_v36, %v5962_v43  ;;  %v2782_v51 = vmul.f32 %v7033_v34, %v5962_v43  ;;  %v7037_v20 = vld [vmem:[#allocation44_spill] sm:$0xff]  ;;  %v7038_v60 = vld [vmem:[#allocation65_spill] sm:$0xff] }
 0x5ce   :  { %v1973_v8 = vadd.f32 %v1941_v10, %v1693_v22  ;;  %v1974_v55 = vadd.f32 %v1942_v40, %v1694_v61  ;;  %v3061_v44 = vmul.f32 %v7034_v32, %v5970_v0  ;;  %v1137_v1 = vmul.f32 %v7035_v39, %v5988_v50  ;;  %v7039_v40 = vld [vmem:[#allocation48_spill] sm:$0xff]  ;;  %v7040_v38 = vld [vmem:[#allocation69_spill] sm:$0xff] }
 0x5cf   :  { %v3125_v23 = vpack.c.bf16 %v3096_v6, %v3095_v35  ;;  %v1138_v24 = vmul.f32 %v7036_v42, %v5988_v50  ;;  %v1385_v53 = vmul.f32 %v7037_v20, %v5996_v19  ;;  %v1386_v33 = vmul.f32 %v7038_v60, %v5996_v19  ;;  %v7041_v6 = vld [vmem:[#allocation210_spill] sm:$0xff]  ;;  %v7042_v34 = vld [vmem:[#allocation52_spill] sm:$0xff]  ;;  %v7047_v20 = vld [vmem:[#allocation81_spill] sm:$0xff] }
 0x5d0   :  { %v2253_v63 = vadd.f32 %v2221_v12, %v1973_v8  ;;  %v2254_v43 = vadd.f32 %v2222_v29, %v1974_v55  ;;  %v1665_v10 = vmul.f32 %v7039_v40, %v6000_v27  ;;  %v1666_v58 = vmul.f32 %v7040_v38, %v6000_v27  ;;  %v7043_v8 = vld [vmem:[#allocation73_spill] sm:$0xff]  ;;  %v7044_v39 = vld [vmem:[#allocation56_spill] sm:$0xff] }
 0x5d1   :  { %v3168_v22 = vunpack.c.h.b16 %v3125_v23  ;;  %v3167_v61 = vunpack.c.l.b16 %v3125_v23  ;;  %v1417_v49 = vadd.f32 %v1385_v53, %v1137_v1  ;;  %v1418_v25 = vadd.f32 %v1386_v33, %v1138_v24  ;;  %v7046_v42 = vld [vmem:[#allocation60_spill] sm:$0xff] }
 0x5d2   :  { %v2533_v35 = vadd.f32 %v2501_v18, %v2253_v63  ;;  %v2534_v50 = vadd.f32 %v2502_v45, %v2254_v43  ;;  %v3062_v36 = vmul.f32 %v7041_v6, %v5970_v0  ;;  %v1945_v19 = vmul.f32 %v7042_v34, %v6016_v11  ;;  %v7045_v18 = vld [vmem:[#allocation77_spill] sm:$0xff] }
 0x5d3   :  { %3211 = vperm.xlu0 %4412, %v3168_v22   ;;  %3208 = vperm.xlu1 %4413, %v3167_v61   ;;  %v1697_v12 = vadd.f32 %v1665_v10, %v1417_v49  ;;  %v1698_v29 = vadd.f32 %v1666_v58, %v1418_v25  ;;  %v1946_v55 = vmul.f32 %v7043_v8, %v6016_v11  ;;  %v7048_v11 = vld [vmem:[#allocation181_spill] sm:$0xff] }
 0x5d4   :  { %v2813_v27 = vadd.f32 %v2781_v7, %v2533_v35  ;;  %v2814_v32 = vadd.f32 %v2782_v51, %v2534_v50  ;;  %v2225_v1 = vmul.f32 %v7044_v39, %v6020_v54  ;;  %v2226_v45 = vmul.f32 %v7045_v18, %v6020_v54  ;;  %v7049_v51 = vld [vmem:[#allocation184_spill] sm:$0xff]  ;;  %v7050_v54 = vld [vmem:[#allocation202_spill] sm:$0xff]  ;;  %v7051_v49 = vld [vmem:[#allocation85_spill] sm:$0xff] }
 0x5d5   :  { %v1977_v23 = vadd.f32 %v1945_v19, %v1697_v12  ;;  %v1978_v0 = vadd.f32 %v1946_v55, %v1698_v29  ;;  %v2505_v24 = vmul.f32 %v7046_v42, %v6024_v9  ;;  %v2506_v53 = vmul.f32 %v7047_v20, %v6024_v9  ;;  %v7052_v35 = vld [vmem:[#allocation87_spill] sm:$0xff]  ;;  %v7054_v19 = vld [vmem:[#allocation64_spill] sm:$0xff]  ;;  %v7055_v29 = vld [vmem:[#allocation89_spill] sm:$0xff] }
 0x5d6   :  { %v3093_v60 = vadd.f32 %v3061_v44, %v2813_v27  ;;  %v3094_v33 = vadd.f32 %v3062_v36, %v2814_v32  ;;  %v2785_v7 = vmul.f32 %v7048_v11, %v6028_v37  ;;  %v2786_v63 = vmul.f32 %v7049_v51, %v6028_v37  ;;  %v7053_v36 = vld [vmem:[#allocation212_spill] sm:$0xff]  ;;  %v7056_v32 = vld [vmem:[#allocation70_spill] sm:$0xff] }
 0x5d7   :  { %v2257_v43 = vadd.f32 %v2225_v1, %v1977_v23  ;;  %v2258_v40 = vadd.f32 %v2226_v45, %v1978_v0  ;;  %v3065_v10 = vmul.f32 %v7050_v54, %v6050_v47  ;;  %v918_v38 = vrot.slane %v5794_v15, %v4642_v3  ;;  %v7057_v1 = vld [vmem:[#allocation95_spill] sm:$0xff]  ;;  %v7058_v0 = vld [vmem:[#allocation74_spill] sm:$0xff] }
 0x5d8   :  { %v6122_v58 = vpack.c.bf16 %v3094_v33, %v3093_v60  ;;  %v1174_v9 = vrot.slane %v5794_v15, %v4648_v5  ;;  %v1454_v44 = vrot.slane %v5794_v15, %v4639_v2  ;;  %v1734_v22 = vrot.slane %v5794_v15, %v4645_v4  ;;  %v7061_v54 = vld [vmem:[#allocation103_spill] sm:$0xff] }
 0x5d9   :  { %v2537_v37 = vadd.f32 %v2505_v24, %v2257_v43  ;;  %v2538_v61 = vadd.f32 %v2506_v53, %v2258_v40  ;;  %v1139_v25 = vmul.f32 %v7051_v49, %v918_v38  ;;  %v1140_v50 = vmul.f32 %v7052_v35, %v918_v38 }
 0x5da   :  { %v3165_v6 = vunpack.c.l.b16 %v6122_v58  ;;  %v3066_v34 = vmul.f32 %v7053_v36, %v6050_v47  ;;  %v1387_v12 = vmul.f32 %v7054_v19, %v1174_v9  ;;  %v1388_v8 = vmul.f32 %v7055_v29, %v1174_v9 }
 0x5db   :  { %v2817_v55 = vadd.f32 %v2785_v7, %v2537_v37  ;;  %v2818_v27 = vadd.f32 %v2786_v63, %v2538_v61  ;;  %v1667_v39 = vmul.f32 %v7056_v32, %v1454_v44  ;;  %v1668_v18 = vmul.f32 %v7057_v1, %v1454_v44  ;;  %v7059_v7 = vld [vmem:[#allocation99_spill] sm:$0xff]  ;;  %v7060_v63 = vld [vmem:[#allocation78_spill] sm:$0xff] }
 0x5dc   :  { %3202 = vperm.xlu1 %4413, %v3165_v6   ;;  %v1419_v45 = vadd.f32 %v1387_v12, %v1139_v25  ;;  %v1420_v23 = vadd.f32 %v1388_v8, %v1140_v50  ;;  %v1947_v42 = vmul.f32 %v7058_v0, %v1734_v22  ;;  %v2014_v24 = vrot.slane %v5794_v15, %v4664_v14  ;;  %v7062_v61 = vld [vmem:[#allocation82_spill] sm:$0xff]  ;;  %v7064_v6 = vld [vmem:[#allocation183_spill] sm:$0xff]  ;;  %v7065_v12 = vld [vmem:[#allocation185_spill] sm:$0xff] }
 0x5dd   :  { %v3097_v20 = vadd.f32 %v3065_v10, %v2817_v55  ;;  %v3098_v47 = vadd.f32 %v3066_v34, %v2818_v27  ;;  %v2294_v53 = vrot.slane %v5794_v15, %v4661_v13  ;;  %v2574_v60 = vrot.slane %v5794_v15, %v4673_v17  ;;  %v7063_v10 = vld [vmem:[#allocation107_spill] sm:$0xff]  ;;  %v7066_v55 = vld [vmem:[#allocation66_spill] sm:$0xff] }
 0x5de   :  { %v1699_v33 = vadd.f32 %v1667_v39, %v1419_v45  ;;  %v1700_v11 = vadd.f32 %v1668_v18, %v1420_v23  ;;  %v1948_v51 = vmul.f32 %v7059_v7, %v1734_v22  ;;  %v2227_v43 = vmul.f32 %v7060_v63, %v2014_v24  ;;  %v7067_v1 = vld [vmem:[#allocation203_spill] sm:$0xff]  ;;  %v7068_v45 = vld [vmem:[#allocation214_spill] sm:$0xff] }
 0x5df   :  { %v6148_v40 = vpack.c.bf16 %v3098_v47, %v3097_v20  ;;  %v2228_v37 = vmul.f32 %v7061_v54, %v2014_v24  ;;  %v2507_v49 = vmul.f32 %v7062_v61, %v2294_v53  ;;  %v2508_v25 = vmul.f32 %v7063_v10, %v2294_v53  ;;  %v7069_v0 = vld [vmem:[#allocation91_spill] sm:$0xff]  ;;  %v7070_v20 = vld [vmem:[#allocation68_spill] sm:$0xff]  ;;  %v7073_v54 = vld [vmem:[#allocation97_spill] sm:$0xff] }
 0x5e0   :  { %v1979_v35 = vadd.f32 %v1947_v42, %v1699_v33  ;;  %v1980_v50 = vadd.f32 %v1948_v51, %v1700_v11  ;;  %v2787_v36 = vmul.f32 %v7064_v6, %v2574_v60  ;;  %v2854_v34 = vrot.slane %v5794_v15, %v4670_v16  ;;  %v7071_v15 = vld [vmem:[#allocation93_spill] sm:$0xff]  ;;  %v7072_v11 = vld [vmem:[#allocation72_spill] sm:$0xff] }
 0x5e1   :  { %v3169_v19 = vunpack.c.l.b16 %v6148_v40  ;;  %v2788_v29 = vmul.f32 %v7065_v12, %v2574_v60  ;;  %v3170_v8 = vunpack.c.h.b16 %v6148_v40  ;;  %v1141_v27 = vmul.f32 %v7066_v55, %v918_v38  ;;  %v7074_v10 = vld [vmem:[#allocation76_spill] sm:$0xff]  ;;  %v7098_v40 = vld [vmem:[#allocation90_spill] sm:$0xff] }
 0x5e2   :  { %v2259_v32 = vadd.f32 %v2227_v43, %v1979_v35  ;;  %v2260_v39 = vadd.f32 %v2228_v37, %v1980_v50  ;;  %v3067_v18 = vmul.f32 %v7067_v1, %v2854_v34  ;;  %v3068_v23 = vmul.f32 %v7068_v45, %v2854_v34  ;;  %v7075_v50 = vld [vmem:[#allocation101_spill] sm:$0xff]  ;;  %v7076_v12 = vld [vmem:[#allocation80_spill] sm:$0xff] }
 0x5e3   :  { %3214 = vperm.xlu0 %4412, %v3169_v19   ;;  %v1142_v42 = vmul.f32 %v7069_v0, %v918_v38  ;;  %v1389_v47 = vmul.f32 %v7070_v20, %v1174_v9  ;;  %v1390_v33 = vmul.f32 %v7071_v15, %v1174_v9  ;;  %v1669_v7 = vmul.f32 %v7072_v11, %v1454_v44  ;;  %v7077_v1 = vld [vmem:[#allocation105_spill] sm:$0xff]  ;;  %v7078_v0 = vld [vmem:[#allocation84_spill] sm:$0xff] }
 0x5e4   :  { %v2539_v51 = vadd.f32 %v2507_v49, %v2259_v32  ;;  %v2540_v63 = vadd.f32 %v2508_v25, %v2260_v39  ;;  %v1670_v61 = vmul.f32 %v7073_v54, %v1454_v44  ;;  %v1949_v43 = vmul.f32 %v7074_v10, %v1734_v22  ;;  %v7079_v49 = vld [vmem:[#allocation109_spill] sm:$0xff]  ;;  %v7080_v32 = vld [vmem:[#allocation191_spill] sm:$0xff] }
 0x5e5   :  { %v1421_v37 = vadd.f32 %v1389_v47, %v1141_v27  ;;  %v1422_v35 = vadd.f32 %v1390_v33, %v1142_v42  ;;  %v1950_v6 = vmul.f32 %v7075_v50, %v1734_v22  ;;  %v2229_v19 = vmul.f32 %v7076_v12, %v2014_v24  ;;  %v7081_v27 = vld [vmem:[#allocation194_spill] sm:$0xff]  ;;  %v7082_v47 = vld [vmem:[#allocation211_spill] sm:$0xff] }
 0x5e6   :  { %v2819_v55 = vadd.f32 %v2787_v36, %v2539_v51  ;;  %v2820_v38 = vadd.f32 %v2788_v29, %v2540_v63  ;;  %v2230_v45 = vmul.f32 %v7077_v1, %v2014_v24  ;;  %v2509_v9 = vmul.f32 %v7078_v0, %v2294_v53  ;;  %v7083_v36 = vld [vmem:[#allocation221_spill] sm:$0xff]  ;;  %v7084_v63 = vld [vmem:[#allocation86_spill] sm:$0xff]  ;;  %v7085_v10 = vld [vmem:[#allocation111_spill] sm:$0xff] }
 0x5e7   :  { %v1701_v20 = vadd.f32 %v1669_v7, %v1421_v37  ;;  %v1702_v15 = vadd.f32 %v1670_v61, %v1422_v35  ;;  %v2510_v25 = vmul.f32 %v7079_v49, %v2294_v53  ;;  %v2789_v44 = vmul.f32 %v7080_v32, %v2574_v60  ;;  %v7086_v35 = vld [vmem:[#allocation88_spill] sm:$0xff]  ;;  %v7088_v1 = vld [vmem:[#allocation94_spill] sm:$0xff] }
 0x5e8   :  { %v3099_v39 = vadd.f32 %v3067_v18, %v2819_v55  ;;  %v3100_v11 = vadd.f32 %v3068_v23, %v2820_v38  ;;  %v2790_v42 = vmul.f32 %v7081_v27, %v2574_v60  ;;  %v3069_v22 = vmul.f32 %v7082_v47, %v2854_v34  ;;  %v7090_v32 = vld [vmem:[#allocation98_spill] sm:$0xff]  ;;  %v7091_v47 = vld [vmem:[#allocation123_spill] sm:$0xff] }
 0x5e9   :  { %v1981_v33 = vadd.f32 %v1949_v43, %v1701_v20  ;;  %v1982_v54 = vadd.f32 %v1950_v6, %v1702_v15  ;;  %v3070_v29 = vmul.f32 %v7083_v36, %v2854_v34  ;;  %v922_v24 = vrot.slane %v5797_v26, %v4642_v3  ;;  %v7087_v6 = vld [vmem:[#allocation113_spill] sm:$0xff]  ;;  %v7089_v20 = vld [vmem:[#allocation119_spill] sm:$0xff] }
 0x5ea   :  { %v3127_v51 = vpack.c.bf16 %v3100_v11, %v3099_v39  ;;  %v1178_v7 = vrot.slane %v5797_v26, %v4648_v5  ;;  %v1458_v53 = vrot.slane %v5797_v26, %v4639_v2  ;;  %v1738_v18 = vrot.slane %v5797_v26, %v4645_v4 }
 0x5eb   :  { %v2261_v60 = vadd.f32 %v2229_v19, %v1981_v33  ;;  %v2262_v23 = vadd.f32 %v2230_v45, %v1982_v54  ;;  %v1143_v61 = vmul.f32 %v7084_v63, %v922_v24  ;;  %v1144_v43 = vmul.f32 %v7085_v10, %v922_v24 }
 0x5ec   :  { %v3172_v34 = vunpack.c.h.b16 %v3127_v51  ;;  %v3171_v37 = vunpack.c.l.b16 %v3127_v51  ;;  %v1391_v50 = vmul.f32 %v7086_v35, %v1178_v7  ;;  %v1392_v12 = vmul.f32 %v7087_v6, %v1178_v7  ;;  %v7095_v35 = vld [vmem:[#allocation106_spill] sm:$0xff] }
 0x5ed   :  { %v2541_v55 = vadd.f32 %v2509_v9, %v2261_v60  ;;  %v2542_v38 = vadd.f32 %v2510_v25, %v2262_v23  ;;  %v1671_v0 = vmul.f32 %v7088_v1, %v1458_v53  ;;  %v1672_v15 = vmul.f32 %v7089_v20, %v1458_v53  ;;  %v7096_v6 = vld [vmem:[#allocation130_spill] sm:$0xff] }
 0x5ee   :  { %3223 = vperm.xlu0 %4412, %v3172_v34   ;;  %3220 = vperm.xlu1 %4413, %v3171_v37   ;;  %v3166_v19 = vunpack.c.h.b16 %v6122_v58  ;;  %v1423_v45 = vadd.f32 %v1391_v50, %v1143_v61  ;;  %v1424_v49 = vadd.f32 %v1392_v12, %v1144_v43  ;;  %v1951_v39 = vmul.f32 %v7090_v32, %v1738_v18  ;;  %v7092_v58 = vld [vmem:[#allocation169_spill] sm:$0xff]  ;;  %v7094_v43 = vld [vmem:[#allocation127_spill] sm:$0xff] }
 0x5ef   :  { %v2821_v11 = vadd.f32 %v2789_v44, %v2541_v55  ;;  %v2822_v27 = vadd.f32 %v2790_v42, %v2542_v38  ;;  %v1952_v33 = vmul.f32 %v7091_v47, %v1738_v18  ;;  %v2018_v9 = vrot.slane %v5797_v26, %v4664_v14  ;;  %v7093_v42 = vld [vmem:[#allocation102_spill] sm:$0xff]  ;;  %v7103_v47 = vld [vmem:[#allocation223_spill] sm:$0xff] }
 0x5f0   :  { %v1703_v25 = vadd.f32 %v1671_v0, %v1423_v45  ;;  %v1704_v54 = vadd.f32 %v1672_v15, %v1424_v49  ;;  %v2298_v36 = vrot.slane %v5797_v26, %v4661_v13  ;;  %v2578_v51 = vrot.slane %v5797_v26, %v4673_v17  ;;  %v7099_v0 = vld [vmem:[#allocation195_spill] sm:$0xff]  ;;  %v7101_v45 = vld [vmem:[#allocation92_spill] sm:$0xff] }
 0x5f1   :  { %v6202_v60 = vmul.f32 %v7092_v58, %v5826_v46  ;;  %v3101_v23 = vadd.f32 %v3069_v22, %v2821_v11  ;;  %v3102_v44 = vadd.f32 %v3070_v29, %v2822_v27  ;;  %v2231_v63 = vmul.f32 %v7093_v42, %v2018_v9  ;;  %v7097_v46 = vld [vmem:[#allocation193_spill] sm:$0xff]  ;;  %v7100_v15 = vld [vmem:[#allocation115_spill] sm:$0xff]  ;;  %v7105_v58 = vld [vmem:[#allocation96_spill] sm:$0xff] }
 0x5f2   :  { %3217 = vperm.xlu0 %4412, %v3170_v8   ;;  %3205 = vperm.xlu1 %4413, %v3166_v19   ;;  %v1983_v61 = vadd.f32 %v1951_v39, %v1703_v25  ;;  %v1984_v10 = vadd.f32 %v1952_v33, %v1704_v54  ;;  %v2232_v34 = vmul.f32 %v7094_v43, %v2018_v9  ;;  %v7102_v11 = vld [vmem:[#allocation213_spill] sm:$0xff] }
 0x5f3   :  { %v6208_v37 = vpack.c.bf16 %v3102_v44, %v3101_v23  ;;  %v2511_v50 = vmul.f32 %v7095_v35, %v2298_v36  ;;  %v2512_v12 = vmul.f32 %v7096_v6, %v2298_v36  ;;  %v2791_v55 = vmul.f32 %v7097_v46, %v2578_v51  ;;  %v7104_v25 = vld [vmem:[#allocation117_spill] sm:$0xff]  ;;  %v7109_v6 = vld [vmem:[#allocation104_spill] sm:$0xff] }
 0x5f4   :  { %v2263_v22 = vadd.f32 %v2231_v63, %v1983_v61  ;;  %v2264_v29 = vadd.f32 %v2232_v34, %v1984_v10  ;;  %v2858_v38 = vrot.slane %v5797_v26, %v4670_v16  ;;  %v1145_v8 = vmul.f32 %v7098_v40, %v922_v24  ;;  %v7106_v44 = vld [vmem:[#allocation121_spill] sm:$0xff]  ;;  %v7107_v10 = vld [vmem:[#allocation100_spill] sm:$0xff] }
 0x5f5   :  { %v3173_v1 = vunpack.c.l.b16 %v6208_v37  ;;  %v2792_v20 = vmul.f32 %v7099_v0, %v2578_v51  ;;  %v1146_v19 = vmul.f32 %v7100_v15, %v922_v24  ;;  %v1393_v49 = vmul.f32 %v7101_v45, %v1178_v7  ;;  %v7108_v43 = vld [vmem:[#allocation125_spill] sm:$0xff]  ;;  %v7114_v45 = vld [vmem:[#allocation206_spill] sm:$0xff] }
 0x5f6   :  { %v2543_v32 = vadd.f32 %v2511_v50, %v2263_v22  ;;  %v2544_v39 = vadd.f32 %v2512_v12, %v2264_v29  ;;  %v3071_v27 = vmul.f32 %v7102_v11, %v2858_v38  ;;  %v3072_v33 = vmul.f32 %v7103_v47, %v2858_v38  ;;  %v7110_v46 = vld [vmem:[#allocation129_spill] sm:$0xff] }
 0x5f7   :  { %3226 = vperm.xlu1 %4413, %v3173_v1   ;;  %v1394_v54 = vmul.f32 %v7104_v25, %v1178_v7  ;;  %v1425_v26 = vadd.f32 %v1393_v49, %v1145_v8  ;;  %v1673_v23 = vmul.f32 %v7105_v58, %v1458_v53  ;;  %v1674_v42 = vmul.f32 %v7106_v44, %v1458_v53  ;;  %v7111_v7 = vld [vmem:[#allocation108_spill] sm:$0xff]  ;;  %v7112_v1 = vld [vmem:[#allocation178_spill] sm:$0xff] }
 0x5f8   :  { %v2823_v63 = vadd.f32 %v2791_v55, %v2543_v32  ;;  %v2824_v61 = vadd.f32 %v2792_v20, %v2544_v39  ;;  %v1953_v24 = vmul.f32 %v7107_v10, %v1738_v18  ;;  %v1954_v34 = vmul.f32 %v7108_v43, %v1738_v18  ;;  %v7113_v55 = vld [vmem:[#allocation198_spill] sm:$0xff]  ;;  %v7116_v39 = vld [vmem:[#allocation227_spill] sm:$0xff]  ;;  %v7118_v58 = vld [vmem:[#allocation132_spill] sm:$0xff] }
 0x5f9   :  { %v1426_v35 = vadd.f32 %v1394_v54, %v1146_v19  ;;  %v1705_v50 = vadd.f32 %v1673_v23, %v1425_v26  ;;  %v2233_v12 = vmul.f32 %v7109_v6, %v2018_v9  ;;  %v2234_v22 = vmul.f32 %v7110_v46, %v2018_v9  ;;  %v7115_v18 = vld [vmem:[#allocation218_spill] sm:$0xff]  ;;  %v7122_v43 = vld [vmem:[#allocation137_spill] sm:$0xff] }
 0x5fa   :  { %v3103_v29 = vadd.f32 %v3071_v27, %v2823_v63  ;;  %v3104_v40 = vadd.f32 %v3072_v33, %v2824_v61  ;;  %v2513_v8 = vmul.f32 %v7111_v7, %v2298_v36  ;;  %v2514_v0 = vmul.f32 %v7112_v1, %v2298_v36  ;;  %v7117_v26 = vld [vmem:[#allocation110_spill] sm:$0xff] }
 0x5fb   :  { %v1706_v15 = vadd.f32 %v1674_v42, %v1426_v35  ;;  %v1985_v53 = vadd.f32 %v1953_v24, %v1705_v50  ;;  %v2793_v20 = vmul.f32 %v7113_v55, %v2578_v51  ;;  %v2794_v49 = vmul.f32 %v7114_v45, %v2578_v51  ;;  %v7120_v61 = vld [vmem:[#allocation134_spill] sm:$0xff] }
 0x5fc   :  { %v3129_v32 = vpack.c.bf16 %v3104_v40, %v3103_v29  ;;  %v3073_v19 = vmul.f32 %v7115_v18, %v2858_v38  ;;  %v3074_v11 = vmul.f32 %v7116_v39, %v2858_v38  ;;  %v926_v9 = vrot.slane %v5802_v56, %v4642_v3  ;;  %v7119_v38 = vld [vmem:[#allocation112_spill] sm:$0xff]  ;;  %v7123_v46 = vld [vmem:[#allocation122_spill] sm:$0xff]  ;;  %v7128_v18 = vld [vmem:[#allocation177_spill] sm:$0xff] }
 0x5fd   :  { %v1986_v27 = vadd.f32 %v1954_v34, %v1706_v15  ;;  %v2265_v47 = vadd.f32 %v2233_v12, %v1985_v53  ;;  %v1182_v33 = vrot.slane %v5802_v56, %v4648_v5  ;;  %v1462_v36 = vrot.slane %v5802_v56, %v4639_v2  ;;  %v7121_v5 = vld [vmem:[#allocation118_spill] sm:$0xff]  ;;  %v7124_v29 = vld [vmem:[#allocation140_spill] sm:$0xff] }
 0x5fe   :  { %v3175_v25 = vunpack.c.l.b16 %v3129_v32  ;;  %v3176_v54 = vunpack.c.h.b16 %v3129_v32  ;;  %v1147_v51 = vmul.f32 %v7117_v26, %v926_v9  ;;  %v1148_v23 = vmul.f32 %v7118_v58, %v926_v9  ;;  %v7126_v55 = vld [vmem:[#allocation126_spill] sm:$0xff]  ;;  %v7131_v26 = vld [vmem:[#allocation135_spill] sm:$0xff]  ;;  %v7132_v58 = vld [vmem:[#allocation116_spill] sm:$0xff] }
 0x5ff   :  { %v2266_v44 = vadd.f32 %v2234_v22, %v1986_v27  ;;  %v2545_v42 = vadd.f32 %v2513_v8, %v2265_v47  ;;  %v1395_v63 = vmul.f32 %v7119_v38, %v1182_v33  ;;  %v1396_v3 = vmul.f32 %v7120_v61, %v1182_v33  ;;  %v7127_v45 = vld [vmem:[#allocation142_spill] sm:$0xff]  ;;  %v7133_v61 = vld [vmem:[#allocation199_spill] sm:$0xff] }
 0x600   :  { %3232 = vperm.xlu0 %4412, %v3175_v25   ;;  %3235 = vperm.xlu1 %4413, %v3176_v54   ;;  %v3174_v10 = vunpack.c.h.b16 %v6208_v37  ;;  %v1675_v24 = vmul.f32 %v7121_v5, %v1462_v36  ;;  %v1676_v2 = vmul.f32 %v7122_v43, %v1462_v36  ;;  %v1742_v34 = vrot.slane %v5802_v56, %v4645_v4  ;;  %v7125_v4 = vld [vmem:[#allocation162_spill] sm:$0xff] }
 0x601   :  { %v2546_v35 = vadd.f32 %v2514_v0, %v2266_v44  ;;  %v2825_v50 = vadd.f32 %v2793_v20, %v2545_v42  ;;  %v1427_v6 = vadd.f32 %v1395_v63, %v1147_v51  ;;  %v1428_v12 = vadd.f32 %v1396_v3, %v1148_v23  ;;  %v7130_v25 = vld [vmem:[#allocation114_spill] sm:$0xff] }
 0x602   :  { %v1955_v22 = vmul.f32 %v7123_v46, %v1742_v34  ;;  %v1956_v40 = vmul.f32 %v7124_v29, %v1742_v34  ;;  %v2022_v7 = vrot.slane %v5802_v56, %v4664_v14  ;;  %v2302_v37 = vrot.slane %v5802_v56, %v4661_v13 }
 0x603   :  { %v2826_v8 = vadd.f32 %v2794_v49, %v2546_v35  ;;  %v3105_v1 = vadd.f32 %v3073_v19, %v2825_v50  ;;  %v1707_v15 = vadd.f32 %v1675_v24, %v1427_v6  ;;  %v1708_v53 = vadd.f32 %v1676_v2, %v1428_v12  ;;  %v7129_v49 = vld [vmem:[#allocation180_spill] sm:$0xff] }
 0x604   :  { %v6258_v0 = vmul.f32 %v7125_v4, %v5844_v28  ;;  %3229 = vperm.xlu0 %4412, %v3174_v10   ;;  %v2235_v20 = vmul.f32 %v7126_v55, %v2022_v7  ;;  %v2236_v32 = vmul.f32 %v7127_v45, %v2022_v7  ;;  %v2515_v39 = vmul.f32 %v7128_v18, %v2302_v37  ;;  %v7134_v10 = vld [vmem:[#allocation136_spill] sm:$0xff] }
 0x605   :  { %v3106_v27 = vadd.f32 %v3074_v11, %v2826_v8  ;;  %v1987_v14 = vadd.f32 %v1955_v22, %v1707_v15  ;;  %v1988_v47 = vadd.f32 %v1956_v40, %v1708_v53  ;;  %v2582_v13 = vrot.slane %v5802_v56, %v4673_v17  ;;  %v7135_v2 = vld [vmem:[#allocation208_spill] sm:$0xff]  ;;  %v7141_v15 = vld [vmem:[#allocation141_spill] sm:$0xff] }
 0x606   :  { %v2516_v19 = vmul.f32 %v7129_v49, %v2302_v37  ;;  %v1149_v54 = vmul.f32 %v7130_v25, %v926_v9  ;;  %v1150_v51 = vmul.f32 %v7131_v26, %v926_v9  ;;  %v1397_v23 = vmul.f32 %v7132_v58, %v1182_v33  ;;  %v7136_v12 = vld [vmem:[#allocation120_spill] sm:$0xff]  ;;  %v7146_v25 = vld [vmem:[#allocation207_spill] sm:$0xff]  ;;  %v7147_v26 = vld [vmem:[#allocation217_spill] sm:$0xff] }
 0x607   :  { %v6269_v44 = vpack.c.bf16 %v3106_v27, %v3105_v1  ;;  %v2267_v42 = vadd.f32 %v2235_v20, %v1987_v14  ;;  %v2268_v38 = vadd.f32 %v2236_v32, %v1988_v47  ;;  %v2862_v11 = vrot.slane %v5802_v56, %v4670_v16  ;;  %v7137_v56 = vld [vmem:[#allocation138_spill] sm:$0xff]  ;;  %v7139_v22 = vld [vmem:[#allocation228_spill] sm:$0xff]  ;;  %v7144_v27 = vld [vmem:[#allocation187_spill] sm:$0xff] }
 0x608   :  { %v1439_v63 = vadd.f32 %v6032_v57, %v5902_v59  ;;  %v1440_v17 = vadd.f32 %v6202_v60, %v5966_v30  ;;  %v2795_v3 = vmul.f32 %v7133_v61, %v2582_v13  ;;  %v1398_v5 = vmul.f32 %v7134_v10, %v1182_v33  ;;  %v7138_v30 = vld [vmem:[#allocation220_spill] sm:$0xff]  ;;  %v7145_v47 = vld [vmem:[#allocation190_spill] sm:$0xff]  ;;  %v7148_v58 = vld [vmem:[#allocation231_spill] sm:$0xff] }
 0x609   :  { %v3177_v9 = vunpack.c.l.b16 %v6269_v44  ;;  %v2547_v24 = vadd.f32 %v2515_v39, %v2267_v42  ;;  %v2548_v43 = vadd.f32 %v2516_v19, %v2268_v38  ;;  %v2796_v35 = vmul.f32 %v7135_v2, %v2582_v13  ;;  %v7140_v8 = vld [vmem:[#allocation124_spill] sm:$0xff]  ;;  %v7150_v61 = vld [vmem:[#allocation145_spill] sm:$0xff]  ;;  %v7154_v2 = vld [vmem:[#allocation146_spill] sm:$0xff] }
 0x60a   :  { %v1429_v50 = vadd.f32 %v1397_v23, %v1149_v54  ;;  %v1430_v6 = vadd.f32 %v1398_v5, %v1150_v51  ;;  %v1677_v16 = vmul.f32 %v7136_v12, %v1462_v36  ;;  %v1678_v46 = vmul.f32 %v7137_v56, %v1462_v36  ;;  %v7142_v20 = vld [vmem:[#allocation128_spill] sm:$0xff]  ;;  %v7149_v23 = vld [vmem:[#allocation131_spill] sm:$0xff]  ;;  %v7152_v10 = vld [vmem:[#allocation133_spill] sm:$0xff] }
 0x60b   :  { %3238 = vperm.xlu1 %4413, %v3177_v9   ;;  %v2827_v59 = vadd.f32 %v2795_v3, %v2547_v24  ;;  %v2828_v57 = vadd.f32 %v2796_v35, %v2548_v43  ;;  %v3075_v60 = vmul.f32 %v7138_v30, %v2862_v11  ;;  %v3076_v29 = vmul.f32 %v7139_v22, %v2862_v11  ;;  %v7143_v32 = vld [vmem:[#allocation144_spill] sm:$0xff]  ;;  %v7153_v43 = vld [vmem:[#allocation225_spill] sm:$0xff]  ;;  %v7155_v12 = vld [vmem:[#allocation234_spill] sm:$0xff] }
 0x60c   :  { %v1709_v33 = vadd.f32 %v1677_v16, %v1429_v50  ;;  %v1710_v40 = vadd.f32 %v1678_v46, %v1430_v6  ;;  %v1957_v1 = vmul.f32 %v7140_v8, %v1742_v34  ;;  %v1958_v53 = vmul.f32 %v7141_v15, %v1742_v34  ;;  %v7156_v16 = vld [vmem:[#allocation139_spill] sm:$0xff]  ;;  %v7157_v46 = vld [vmem:[#allocation233_spill] sm:$0xff]  ;;  %v7158_v30 = vld [vmem:[#allocation148_spill] sm:$0xff] }
 0x60d   :  { %v3107_v4 = vadd.f32 %v3075_v60, %v2827_v59  ;;  %v3108_v55 = vadd.f32 %v3076_v29, %v2828_v57  ;;  %v2237_v45 = vmul.f32 %v7142_v20, %v2022_v7  ;;  %v2238_v18 = vmul.f32 %v7143_v32, %v2022_v7  ;;  %v7151_v7 = vld [vmem:[#allocation232_spill] sm:$0xff]  ;;  %v7160_v8 = vld [vmem:[#allocation143_spill] sm:$0xff]  ;;  %v7162_v20 = vld [vmem:[#allocation150_spill] sm:$0xff] }
 0x60e   :  { %v1989_v36 = vadd.f32 %v1957_v1, %v1709_v33  ;;  %v1990_v39 = vadd.f32 %v1958_v53, %v1710_v40  ;;  %v2517_v14 = vmul.f32 %v7144_v27, %v2302_v37  ;;  %v2518_v49 = vmul.f32 %v7145_v47, %v2302_v37  ;;  %v7159_v40 = vld [vmem:[#allocation236_spill] sm:$0xff] }
 0x60f   :  { %v3131_v19 = vpack.c.bf16 %v3108_v55, %v3107_v4  ;;  %v2797_v54 = vmul.f32 %v7146_v25, %v2582_v13  ;;  %v2798_v51 = vmul.f32 %v7147_v26, %v2582_v13  ;;  %v1151_v34 = vmul.f32 %v7149_v23, %v7148_v58  ;;  %v7161_v15 = vld [vmem:[#allocation172_spill] sm:$0xff]  ;;  %v7166_v26 = vld [vmem:[#allocation238_spill] sm:$0xff] }
 0x610   :  { %v2269_v42 = vadd.f32 %v2237_v45, %v1989_v36  ;;  %v2270_v38 = vadd.f32 %v2238_v18, %v1990_v39  ;;  %v1152_v3 = vmul.f32 %v7150_v61, %v7148_v58  ;;  %v1399_v5 = vmul.f32 %v7152_v10, %v7151_v7  ;;  %v7163_v36 = vld [vmem:[#allocation237_spill] sm:$0xff]  ;;  %v7164_v39 = vld [vmem:[#allocation147_spill] sm:$0xff]  ;;  %v7168_v23 = vld [vmem:[#allocation166_spill] sm:$0xff] }
 0x611   :  { %v3179_v9 = vunpack.c.l.b16 %v3131_v19  ;;  %v3180_v24 = vunpack.c.h.b16 %v3131_v19  ;;  %v3077_v37 = vmul.f32 %v7153_v43, %v2862_v11  ;;  %v1400_v35 = vmul.f32 %v7154_v2, %v7151_v7  ;;  %v7165_v19 = vld [vmem:[#allocation152_spill] sm:$0xff] }
 0x612   :  { %v2549_v50 = vadd.f32 %v2517_v14, %v2269_v42  ;;  %v2550_v13 = vadd.f32 %v2518_v49, %v2270_v38  ;;  %v1431_v6 = vadd.f32 %v1399_v5, %v1151_v34  ;;  %v1679_v56 = vmul.f32 %v7156_v16, %v7155_v12  ;;  %v7169_v42 = vld [vmem:[#allocation175_spill] sm:$0xff]  ;;  %v7179_v16 = vld [vmem:[#allocation186_spill] sm:$0xff] }
 0x613   :  { %3244 = vperm.xlu0 %4412, %v3179_v9   ;;  %3247 = vperm.xlu1 %4413, %v3180_v24   ;;  %v3078_v59 = vmul.f32 %v7157_v46, %v2862_v11  ;;  %v1432_v57 = vadd.f32 %v1400_v35, %v1152_v3  ;;  %v1680_v60 = vmul.f32 %v7158_v30, %v7155_v12  ;;  %v3178_v4 = vunpack.c.h.b16 %v6269_v44  ;;  %v7172_v24 = vld [vmem:[#allocation219_spill] sm:$0xff]  ;;  %v7178_v12 = vld [vmem:[#allocation170_spill] sm:$0xff]  ;;  %v7180_v46 = vld [vmem:[#allocation188_spill] sm:$0xff] }
 0x614   :  { %v2829_v22 = vadd.f32 %v2797_v54, %v2549_v50  ;;  %v2830_v29 = vadd.f32 %v2798_v51, %v2550_v13  ;;  %v1711_v33 = vadd.f32 %v1679_v56, %v1431_v6  ;;  %v1959_v1 = vmul.f32 %v7160_v8, %v7159_v40  ;;  %v7167_v51 = vld [vmem:[#allocation189_spill] sm:$0xff]  ;;  %v7175_v35 = vld [vmem:[#allocation215_spill] sm:$0xff] }
 0x615   :  { %v1688_v53 = vmul.f32 %v7161_v15, %v5844_v28  ;;  %v1712_v55 = vadd.f32 %v1680_v60, %v1432_v57  ;;  %v1960_v45 = vmul.f32 %v7162_v20, %v7159_v40  ;;  %v2239_v27 = vmul.f32 %v7164_v39, %v7163_v36  ;;  %v7182_v60 = vld [vmem:[#allocation153_spill] sm:$0xff] }
 0x616   :  { %v3109_v11 = vadd.f32 %v3077_v37, %v2829_v22  ;;  %v3110_v32 = vadd.f32 %v3078_v59, %v2830_v29  ;;  %v1991_v18 = vadd.f32 %v1959_v1, %v1711_v33  ;;  %v1719_v14 = vadd.f32 %v6258_v0, %v1439_v63  ;;  %v7173_v37 = vld [vmem:[#allocation240_spill] sm:$0xff]  ;;  %v7183_v22 = vld [vmem:[#allocation157_spill] sm:$0xff] }
 0x617   :  { %v1720_v47 = vadd.f32 %v1688_v53, %v1440_v17  ;;  %3241 = vperm.xlu0 %4412, %v3178_v4   ;;  %v1992_v49 = vadd.f32 %v1960_v45, %v1712_v55  ;;  %v2240_v28 = vmul.f32 %v7165_v19, %v7163_v36  ;;  %v2277_v44 = vadd.f32 %v5870_v52, %v5886_v31  ;;  %v7170_v17 = vld [vmem:[#allocation192_spill] sm:$0xff]  ;;  %v7171_v31 = vld [vmem:[#allocation209_spill] sm:$0xff]  ;;  %v7184_v4 = vld [vmem:[#allocation151_spill] sm:$0xff] }
 0x618   :  { %v3132_v25 = vpack.c.bf16 %v3110_v32, %v3109_v11  ;;  %v2271_v54 = vadd.f32 %v2239_v27, %v1991_v18  ;;  %v2519_v58 = vmul.f32 %v7167_v51, %v7166_v26  ;;  %v1967_v34 = vmul.f32 %v7168_v23, %v5856_v41  ;;  %v7185_v55 = vld [vmem:[#allocation239_spill] sm:$0xff]  ;;  %v7186_v45 = vld [vmem:[#allocation241_spill] sm:$0xff]  ;;  %v7188_v18 = vld [vmem:[#allocation222_spill] sm:$0xff] }
 0x619   :  { %v1968_v0 = vmul.f32 %v7169_v42, %v5856_v41  ;;  %v2272_v63 = vadd.f32 %v2240_v28, %v1992_v49  ;;  %v2520_v38 = vmul.f32 %v7170_v17, %v7166_v26  ;;  %v2278_v61 = vadd.f32 %v5892_v62, %v5888_v48  ;;  %v7174_v41 = vld [vmem:[#allocation204_spill] sm:$0xff]  ;;  %v7176_v48 = vld [vmem:[#allocation173_spill] sm:$0xff]  ;;  %v7177_v62 = vld [vmem:[#allocation226_spill] sm:$0xff] }
 0x61a   :  { %v3181_v3 = vunpack.c.l.b16 %v3132_v25  ;;  %v2551_v52 = vadd.f32 %v2519_v58, %v2271_v54  ;;  %v2799_v7 = vmul.f32 %v7171_v31, %v5740_v21  ;;  %v1999_v10 = vadd.f32 %v1967_v34, %v1719_v14  ;;  %v7187_v32 = vld [vmem:[#allocation149_spill] sm:$0xff]  ;;  %v7190_v14 = vld [vmem:[#allocation242_spill] sm:$0xff]  ;;  %v7194_v54 = vld [vmem:[#allocation216_spill] sm:$0xff] }
 0x61b   :  { %v2000_v5 = vadd.f32 %v1968_v0, %v1720_v47  ;;  %v2552_v9 = vadd.f32 %v2520_v38, %v2272_v63  ;;  %v2800_v43 = vmul.f32 %v7172_v24, %v5740_v21  ;;  %v2525_v2 = vmul.f32 %v7174_v41, %v7173_v37  ;;  %v7181_v21 = vld [vmem:[#allocation235_spill] sm:$0xff]  ;;  %v7189_v39 = vld [vmem:[#allocation229_spill] sm:$0xff]  ;;  %v7195_v58 = vld [vmem:[#allocation160_spill] sm:$0xff] }
 0x61c   :  { %v2526_v50 = vmul.f32 %v7175_v35, %v7173_v37  ;;  %3250 = vperm.xlu1 %4413, %v3181_v3   ;;  %v2831_v13 = vadd.f32 %v2799_v7, %v2551_v52  ;;  %v3079_v6 = vmul.f32 %v7177_v62, %v7176_v48  ;;  %v2247_v56 = vmul.f32 %v7179_v16, %v7178_v12  ;;  %v7191_v47 = vld [vmem:[#allocation243_spill] sm:$0xff]  ;;  %v7192_v19 = vld [vmem:[#allocation161_spill] sm:$0xff]  ;;  %v7200_v24 = vld [vmem:[#allocation230_spill] sm:$0xff] }
 0x61d   :  { %v2248_v59 = vmul.f32 %v7180_v46, %v7178_v12  ;;  %v2832_v57 = vadd.f32 %v2800_v43, %v2552_v9  ;;  %v3080_v30 = vmul.f32 %v7181_v21, %v7176_v48  ;;  %v2836_v29 = vadd.f32 %v7183_v22, %v7182_v60  ;;  %v7193_v28 = vld [vmem:[#allocation205_spill] sm:$0xff]  ;;  %v7196_v3 = vld [vmem:[#allocation155_spill] sm:$0xff] }
 0x61e   :  { %v2557_v33 = vadd.f32 %v2525_v2, %v2277_v44  ;;  %v2558_v40 = vadd.f32 %v2526_v50, %v2278_v61  ;;  %v3111_v8 = vadd.f32 %v3079_v6, %v2831_v13  ;;  %v2279_v1 = vadd.f32 %v2247_v56, %v1999_v10  ;;  %v7197_v31 = vld [vmem:[#allocation165_spill] sm:$0xff]  ;;  %v7198_v10 = vld [vmem:[#allocation154_spill] sm:$0xff]  ;;  %v7201_v62 = vld [vmem:[#allocation163_spill] sm:$0xff] }
 0x61f   :  { %v2280_v15 = vadd.f32 %v2248_v59, %v2000_v5  ;;  %v3112_v53 = vadd.f32 %v3080_v30, %v2832_v57  ;;  %v3083_v20 = vmul.f32 %v7185_v55, %v7184_v4  ;;  %v3084_v11 = vmul.f32 %v7186_v45, %v7184_v4  ;;  %v7199_v5 = vld [vmem:[#allocation224_spill] sm:$0xff]  ;;  %v7202_v6 = vld [vmem:[#allocation159_spill] sm:$0xff] }
 0x620   :  { %v2805_v36 = vmul.f32 %v7188_v18, %v7187_v32  ;;  %v2806_v27 = vmul.f32 %v7189_v39, %v7187_v32  ;;  %v3134_v49 = vpack.c.bf16 %v7191_v47, %v7190_v14  ;;  %v2527_v44 = vmul.f32 %v7193_v28, %v7192_v19  ;;  %v7203_v16 = vld [vmem:[#allocation171_spill] sm:$0xff] }
 0x621   :  { %v2528_v26 = vmul.f32 %v7194_v54, %v7192_v19  ;;  %v3133_v51 = vpack.c.bf16 %v3112_v53, %v3111_v8  ;;  %v3115_v23 = vadd.f32 %v3083_v20, %v7195_v58  ;;  %v3116_v34 = vadd.f32 %v3084_v11, %v2836_v29 }
 0x622   :  { %v2837_v42 = vadd.f32 %v2805_v36, %v2557_v33  ;;  %v2838_v0 = vadd.f32 %v2806_v27, %v2558_v40  ;;  %v2559_v63 = vadd.f32 %v2527_v44, %v2279_v1  ;;  %v3085_v52 = vmul.f32 %v7196_v3, %v7184_v4 }
 0x623   :  { %v2560_v17 = vadd.f32 %v2528_v26, %v2280_v15  ;;  %v3183_v38 = vunpack.c.l.b16 %v3133_v51  ;;  %v3184_v61 = vunpack.c.h.b16 %v3133_v51  ;;  %v3086_v7 = vmul.f32 %v7197_v31, %v7184_v4  ;;  %v7205_v15 = vld [vmem:[#allocation164_spill] sm:$0xff] }
 0x624   :  { %v2807_v9 = vmul.f32 %v7199_v5, %v7198_v10  ;;  %v2808_v43 = vmul.f32 %v7200_v24, %v7198_v10  ;;  %v3185_v37 = vunpack.c.l.b16 %v3134_v49  ;;  %v3135_v41 = vpack.c.bf16 %v3116_v34, %v3115_v23  ;;  %v4427_v4 = vld [vmem:[%s6670_s6] sm:$0xff]   ;;  %v7206_v34 = vld [vmem:[#allocation13_spill] sm:$0xff] }
 0x625   :  { %3256 = vperm.xlu0 %4412, %v3183_v38   ;;  %3259 = vperm.xlu1 %4413, %v3184_v61   ;;  %v3117_v2 = vadd.f32 %v3085_v52, %v2837_v42  ;;  %v3118_v35 = vadd.f32 %v3086_v7, %v2838_v0  ;;  %v3182_v48 = vunpack.c.h.b16 %v3132_v25  ;;  %v3087_v12 = vmul.f32 %v7202_v6, %v7201_v62  ;;  %v4426_v25 = vld [vmem:[%s6670_s6 + $0x8] sm:$0xff]   ;;  %v7207_v61 = vld [vmem:[#allocation12_spill] sm:$0xff] }
 0x626   :  { %v2839_v50 = vadd.f32 %v2807_v9, %v2559_v63  ;;  %v2840_v13 = vadd.f32 %v2808_v43, %v2560_v17  ;;  %v3088_v56 = vmul.f32 %v7203_v16, %v7201_v62  ;;  %v3187_v46 = vunpack.c.l.b16 %v3135_v41  ;;  %4353 = vmatpush3.bf16.msra.mxu0 %v4426_v25  ;;  %v7208_v5 = vld [vmem:[#allocation197_spill] sm:$0xff] }
 0x627   :  { %v3188_v59 = vunpack.c.h.b16 %v3135_v41  ;;  %v3136_v57 = vpack.c.bf16 %v3118_v35, %v3117_v2  ;;  %v3186_v60 = vunpack.c.h.b16 %v3134_v49  ;;  %v7204_v8 = vmov 0.0  }
 0x628   :  { %v3119_v21 = vadd.f32 %v3087_v12, %v2839_v50  ;;  %v3120_v30 = vadd.f32 %v3088_v56, %v2840_v13  ;;  %4354 = vmatprep.subr.bf16.mxu0 %v7204_v8  ;;  %v3193_v53 = vunpack.c.l.b16 %v7205_v15  ;;  %v3194_v55 = vunpack.c.h.b16 %v7205_v15 }
 0x629   :  { %3253 = vperm.xlu0 %4412, %v3182_v48   ;;  %3262 = vperm.xlu1 %4413, %v3185_v37   ;;  %v3189_v22 = vunpack.c.l.b16 %v3136_v57  ;;  %v3190_v1 = vunpack.c.h.b16 %v3136_v57  ;;  %v3295_v42 = vadd.s32 4294967288, %v7206_v34  ;;  %v3302_v17 = vadd.s32 4294967280, %v7206_v34 }
 0x62a   :  { %v3137_v29 = vpack.c.bf16 %v3120_v30, %v3119_v21  ;;  %4355 = vmatpush3.bf16.msra.mxu0 %v4427_v4  ;;  %v3309_v38 = vadd.s32 4294967272, %v7206_v34 }
 0x62b   :  { %4368 = vmatprep.subr.bf16.mxu0 %v7204_v8  ;;  %v6396_v3 = vsub.s32 %v3295_v42, %v7207_v61  ;;  %v6403_v7 = vsub.s32 %v3302_v17, %v7207_v61 }
 0x62c   :  { %v3191_v33 = vunpack.c.l.b16 %v3137_v29  ;;  %v3192_v40 = vunpack.c.h.b16 %v3137_v29  ;;  %v6406_v10 = vsub.s32 %v3309_v38, %v7207_v61 }
 0x62d   :  { %3268 = vperm.xlu0 %4412, %v3187_v46   ;;  %3271 = vperm.xlu1 %4413, %v3188_v59  }
 0x631   :  { %3265 = vperm.xlu0 %4412, %v3186_v60   ;;  %3274 = vperm.xlu1 %4413, %v3189_v22  }
 0x635   :  { %3280 = vperm.xlu0 %4412, %v3191_v33   ;;  %3283 = vperm.xlu1 %4413, %v3192_v40  }
 0x639   :  { %3277 = vperm.xlu0 %4412, %v3190_v1   ;;  %3286 = vperm.xlu1 %4413, %v3193_v53  }
 0x63d   :  { %3289 = vperm.xlu0 %4412, %v3194_v55  }
 0x643   :  { %v3197_v20 = vpop.permute.xlu1 %3196  ;;  %v3200_v45 = vpop.permute.xlu0 %3199 }
 0x644   :  { %v3294_v9 = vrot.slane %v3197_v20, %v7208_v5  ;;  %v3299_v24 = vrot.slane %v3200_v45, %v6396_v3 }
 0x646   :  { %v3301_v12 = vsel %vm3300_vm3, %v3299_v24, %v3294_v9 }
 0x64e   :  { %v3209_v11 = vpop.permute.xlu1 %3208  ;;  %v3212_v32 = vpop.permute.xlu0 %3211 }
 0x64f   :  { %v3319_v41 = vrot.slane %v3209_v11, %v7208_v5  ;;  %v3323_v2 = vrot.slane %v3212_v32, %v6396_v3 }
 0x651   :  { %v3324_v30 = vsel %vm3300_vm3, %v3323_v2, %v3319_v41 }
 0x657   :  { %v3203_v18 = vpop.permute.xlu1 %3202 }
 0x658   :  { %v3306_v35 = vrot.slane %v3203_v18, %v6403_v7 }
 0x65a   :  { %v3308_v60 = vsel %vm3307_vm4, %v3306_v35, %v3301_v12 }
 0x65e   :  { %v3215_v36 = vpop.permute.xlu0 %3214 }
 0x65f   :  { %v3328_v50 = vrot.slane %v3215_v36, %v6403_v7 }
 0x661   :  { %v3329_v29 = vsel %vm3307_vm4, %v3328_v50, %v3324_v30 }
 0x669   :  { %v3221_v39 = vpop.permute.xlu1 %3220  ;;  %v3224_v27 = vpop.permute.xlu0 %3223 }
 0x66a   :  { %v3338_v13 = vrot.slane %v3221_v39, %v7208_v5  ;;  %v3342_v48 = vrot.slane %v3224_v27, %v6396_v3 }
 0x66c   :  { %v3343_v25 = vsel %vm3300_vm3, %v3342_v48, %v3338_v13 }
 0x66d   :  { %v3206_v14 = vpop.permute.xlu1 %3205  ;;  %v3218_v47 = vpop.permute.xlu0 %3217 }
 0x66e   :  { %v3313_v62 = vrot.slane %v3206_v14, %v6406_v10  ;;  %v3333_v46 = vrot.slane %v3218_v47, %v6406_v10 }
 0x670   :  { %v3315_v33 = vsel %vm3314_vm5, %v3313_v62, %v3308_v60  ;;  %v3334_v45 = vsel %vm3314_vm5, %v3333_v46, %v3329_v29  ;;  %v7209_v29 = vld [vmem:[#allocation15_spill] sm:$0xff] }
 0x671   :  { %v3449_v17 = vsel %vm484_vm11, %v3334_v45, %v3315_v33  ;;  %v7210_v33 = vld [vmem:[#allocation16_spill] sm:$0xff] }
 0x672   :  { %v3227_v49 = vpop.permute.xlu1 %3226 }
 0x673   :  { %v3347_v59 = vrot.slane %v3227_v49, %v6403_v7 }
 0x675   :  { %v3348_v11 = vsel %vm3307_vm4, %v3347_v59, %v3343_v25 }
 0x67b   :  { %v3233_v19 = vpop.permute.xlu0 %3232  ;;  %v3236_v28 = vpop.permute.xlu1 %3235 }
 0x67c   :  { %v3361_v6 = vrot.slane %v3236_v28, %v6396_v3  ;;  %v3357_v57 = vrot.slane %v3233_v19, %v7208_v5 }
 0x67e   :  { %v3362_v40 = vsel %vm3300_vm3, %v3361_v6, %v3357_v57  ;;  %v4263_v6 = vld [vmem:[%s6675_s11 + $0x3] ss:$0 sm:$0xff] }
 0x67f   :  { %v6386_v44 = vpop.permute.xlu0 %3229 }
 0x680   :  { %v3352_v1 = vrot.slane %v6386_v44, %v6406_v10 }
 0x682   :  { %v3353_v44 = vsel %vm3314_vm5, %v3352_v1, %v3348_v11  ;;  %v7211_v1 = vld [vmem:[#allocation17_spill] sm:$0xff]  ;;  %v7214_v11 = vld [vmem:[#allocation19_spill] sm:$0xff] }
 0x686   :  { %v3239_v54 = vpop.permute.xlu1 %3238 }
 0x687   :  { %v3366_v21 = vrot.slane %v3239_v54, %v6403_v7 }
 0x689   :  { %v3367_v32 = vsel %vm3307_vm4, %v3366_v21, %v3362_v40 }
 0x68e   :  { %v3245_v26 = vpop.permute.xlu0 %3244  ;;  %v3248_v51 = vpop.permute.xlu1 %3247 }
 0x68f   :  { %v3380_v22 = vrot.slane %v3248_v51, %v6396_v3  ;;  %v3376_v15 = vrot.slane %v3245_v26, %v7208_v5 }
 0x691   :  { %v3381_v36 = vsel %vm3300_vm3, %v3380_v22, %v3376_v15 }
 0x692   :  { %v3242_v58 = vpop.permute.xlu0 %3241 }
 0x693   :  { %v3371_v53 = vrot.slane %v3242_v58, %v6406_v10 }
 0x695   :  { %v3372_v54 = vsel %vm3314_vm5, %v3371_v53, %v3367_v32 }
 0x697   :  { %v3251_v23 = vpop.permute.xlu1 %3250 }
 0x698   :  { %v3385_v4 = vrot.slane %v3251_v23, %v6403_v7 }
 0x69a   :  { %v3386_v26 = vsel %vm3307_vm4, %v3385_v4, %v3381_v36  ;;  %v7212_v4 = vld [vmem:[#allocation18_spill] sm:$0xff] }
 0x6a0   :  { %v6389_v0 = vpop.permute.xlu0 %3256  ;;  %v6391_v63 = vpop.permute.xlu1 %3259 }
 0x6a1   :  { %v3399_v18 = vrot.slane %v6391_v63, %v6396_v3  ;;  %v3395_v47 = vrot.slane %v6389_v0, %v7208_v5 }
 0x6a3   :  { %v3400_v34 = vsel %vm3300_vm3, %v3399_v18, %v3395_v47 }
 0x6a4   :  { %v6398_v52 = vpop.permute.xlu0 %3253  ;;  %v6400_v31 = vpop.permute.xlu1 %3262 }
 0x6a5   :  { %v3390_v39 = vrot.slane %v6398_v52, %v6406_v10  ;;  %v3404_v27 = vrot.slane %v6400_v31, %v6403_v7  ;;  %v3450_v52 = vsel %vm487_vm12, %v3353_v44, %v3449_v17 }
 0x6a6   :  { %v3451_v24 = vsel %vm490_vm13, %v3372_v54, %v3450_v52 }
 0x6a7   :  { %v3391_v38 = vsel %vm3314_vm5, %v3390_v39, %v3386_v26  ;;  %v3405_v61 = vsel %vm3307_vm4, %v3404_v27, %v3400_v34  ;;  %v7215_v39 = vld [vmem:[#allocation20_spill] sm:$0xff] }
 0x6a8   :  { %v3269_v43 = vpop.permute.xlu0 %3268  ;;  %v3272_v37 = vpop.permute.xlu1 %3271  ;;  %v3452_v41 = vsel %vm493_vm14, %v3391_v38, %v3451_v24 }
 0x6a9   :  { %v3418_v14 = vrot.slane %v3272_v37, %v6396_v3  ;;  %v3414_v51 = vrot.slane %v3269_v43, %v7208_v5 }
 0x6ac   :  { %v3266_v16 = vpop.permute.xlu0 %3265  ;;  %v3275_v56 = vpop.permute.xlu1 %3274 }
 0x6ad   :  { %v3409_v49 = vrot.slane %v3266_v16, %v6406_v10  ;;  %v3423_v19 = vrot.slane %v3275_v56, %v6403_v7 }
 0x6af   :  { %v3410_v31 = vsel %vm3314_vm5, %v3409_v49, %v3405_v61 }
 0x6b0   :  { %v3281_v55 = vpop.permute.xlu0 %3280  ;;  %v3284_v20 = vpop.permute.xlu1 %3283  ;;  %v3453_v35 = vsel %vm496_vm15, %v3410_v31, %v3452_v41 }
 0x6b1   :  { %v3437_v28 = vrot.slane %v3284_v20, %v6396_v3  ;;  %v3433_v42 = vrot.slane %v3281_v55, %v7208_v5  ;;  %v3419_v3 = vsel %vm3300_vm3, %v3418_v14, %v3414_v51  ;;  %v7213_v20 = vld [vmem:[#allocation14_spill] sm:$0xff]  ;;  %v7216_v14 = vld [vmem:[#allocation21_spill] sm:$0xff] }
 0x6b2   :  { %v3424_v9 = vsel %vm3307_vm4, %v3423_v19, %v3419_v3 }
 0x6b3   :  { %v3438_v5 = vsel %vm3300_vm3, %v3437_v28, %v3433_v42 }
 0x6b4   :  { %v3278_v58 = vpop.permute.xlu0 %3277  ;;  %v3287_v23 = vpop.permute.xlu1 %3286 }
 0x6b5   :  { %v3428_v0 = vrot.slane %v3278_v58, %v6406_v10  ;;  %v3442_v63 = vrot.slane %v3287_v23, %v6403_v7 }
 0x6b7   :  { %v3429_v7 = vsel %vm3314_vm5, %v3428_v0, %v3424_v9  ;;  %v3443_v43 = vsel %vm3307_vm4, %v3442_v63, %v3438_v5 }
 0x6b8   :  { %v3290_v37 = vpop.permute.xlu0 %3289  ;;  %v3454_v50 = vsel %vm499_vm0, %v3429_v7, %v3453_v35 }
 0x6b9   :  { %v3447_v2 = vrot.slane %v3290_v37, %v6406_v10 }
 0x6bb   :  { %v3448_v13 = vsel %vm3314_vm5, %v3447_v2, %v3443_v43 }
 0x6bc   :  { %v3455_v48 = vsel %vm502_vm1, %v3448_v13, %v3454_v50 }
 0x6bd   :  { %v3456_v62 = vpack.c.b16 %v3455_v48, %v3455_v48 }
 0x6bf   :  { %4357 = vmatmul.mubr.msk.bf16.vlgmr.msra.gmra.mxu0 %vm341_vm10, %v3456_v62 }
 0x6c0   :  { %4384 = vmatprep.mubr.msk.bf16.mxu0 %vm4559_vm9, %v7204_v8 }
 0x77f   :  { %v3506_v12 = vpop.f32.mrf.mxu0 }
 0x780   :  { %v3507_v10 = vadd.f32 %v4263_v6, %v3506_v12 }
 0x781   :  { %v4358_v16 = vpop.f32.mrf.mxu0 }
 0x782   :  { %v3513_v56 = vrot.slane %v3507_v10, 1  ;;  %v3514_v46 = vrot.slane %v3507_v10, 2  ;;  %v3515_v59 = vrot.slane %v3507_v10, 3  ;;  %v3516_v57 = vrot.slane %v3507_v10, 4 }
 0x783   :  { %v3509_v21 = vpop.f32.mrf.mxu0  ;;  %v3517_v30 = vrot.slane %v3507_v10, 5  ;;  %v3518_v60 = vrot.slane %v3507_v10, 6  ;;  %v3519_v22 = vrot.slane %v3507_v10, 7  ;;  %v3528_v45 = vadd.f32 %v3507_v10, %v7213_v20  ;;  %v4428_v20 = vld [vmem:[%s6671_s7 + $0x8] sm:$0xff]  }
 0x784   :  { %v3529_v25 = vadd.f32 %v3513_v56, %v7209_v29  ;;  %v3530_v40 = vadd.f32 %v3514_v46, %v7210_v33  ;;  %v3531_v15 = vadd.f32 %v3515_v59, %v7211_v1  ;;  %v3532_v55 = vadd.f32 %v3516_v57, %v7212_v4  ;;  %4361 = vmatpush3.bf16.msra.mxu1 %v4428_v20 }
 0x785   :  { %v4359_v53 = vpop.f32.mrf.mxu0  ;;  %v3533_v32 = vadd.f32 %v3517_v30, %v7214_v11  ;;  %v3534_v27 = vadd.f32 %v3518_v60, %v7215_v39  ;;  %v3535_v47 = vadd.f32 %v3519_v22, %v7216_v14  ;;  %4362 = vmatprep.subr.bf16.mxu1 %v7204_v8  ;;  %v4267_v39 = vld [vmem:[%s6675_s11 + $0x4] ss:$0 sm:$0xff] }
 0x786   :  { %v3544_v18 = vrot.slane %v3529_v25, 7  ;;  %v3546_v36 = vrot.slane %v3530_v40, 6  ;;  %v3548_v19 = vrot.slane %v3531_v15, 5  ;;  %v3550_v44 = vrot.slane %v3532_v55, 4 }
 0x787   :  { %v3552_v26 = vrot.slane %v3533_v32, 3  ;;  %v3554_v58 = vrot.slane %v3534_v27, 2  ;;  %v3556_v34 = vrot.slane %v3535_v47, 1 }
 0x788   :  { %v3545_v49 = vsel %vm484_vm11, %v3544_v18, %v3528_v45 }
 0x789   :  { %v3547_v28 = vsel %vm487_vm12, %v3546_v36, %v3545_v49 }
 0x78a   :  { %v3549_v54 = vsel %vm490_vm13, %v3548_v19, %v3547_v28 }
 0x78b   :  { %v3551_v51 = vsel %vm493_vm14, %v3550_v44, %v3549_v54 }
 0x78c   :  { %v3553_v23 = vsel %vm496_vm15, %v3552_v26, %v3551_v51  ;;  %v4268_v26 = vld [vmem:[%s6675_s11 + $0x5] ss:$0 sm:$0xff] }
 0x78d   :  { %v3555_v42 = vsel %vm499_vm0, %v3554_v58, %v3553_v23 }
 0x78e   :  { %v3557_v0 = vsel %vm502_vm1, %v3556_v34, %v3555_v42 }
 0x78f   :  { %v3559_v63 = vsel %vm341_vm10, %v3557_v0, 0.0 }
 0x790   :  { %3560 = vadd.xlane.f32.xlu1 %v3559_v63 }
 0x819   :  { %v3561_v17 = vpop.xlane.xlu1 %3560 }
 0x81a   :  { %v3563_v38 = vmul.f32 0.03125, %v3561_v17 }
 0x81c   :  { %v3565_v61 = vrot.slane %v3563_v38, 1  ;;  %v3566_v3 = vrot.slane %v3563_v38, 2  ;;  %v3567_v52 = vrot.slane %v3563_v38, 3  ;;  %v3568_v31 = vrot.slane %v3563_v38, 4 }
 0x81d   :  { %v3569_v9 = vrot.slane %v3563_v38, 5  ;;  %v3570_v5 = vrot.slane %v3563_v38, 6  ;;  %v3571_v24 = vrot.slane %v3563_v38, 7  ;;  %v3580_v7 = vsub.f32 %v3528_v45, %v3563_v38  ;;  %v4429_v45 = vld [vmem:[%s6671_s7] sm:$0xff]  }
 0x81e   :  { %v3581_v43 = vsub.f32 %v3529_v25, %v3565_v61  ;;  %v3582_v37 = vsub.f32 %v3530_v40, %v3566_v3  ;;  %v3583_v41 = vsub.f32 %v3531_v15, %v3567_v52  ;;  %v3584_v2 = vsub.f32 %v3532_v55, %v3568_v31  ;;  %4363 = vmatpush3.bf16.msra.mxu1 %v4429_v45 }
 0x81f   :  { %v3585_v35 = vsub.f32 %v3533_v32, %v3569_v9  ;;  %v3586_v50 = vsub.f32 %v3534_v27, %v3570_v5  ;;  %v3587_v13 = vsub.f32 %v3535_v47, %v3571_v24  ;;  %v3588_v10 = vmul.f32 %v3580_v7, %v3580_v7  ;;  %4388 = vmatprep.subr.bf16.mxu1 %v7204_v8 }
 0x820   :  { %v3589_v48 = vmul.f32 %v3581_v43, %v3581_v43  ;;  %v3590_v62 = vmul.f32 %v3582_v37, %v3582_v37  ;;  %v3591_v6 = vmul.f32 %v3583_v41, %v3583_v41  ;;  %v3592_v12 = vmul.f32 %v3584_v2, %v3584_v2 }
 0x821   :  { %v3593_v16 = vmul.f32 %v3585_v35, %v3585_v35  ;;  %v3594_v59 = vmul.f32 %v3586_v50, %v3586_v50  ;;  %v3595_v57 = vmul.f32 %v3587_v13, %v3587_v13 }
 0x822   :  { %v3604_v56 = vrot.slane %v3589_v48, 7  ;;  %v3606_v46 = vrot.slane %v3590_v62, 6  ;;  %v3608_v30 = vrot.slane %v3591_v6, 5  ;;  %v3610_v22 = vrot.slane %v3592_v12, 4 }
 0x823   :  { %v3612_v25 = vrot.slane %v3593_v16, 3  ;;  %v3614_v40 = vrot.slane %v3594_v59, 2  ;;  %v3616_v15 = vrot.slane %v3595_v57, 1 }
 0x824   :  { %v3605_v21 = vsel %vm484_vm11, %v3604_v56, %v3588_v10 }
 0x825   :  { %v3607_v60 = vsel %vm487_vm12, %v3606_v46, %v3605_v21 }
 0x826   :  { %v3609_v29 = vsel %vm490_vm13, %v3608_v30, %v3607_v60 }
 0x827   :  { %v3611_v33 = vsel %vm493_vm14, %v3610_v22, %v3609_v29 }
 0x828   :  { %v3613_v1 = vsel %vm496_vm15, %v3612_v25, %v3611_v33 }
 0x829   :  { %v3615_v53 = vsel %vm499_vm0, %v3614_v40, %v3613_v1 }
 0x82a   :  { %v3617_v4 = vsel %vm502_vm1, %v3616_v15, %v3615_v53 }
 0x82b   :  { %v3619_v55 = vsel %vm341_vm10, %v3617_v4, 0.0 }
 0x82c   :  { %3620 = vadd.xlane.f32.xlu0 %v3619_v55 }
 0x8b5   :  { %v3621_v11 = vpop.xlane.xlu0 %3620 }
 0x8b6   :  { %v3622_v32 = vmul.f32 0.03125, %v3621_v11 }
 0x8b8   :  { %v3623_v18 = vadd.f32 1e-12, %v3622_v32 }
 0x8ba   :  { %4460 = vrsqrt.f32 %v3623_v18 }
 0x8c7   :  { %v4461_v36 = vpop.eup %4460 }
 0x8c8   :  { %v3626_v27 = vrot.slane %v4461_v36, 1  ;;  %v3627_v14 = vrot.slane %v4461_v36, 2  ;;  %v3628_v47 = vrot.slane %v4461_v36, 3  ;;  %v3629_v49 = vrot.slane %v4461_v36, 4 }
 0x8c9   :  { %v3630_v19 = vrot.slane %v4461_v36, 5  ;;  %v3631_v28 = vrot.slane %v4461_v36, 6  ;;  %v3632_v44 = vrot.slane %v4461_v36, 7  ;;  %v3641_v54 = vmul.f32 %v4461_v36, %v3580_v7 }
 0x8ca   :  { %v3642_v51 = vmul.f32 %v3626_v27, %v3581_v43  ;;  %v3643_v58 = vmul.f32 %v3627_v14, %v3582_v37  ;;  %v3644_v23 = vmul.f32 %v3628_v47, %v3583_v41  ;;  %v3645_v34 = vmul.f32 %v3629_v49, %v3584_v2  ;;  %v4430_v27 = vld [vmem:[%s6672_s8 + $0x38] sm:$0xff]   ;;  %v4431_v14 = vld [vmem:[%s6672_s8 + $0x30] sm:$0xff]   ;;  %v4432_v47 = vld [vmem:[%s6672_s8 + $0x28] sm:$0xff]  }
 0x8cb   :  { %v3646_v42 = vmul.f32 %v3630_v19, %v3585_v35  ;;  %v3647_v0 = vmul.f32 %v3631_v28, %v3586_v50  ;;  %v3648_v63 = vmul.f32 %v3632_v44, %v3587_v13  ;;  %v3653_v17 = vmul.f32 %v4267_v39, %v3641_v54  ;;  %4369 = vmatpush3.bf16.msra.mxu0 %v4430_v27  ;;  %v4433_v49 = vld [vmem:[%s6672_s8 + $0x20] sm:$0xff]   ;;  %v4434_v19 = vld [vmem:[%s6672_s8 + $0x18] sm:$0xff]   ;;  %v4435_v28 = vld [vmem:[%s6672_s8 + $0x10] sm:$0xff]  }
 0x8cc   :  { %v3654_v38 = vmul.f32 %v4267_v39, %v3642_v51  ;;  %v3655_v61 = vmul.f32 %v4267_v39, %v3643_v58  ;;  %v3656_v3 = vmul.f32 %v4267_v39, %v3644_v23  ;;  %v3657_v52 = vmul.f32 %v4267_v39, %v3645_v34  ;;  %4370 = vmatprep.subr.bf16.mxu0 %v7204_v8  ;;  %v4436_v44 = vld [vmem:[%s6672_s8 + $0x8] sm:$0xff]   ;;  %v4437_v54 = vld [vmem:[%s6672_s8] sm:$0xff]  }
 0x8cd   :  { %v3658_v31 = vmul.f32 %v4267_v39, %v3646_v42  ;;  %v3659_v9 = vmul.f32 %v4267_v39, %v3647_v0  ;;  %v3660_v5 = vmul.f32 %v4267_v39, %v3648_v63  ;;  %v6520_v24 = vadd.f32 %v4268_v26, %v3653_v17 }
 0x8ce   :  { %v6522_v7 = vadd.f32 %v4268_v26, %v3654_v38  ;;  %v6524_v48 = vadd.f32 %v4268_v26, %v3655_v61  ;;  %v6526_v43 = vadd.f32 %v4268_v26, %v3656_v3  ;;  %v6528_v37 = vadd.f32 %v4268_v26, %v3657_v52 }
 0x8cf   :  { %v6530_v41 = vadd.f32 %v4268_v26, %v3658_v31  ;;  %v6532_v2 = vadd.f32 %v4268_v26, %v3659_v9  ;;  %v6534_v35 = vadd.f32 %v4268_v26, %v3660_v5  ;;  %v3673_v50 = vpack.c.bf16 %v6520_v24, %v6520_v24  ;;  %4371 = vmatpush3.bf16.msra.mxu0 %v4431_v14  ;;  %v4269_v26 = vld [vmem:[%s6675_s11 + $0x6] ss:$0 sm:$0xff] }
 0x8d0   :  { %v3674_v13 = vpack.c.bf16 %v6522_v7, %v6522_v7  ;;  %v3675_v62 = vpack.c.bf16 %v6524_v48, %v6524_v48  ;;  %v3676_v6 = vpack.c.bf16 %v6526_v43, %v6526_v43  ;;  %v3677_v12 = vpack.c.bf16 %v6528_v37, %v6528_v37  ;;  %4372 = vmatprep.subr.bf16.mxu0 %v7204_v8 }
 0x8d1   :  { %v3678_v10 = vpack.c.bf16 %v6530_v41, %v6530_v41  ;;  %v3679_v16 = vpack.c.bf16 %v6532_v2, %v6532_v2  ;;  %v3680_v56 = vpack.c.bf16 %v6534_v35, %v6534_v35  ;;  %v3697_v30 = vunpack.c.l.b16 %v3673_v50  ;;  %v4273_v50 = vld [vmem:[%s6675_s11 + $0x7] ss:$0 sm:$0xff] }
 0x8d2   :  { %v3698_v46 = vunpack.c.l.b16 %v3674_v13  ;;  %v3699_v59 = vunpack.c.l.b16 %v3675_v62  ;;  %v3700_v57 = vunpack.c.l.b16 %v3676_v6  ;;  %v3701_v21 = vunpack.c.l.b16 %v3677_v12 }
 0x8d3   :  { %v3702_v60 = vunpack.c.l.b16 %v3678_v10  ;;  %v3703_v25 = vunpack.c.l.b16 %v3679_v16  ;;  %v3704_v33 = vunpack.c.l.b16 %v3680_v56  ;;  %4373 = vmatpush3.bf16.msra.mxu0 %v4432_v47 }
 0x8d4   :  { %v3705_v22 = vrot.slane %v3698_v46, 7  ;;  %v3707_v29 = vrot.slane %v3699_v59, 6  ;;  %v3709_v1 = vrot.slane %v3700_v57, 5  ;;  %v3711_v53 = vrot.slane %v3701_v21, 4  ;;  %4374 = vmatprep.subr.bf16.mxu0 %v7204_v8 }
 0x8d5   :  { %v3713_v55 = vrot.slane %v3702_v60, 3  ;;  %v3715_v45 = vrot.slane %v3703_v25, 2  ;;  %v3717_v32 = vrot.slane %v3704_v33, 1 }
 0x8d6   :  { %v3706_v40 = vsel %vm484_vm11, %v3705_v22, %v3697_v30 }
 0x8d7   :  { %v3708_v15 = vsel %vm487_vm12, %v3707_v29, %v3706_v40  ;;  %4375 = vmatpush3.bf16.msra.mxu0 %v4433_v49 }
 0x8d8   :  { %v3710_v4 = vsel %vm490_vm13, %v3709_v1, %v3708_v15  ;;  %4376 = vmatprep.subr.bf16.mxu0 %v7204_v8 }
 0x8d9   :  { %v3712_v20 = vsel %vm493_vm14, %v3711_v53, %v3710_v4 }
 0x8da   :  { %v3714_v11 = vsel %vm496_vm15, %v3713_v55, %v3712_v20 }
 0x8db   :  { %v3716_v18 = vsel %vm499_vm0, %v3715_v45, %v3714_v11  ;;  %4377 = vmatpush3.bf16.msra.mxu0 %v4434_v19 }
 0x8dc   :  { %v3718_v36 = vsel %vm502_vm1, %v3717_v32, %v3716_v18  ;;  %4378 = vmatprep.subr.bf16.mxu0 %v7204_v8 }
 0x8dd   :  { %v3719_v39 = vpack.c.b16 %v3718_v36, %v3718_v36 }
 0x8df   :  { %4365 = vmatmul.mubr.msk.bf16.vlgmr.msra.gmra.mxu1 %vm341_vm10, %v3719_v39  ;;  %4379 = vmatpush3.bf16.msra.mxu0 %v4435_v28 }
 0x8e0   :  { %4392 = vmatprep.mubr.msk.bf16.mxu1 %vm4559_vm9, %v7204_v8  ;;  %4380 = vmatprep.subr.bf16.mxu0 %v7204_v8 }
 0x8e3   :  { %4381 = vmatpush3.bf16.msra.mxu0 %v4436_v44 }
 0x8e4   :  { %4382 = vmatprep.subr.bf16.mxu0 %v7204_v8 }
 0x8e7   :  { %4383 = vmatpush3.bf16.msra.mxu0 %v4437_v54 }
 0x99f   :  { %v3769_v51 = vpop.f32.mrf.mxu1 }
 0x9a0   :  { %v3770_v58 = vadd.f32 %v4269_v26, %v3769_v51 }
 0x9a1   :  { %v4366_v23 = vpop.f32.mrf.mxu1 }
 0x9a2   :  { %v3776_v34 = vmul.f32 0.044715, %v3770_v58  ;;  %v3775_v52 = vmul.f32 0.5, %v3770_v58 }
 0x9a3   :  { %v3772_v42 = vpop.f32.mrf.mxu1 }
 0x9a4   :  { %v3777_v0 = vmul.f32 %v3776_v34, %v3770_v58 }
 0x9a5   :  { %v4367_v63 = vpop.f32.mrf.mxu1 }
 0x9a6   :  { %v3778_v17 = vmul.f32 %v3777_v0, %v3770_v58 }
 0x9a8   :  { %v3779_v38 = vadd.f32 %v3778_v17, %v3770_v58 }
 0x9aa   :  { %v3780_v61 = vmul.f32 0.7978846, %v3779_v38 }
 0x9ac   :  { %4462 = vtanh.f32 %v3780_v61 }
 0x9b9   :  { %v4463_v3 = vpop.eup %4462 }
 0x9ba   :  { %v3782_v31 = vadd.f32 1.0, %v4463_v3 }
 0x9bc   :  { %v3783_v9 = vmul.f32 %v3782_v31, %v3775_v52 }
 0x9be   :  { %v3784_v5 = vpack.c.bf16 %v3783_v9, %v3783_v9 }
 0x9c0   :  { %4385 = vmatmul.mubr.bf16.vlgmr.msra.gmra.mxu0 %v3784_v5 }
 0xa80   :  { %v3887_v13 = vpop.f32.mrf.mxu0 }
 0xa81   :  { %v3888_v62 = vadd.f32 %v4273_v50, %v3887_v13 }
 0xa82   :  { %v4386_v6 = vpop.f32.mrf.mxu0 }
 0xa83   :  { %v3894_v12 = vrot.slane %v3888_v62, 1  ;;  %v3895_v10 = vrot.slane %v3888_v62, 2  ;;  %v3896_v16 = vrot.slane %v3888_v62, 3  ;;  %v3897_v56 = vrot.slane %v3888_v62, 4 }
 0xa84   :  { %v3890_v46 = vpop.f32.mrf.mxu0  ;;  %v3898_v59 = vrot.slane %v3888_v62, 5  ;;  %v3899_v57 = vrot.slane %v3888_v62, 6  ;;  %v3900_v21 = vrot.slane %v3888_v62, 7  ;;  %v3909_v33 = vadd.f32 %v3888_v62, %v6520_v24 }
 0xa85   :  { %v3910_v30 = vadd.f32 %v3894_v12, %v6522_v7  ;;  %v3911_v60 = vadd.f32 %v3895_v10, %v6524_v48  ;;  %v3912_v22 = vadd.f32 %v3896_v16, %v6526_v43  ;;  %v3913_v25 = vadd.f32 %v3897_v56, %v6528_v37 }
 0xa86   :  { %v4387_v29 = vpop.f32.mrf.mxu0  ;;  %v3914_v40 = vadd.f32 %v3898_v59, %v6530_v41  ;;  %v3915_v53 = vadd.f32 %v3899_v57, %v6532_v2  ;;  %v3916_v4 = vadd.f32 %v3900_v21, %v6534_v35 }
 0xa87   :  { %v3925_v1 = vrot.slane %v3910_v30, 7  ;;  %v3927_v15 = vrot.slane %v3911_v60, 6  ;;  %v3929_v7 = vrot.slane %v3912_v22, 5  ;;  %v3931_v20 = vrot.slane %v3913_v25, 4 }
 0xa88   :  { %v3933_v45 = vrot.slane %v3914_v40, 3  ;;  %v3935_v24 = vrot.slane %v3915_v53, 2  ;;  %v3937_v11 = vrot.slane %v3916_v4, 1 }
 0xa89   :  { %v3926_v55 = vsel %vm484_vm11, %v3925_v1, %v3909_v33  ;;  %v4282_v1 = vld [vmem:[%s6675_s11 + $0x8] ss:$0 sm:$0xff] }
 0xa8a   :  { %v3928_v48 = vsel %vm487_vm12, %v3927_v15, %v3926_v55 }
 0xa8b   :  { %v3930_v43 = vsel %vm490_vm13, %v3929_v7, %v3928_v48 }
 0xa8c   :  { %v3932_v37 = vsel %vm493_vm14, %v3931_v20, %v3930_v43 }
 0xa8d   :  { %v3934_v41 = vsel %vm496_vm15, %v3933_v45, %v3932_v37  ;;  %v4283_v45 = vld [vmem:[%s6675_s11 + $0x9] ss:$0 sm:$0xff] }
 0xa8e   :  { %v3936_v32 = vsel %vm499_vm0, %v3935_v24, %v3934_v41 }
 0xa8f   :  { %v3938_v2 = vsel %vm502_vm1, %v3937_v11, %v3936_v32 }
 0xa90   :  { %v3940_v35 = vsel %vm341_vm10, %v3938_v2, 0.0 }
 0xa91   :  { %3941 = vadd.xlane.f32.xlu0 %v3940_v35 }
 0xb1a   :  { %v3942_v18 = vpop.xlane.xlu0 %3941 }
 0xb1b   :  { %v3943_v36 = vmul.f32 0.03125, %v3942_v18 }
 0xb1d   :  { %v3945_v39 = vrot.slane %v3943_v36, 1  ;;  %v3946_v27 = vrot.slane %v3943_v36, 2  ;;  %v3947_v14 = vrot.slane %v3943_v36, 3  ;;  %v3948_v47 = vrot.slane %v3943_v36, 4 }
 0xb1e   :  { %v3949_v49 = vrot.slane %v3943_v36, 5  ;;  %v3950_v19 = vrot.slane %v3943_v36, 6  ;;  %v3951_v28 = vrot.slane %v3943_v36, 7  ;;  %v3960_v44 = vsub.f32 %v3909_v33, %v3943_v36 }
 0xb1f   :  { %v3961_v54 = vsub.f32 %v3910_v30, %v3945_v39  ;;  %v3962_v26 = vsub.f32 %v3911_v60, %v3946_v27  ;;  %v3963_v51 = vsub.f32 %v3912_v22, %v3947_v14  ;;  %v3964_v58 = vsub.f32 %v3913_v25, %v3948_v47  ;;  %v4438_v60 = vld [vmem:[%s6673_s9 + $0x8] sm:$0xff]   ;;  %v4439_v22 = vld [vmem:[%s6673_s9] sm:$0xff]  }
 0xb20   :  { %v3965_v23 = vsub.f32 %v3914_v40, %v3949_v49  ;;  %v3966_v34 = vsub.f32 %v3915_v53, %v3950_v19  ;;  %v3967_v42 = vsub.f32 %v3916_v4, %v3951_v28  ;;  %v3968_v61 = vmul.f32 %v3960_v44, %v3960_v44  ;;  %4389 = vmatpush3.bf16.msra.mxu1 %v4438_v60 }
 0xb21   :  { %v3969_v0 = vmul.f32 %v3961_v54, %v3961_v54  ;;  %v3970_v63 = vmul.f32 %v3962_v26, %v3962_v26  ;;  %v3971_v17 = vmul.f32 %v3963_v51, %v3963_v51  ;;  %v3972_v38 = vmul.f32 %v3964_v58, %v3964_v58  ;;  %4390 = vmatprep.subr.bf16.mxu1 %v7204_v8 }
 0xb22   :  { %v3973_v3 = vmul.f32 %v3965_v23, %v3965_v23  ;;  %v3974_v9 = vmul.f32 %v3966_v34, %v3966_v34  ;;  %v3975_v5 = vmul.f32 %v3967_v42, %v3967_v42 }
 0xb23   :  { %v3984_v52 = vrot.slane %v3969_v0, 7  ;;  %v3986_v31 = vrot.slane %v3970_v63, 6  ;;  %v3988_v13 = vrot.slane %v3971_v17, 5  ;;  %v3990_v6 = vrot.slane %v3972_v38, 4 }
 0xb24   :  { %v3992_v10 = vrot.slane %v3973_v3, 3  ;;  %v3994_v56 = vrot.slane %v3974_v9, 2  ;;  %v3996_v59 = vrot.slane %v3975_v5, 1  ;;  %4391 = vmatpush3.bf16.msra.mxu1 %v4439_v22 }
 0xb25   :  { %v3985_v50 = vsel %vm484_vm11, %v3984_v52, %v3968_v61  ;;  %4396 = vmatprep.subr.bf16.mxu1 %v7204_v8 }
 0xb26   :  { %v3987_v62 = vsel %vm487_vm12, %v3986_v31, %v3985_v50 }
 0xb27   :  { %v3989_v12 = vsel %vm490_vm13, %v3988_v13, %v3987_v62 }
 0xb28   :  { %v3991_v16 = vsel %vm493_vm14, %v3990_v6, %v3989_v12 }
 0xb29   :  { %v3993_v46 = vsel %vm496_vm15, %v3992_v10, %v3991_v16 }
 0xb2a   :  { %v3995_v57 = vsel %vm499_vm0, %v3994_v56, %v3993_v46 }
 0xb2b   :  { %v3997_v21 = vsel %vm502_vm1, %v3996_v59, %v3995_v57 }
 0xb2c   :  { %v3999_v30 = vsel %vm341_vm10, %v3997_v21, 0.0 }
 0xb2d   :  { %4000 = vadd.xlane.f32.xlu1 %v3999_v30 }
 0xbb6   :  { %v4001_v29 = vpop.xlane.xlu1 %4000 }
 0xbb7   :  { %v4002_v25 = vmul.f32 0.03125, %v4001_v29 }
 0xbb9   :  { %v4003_v33 = vadd.f32 1e-12, %v4002_v25 }
 0xbbb   :  { %4464 = vrsqrt.f32 %v4003_v33 }
 0xbc8   :  { %v4465_v40 = vpop.eup %4464 }
 0xbc9   :  { %v4006_v15 = vrot.slane %v4465_v40, 1  ;;  %v4007_v53 = vrot.slane %v4465_v40, 2  ;;  %v4008_v4 = vrot.slane %v4465_v40, 3  ;;  %v4009_v55 = vrot.slane %v4465_v40, 4 }
 0xbca   :  { %v4010_v7 = vrot.slane %v4465_v40, 5  ;;  %v4011_v48 = vrot.slane %v4465_v40, 6  ;;  %v4012_v20 = vrot.slane %v4465_v40, 7  ;;  %v4021_v43 = vmul.f32 %v4465_v40, %v3960_v44 }
 0xbcb   :  { %v4022_v37 = vmul.f32 %v4006_v15, %v3961_v54  ;;  %v4023_v24 = vmul.f32 %v4007_v53, %v3962_v26  ;;  %v4024_v41 = vmul.f32 %v4008_v4, %v3963_v51  ;;  %v4025_v11 = vmul.f32 %v4009_v55, %v3964_v58  ;;  %v4440_v15 = vld [vmem:[%s6674_s10 + $0x8] sm:$0xff]   ;;  %v4441_v53 = vld [vmem:[%s6674_s10] sm:$0xff]   ;;  %s4561_s10 = smov [#allocation8]  }
 0xbcc   :  { %v4026_v32 = vmul.f32 %v4010_v7, %v3965_v23  ;;  %v4027_v2 = vmul.f32 %v4011_v48, %v3966_v34  ;;  %v4028_v35 = vmul.f32 %v4012_v20, %v3967_v42  ;;  %v4033_v18 = vmul.f32 %v4282_v1, %v4021_v43  ;;  %v4284_v4 = vld [vmem:[%s6675_s11 + $0xa] ss:$0 sm:$0xff]  ;;  %s4227_s1 = sshll.u32 %s4561_s10, 4  ;;  %s4228_s1 = int_to_ptr.vmem [resolvable:$true] %s4227_s1 }
 0xbcd   :  { %v4034_v36 = vmul.f32 %v4282_v1, %v4022_v37  ;;  %v4035_v39 = vmul.f32 %v4282_v1, %v4023_v24  ;;  %v4036_v27 = vmul.f32 %v4282_v1, %v4024_v41  ;;  %v4037_v14 = vmul.f32 %v4282_v1, %v4025_v11  ;;  %v4288_v24 = vld [vmem:[%s6675_s11 + $0xb] ss:$0 sm:$0xff]  ;;  %s4528_s16 = scalar_lea.vmem %s4228_s1, 128  ;;  %p4533_p2 = scmp.lt.s32.totalorder %s4228_s1, %s4228_s1 }
 0xbce   :  { %v4038_v47 = vmul.f32 %v4282_v1, %v4026_v32  ;;  %v4039_v49 = vmul.f32 %v4282_v1, %v4027_v2  ;;  %v4040_v19 = vmul.f32 %v4282_v1, %v4028_v35  ;;  %v4045_v28 = vadd.f32 %v4283_v45, %v4033_v18  ;;  %p4529_p1 = scmp.ne.s32.totalorder %s4228_s1, %s4528_s16  ;;  %p4534_p3 = scmp.lt.s32.totalorder %s4528_s16, %s4528_s16 }
 0xbcf   :  { %v4046_v44 = vadd.f32 %v4283_v45, %v4034_v36  ;;  %v4047_v0 = vadd.f32 %v4283_v45, %v4035_v39  ;;  %v4048_v63 = vadd.f32 %v4283_v45, %v4036_v27  ;;  %v4049_v17 = vadd.f32 %v4283_v45, %v4037_v14 }
 0xbd0   :  { %v4050_v54 = vadd.f32 %v4283_v45, %v4038_v47  ;;  %v4051_v26 = vadd.f32 %v4283_v45, %v4039_v49  ;;  %v4052_v51 = vadd.f32 %v4283_v45, %v4040_v19  ;;  %v4053_v58 = vpack.c.bf16 %v4045_v28, %v4045_v28  ;;  %p4535_p4 = por %p4534_p3, %p4533_p2 }
 0xbd1   :  { %v4054_v23 = vpack.c.bf16 %v4046_v44, %v4046_v44  ;;  %v4055_v34 = vpack.c.bf16 %v4047_v0, %v4047_v0  ;;  %v4056_v42 = vpack.c.bf16 %v4048_v63, %v4048_v63  ;;  %v4057_v38 = vpack.c.bf16 %v4049_v17, %v4049_v17 }
 0xbd2   :  { %v4058_v61 = vpack.c.bf16 %v4050_v54, %v4050_v54  ;;  %v4059_v3 = vpack.c.bf16 %v4051_v26, %v4051_v26  ;;  %v4060_v52 = vpack.c.bf16 %v4052_v51, %v4052_v51  ;;  %v4077_v13 = vunpack.c.l.b16 %v4053_v58  ;;  %p4536_p5 = pnand %p4535_p4, %p4529_p1 }
 0xbd3   :  { %v4078_v31 = vunpack.c.l.b16 %v4054_v23  ;;  %v4079_v9 = vunpack.c.l.b16 %v4055_v34  ;;  %v4080_v5 = vunpack.c.l.b16 %v4056_v42  ;;  %v4081_v50 = vunpack.c.l.b16 %v4057_v38 }
 0xbd4   :  { %v4082_v62 = vunpack.c.l.b16 %v4058_v61  ;;  %v4083_v10 = vunpack.c.l.b16 %v4059_v3  ;;  %v4084_v16 = vunpack.c.l.b16 %v4060_v52 }
 0xbd5   :  { %v4085_v6 = vrot.slane %v4078_v31, 7  ;;  %v4087_v12 = vrot.slane %v4079_v9, 6  ;;  %v4089_v46 = vrot.slane %v4080_v5, 5  ;;  %v4091_v57 = vrot.slane %v4081_v50, 4 }
 0xbd6   :  { %v4093_v30 = vrot.slane %v4082_v62, 3  ;;  %v4095_v22 = vrot.slane %v4083_v10, 2  ;;  %v4097_v25 = vrot.slane %v4084_v16, 1 }
 0xbd7   :  { %v4086_v56 = vsel %vm484_vm11, %v4085_v6, %v4077_v13 }
 0xbd8   :  { %v4088_v59 = vsel %vm487_vm12, %v4087_v12, %v4086_v56 }
 0xbd9   :  { %v4090_v21 = vsel %vm490_vm13, %v4089_v46, %v4088_v59 }
 0xbda   :  { %v4092_v60 = vsel %vm493_vm14, %v4091_v57, %v4090_v21 }
 0xbdb   :  { %v4094_v29 = vsel %vm496_vm15, %v4093_v30, %v4092_v60 }
 0xbdc   :  { %v4096_v33 = vsel %vm499_vm0, %v4095_v22, %v4094_v29 }
 0xbdd   :  { %v4098_v40 = vsel %vm502_vm1, %v4097_v25, %v4096_v33 }
 0xbde   :  { %v4099_v1 = vpack.c.b16 %v4098_v40, %v4098_v40 }
 0xbe0   :  { %4393 = vmatmul.mubr.msk.bf16.vlgmr.msra.gmra.mxu1 %vm341_vm10, %v4099_v1 }
 0xbe1   :  { %4400 = vmatprep.mubr.msk.bf16.mxu1 %vm4559_vm9, %v7204_v8  ;;  %4397 = vmatpush3.bf16.msra.mxu1 %v4440_v15 }
 0xbe2   :  { %4398 = vmatprep.subr.bf16.mxu1 %v7204_v8 }
 0xbe5   :  { %4399 = vmatpush3.bf16.msra.mxu1 %v4441_v53 }
 0xca0   :  { %v4149_v55 = vpop.f32.mrf.mxu1 }
 0xca1   :  { %v4150_v7 = vadd.f32 %v4284_v4, %v4149_v55 }
 0xca2   :  { %v4394_v48 = vpop.f32.mrf.mxu1 }
 0xca3   :  { %4466 = vtanh.f32 %v4150_v7 }
 0xca4   :  { %v4152_v20 = vpop.f32.mrf.mxu1 }
 0xca6   :  { %v4395_v43 = vpop.f32.mrf.mxu1 }
 0xcb0   :  { %v4467_v45 = vpop.eup %4466 }
 0xcb1   :  { %v4156_v37 = vpack.c.bf16 %v4467_v45, %v4467_v45 }
 0xcb3   :  { %4401 = vmatmul.mubr.msk.bf16.vlgmr.msra.gmra.mxu1 %vm341_vm10, %v4156_v37 }
 0xd73   :  { %v4214_v8 = vpop.f32.mrf.mxu1 }
 0xd74   :  { %v4215_v41 = vadd.f32 %v4288_v24, %v4214_v8 }
 0xd75   :  { %v4402_v11 = vpop.f32.mrf.mxu1 }
 0xd76   :  { %4220 = vst [vmem:[#allocation8] sm:$0xff] %v4215_v41 }
 0xd77   :  { %v4217_v32 = vpop.f32.mrf.mxu1 }
 0xd78   :  { %4539 = shalt.err (!%p4536_p5)
}
 0xd79   :  { %4230 = dma.vmem_to_hbm [thread:$0]  %s4228_s1, 128, %s6676_s12, [#allocation4]   ;;  %v4403_v2 = vpop.f32.mrf.mxu1 }
 0xd7a   :  { %4552 = dma.done.wait [#allocation4], 128  }
 0xd7b   :  { %4553 = vsyncadd [#allocation4], 4294967168 }
 0xd7c   :  { %4234 = vsyncpa [#allocation3], 1 }
 0xd7d   :  { %4235 = vsyncpa [#allocation6], 1 }
 0xd7e   :  { %4236 = vsyncpa [#allocation4], 1 }

</bundles_post_ra>
